<compile_context>
chip_gen: v7x
topology: tpu7x:2x2x1
jax: 0.10.0
libtpu: 0.0.40
codegen_flags: <defaults>
</compile_context>

<pallas_src>
import math

import jax
import jax.numpy as jnp
from jax import lax
from jax.experimental import pallas as pl
from jax.experimental.pallas import tpu as pltpu


def _silu(t):
    return t * jax.nn.sigmoid(t)


# ================= Kernel 1: chunked EMA + fused K/V projections =============
def ema_kv_kernel(x_ref, exp_ref, red_ref, dec_ref, carry_ref,
                  wqk_ref, bqk_ref, gamma_ref, beta_ref, wv_ref, bv_ref,
                  ema_ref, k_ref, v_ref, state_scr):
    """Causal multi-headed EMA + K/V projections for one (batch, chunk) tile.

    e_h[t] = alpha_h*xe_h[t] + q_h*e_h[t-1],  q_h = (1-alpha_h)*damp_h
    Chunked: e[c*Tc+i] = (decay_block @ xe_chunk)[i] + q^(i+1) * state, with the
    (H, D) state carried across chunks in VMEM scratch.  This is exactly the
    causal correlation conv1d_fft computes in the PyTorch module.

    CORRECTNESS NOTE: the carried state requires the chunk axis to be the
    innermost grid axis and marked "arbitrary" (sequential); it is re-inited at
    c == 0.  Do not reorder the grid or mark the chunk axis "parallel".
    """
    c = pl.program_id(1)

    @pl.when(c == 0)
    def _init():
        state_scr[...] = jnp.zeros(state_scr.shape, jnp.float32)

    x = x_ref[0]                                          # (Tc, D)  f32
    xe = x[None, :, :] * exp_ref[...]                     # (H, Tc, D) expansion
    # intra-chunk causal decay: batched-over-heads MXU matmul, kept f32
    # (recurrence accuracy matters; FLOPs here are negligible).
    intra = jnp.einsum('hij,hjd->hid', dec_ref[...], xe,
                       preferred_element_type=jnp.float32)
    e = intra + carry_ref[...] * state_scr[...][:, None, :]   # (H, Tc, D)
    state_scr[...] = e[:, -1, :]                          # carry to next chunk
    ema = jnp.sum(e * red_ref[...], axis=0)               # head reduce -> (Tc, D)
    ema_ref[0, :, :] = ema.astype(ema_ref.dtype)          # bf16 HBM write

    # key projection (from ema) -- hoisted out of the attention hot loop.
    qk = _silu(jnp.dot(ema.astype(jnp.bfloat16), wqk_ref[...],
                       preferred_element_type=jnp.float32) + bqk_ref[...])
    k = qk * gamma_ref[1:2, :] + beta_ref[1:2, :]
    k_ref[0, :, :] = k.astype(k_ref.dtype)                # bf16

    # value projection (from x) -- also hoisted.
    v = _silu(jnp.dot(x.astype(jnp.bfloat16), wv_ref[...],
                      preferred_element_type=jnp.float32) + bv_ref[...])
    v_ref[0, :, :] = v.astype(v_ref.dtype)                # bf16


# ================= Kernel 2: flash attention + gated update ==================
def attn_gate_kernel(emaq_ref, xq_ref, k_ref, v_ref, bias_ref,
                     wf_ref, bf_ref, gamma_ref, beta_ref, uh_ref,
                     out_ref,
                     proj_scr, q_scr, m_scr, l_scr, acc_scr):
    qi = pl.program_id(1)
    kj = pl.program_id(2)
    nk = pl.num_programs(2)

    Tq, D = emaq_ref.shape[1], emaq_ref.shape[2]
    Tk = k_ref.shape[1]
    dqk = q_scr.shape[1]
    dv = acc_scr.shape[1]

    @pl.when(kj == 0)
    def _init():
        # Fused lane-dense projection of the query-tile ema (one MXU pass):
        #   columns = [ update(D) | reset(dv) | Wh-part(D)(+bh) | qk(dqk) ]
        proj = jnp.dot(emaq_ref[0], wf_ref[...],
                       preferred_element_type=jnp.float32) + bf_ref[...]
        proj_scr[...] = proj
        qk = _silu(proj[:, D + dv + D:])
        q = qk * gamma_ref[0:1, :] + beta_ref[0:1, :]
        # NOTE: Mega scales by (attention-input dim)**-0.5, i.e. the model dim
        # D of ema_output (matches the PyTorch module), not dim_qk.  Fold the
        # scale into q once instead of scaling every (Tq, Tk) sim tile.
        q_scr[...] = q * (1.0 / math.sqrt(D))
        m_scr[...] = jnp.full(m_scr.shape, -jnp.inf, jnp.float32)
        l_scr[...] = jnp.zeros(l_scr.shape, jnp.float32)
        acc_scr[...] = jnp.zeros(acc_scr.shape, jnp.float32)

    # Skip key tiles that lie entirely above the causal diagonal (their K/V/bias
    # DMAs are also elided via the clamped index_maps in the wrapper).
    live = kj * Tk <= qi * Tq + (Tq - 1)

    @pl.when(live)
    def _attend():
        k = k_ref[0]                                       # (Tk, dqk) bf16
        v = v_ref[0]                                       # (Tk, dv)  bf16
        sim = jnp.einsum('id,jd->ij', q_scr[...].astype(jnp.bfloat16), k,
                         preferred_element_type=jnp.float32) + bias_ref[0]

        def _accumulate(s):
            m_new = jnp.maximum(m_scr[...], jnp.max(s, axis=-1, keepdims=True))
            alpha = jnp.exp(m_scr[...] - m_new)
            p = jnp.exp(s - m_new)        # masked entries underflow to exact 0
            l_scr[...] = alpha * l_scr[...] + jnp.sum(p, axis=-1, keepdims=True)
            acc_scr[...] = alpha * acc_scr[...] + jnp.dot(
                p.astype(jnp.bfloat16), v, preferred_element_type=jnp.float32)
            m_scr[...] = m_new

        # Only diagonal tiles contain masked entries; interior tiles skip the
        # iota/compare/where entirely (VPU savings, esp. v5e).
        has_masked = kj * Tk + (Tk - 1) > qi * Tq

        @pl.when(jnp.logical_not(has_masked))
        def _full_tile():
            _accumulate(sim)

        @pl.when(has_masked)
        def _diag_tile():
            row = qi * Tq + lax.broadcasted_iota(jnp.int32, (Tq, Tk), 0)
            col = kj * Tk + lax.broadcasted_iota(jnp.int32, (Tq, Tk), 1)
            # With tq == tk every live row owns >= 1 allowed column, so -1e30
            # entries underflow exp() to exactly 0 and can never NaN a row.
            _accumulate(jnp.where(col <= row, sim, -1e30))

    # --- finalize: gates + gated residual update ---
    @pl.when(kj == nk - 1)
    def _fin():
        proj = proj_scr[...]
        update = jax.nn.sigmoid(proj[:, :D])
        reset = _silu(proj[:, D:D + dv])
        wh_ema = proj[:, D + dv:D + dv + D]               # already includes bh
        attn_out = acc_scr[...] * pl.reciprocal(l_scr[...], approx=True)
        gated = attn_out * reset
        hidden = _silu(wh_ema + jnp.dot(gated.astype(jnp.bfloat16), uh_ref[...],
                                        preferred_element_type=jnp.float32))
        out = update * hidden + (1.0 - update) * xq_ref[0]   # residual = x
        out_ref[0, :, :] = out.astype(out_ref.dtype)


# ------------------------------- wrapper --------------------------------------
def _full2(a):
    nd = a.ndim
    return pl.BlockSpec(a.shape, lambda b, c, _n=nd: (0,) * _n)


def _full3(a):
    nd = a.ndim
    return pl.BlockSpec(a.shape, lambda b, i, j, _n=nd: (0,) * _n)


def build_rel_pos_bias_tiles(ndiag, t, emb, scale, num_buckets=32, max_distance=128):
    """(ndiag, t, t) tiles: the T5 bias is Toeplitz in (i - j), so only the N//t
    distinct block-diagonal offsets are materialized (no (N, N) array).  Tile d
    holds bias for query rows d*t..d*t+t-1 against key cols 0..t-1."""
    d = jnp.arange(ndiag)[:, None, None]
    a = jnp.arange(t)[None, :, None]
    b = jnp.arange(t)[None, None, :]
    n = jnp.maximum(d * t + a - b, 0)                     # = max(q_pos - k_pos, 0)
    max_exact = num_buckets // 2
    is_small = n < max_exact
    nf = jnp.maximum(n, 1).astype(jnp.float32)
    val_if_large = max_exact + (jnp.log(nf / max_exact)
                                / math.log(max_distance / max_exact)
                                * (num_buckets - max_exact)).astype(jnp.int32)
    val_if_large = jnp.minimum(val_if_large, num_buckets - 1)
    bucket = jnp.where(is_small, n, val_if_large)
    # Kept f32 so the kernel stays within the f32-reference tolerance;
    # TODO(synk): flip to bf16 to halve the largest remaining per-step stream.
    return (emb[bucket, 0] * scale).astype(jnp.float32)


def mega_layer_pallas(x, params, *, tc=256, tq=256, tk=256,
                      vmem_limit_bytes=32 * 1024 * 1024, kv_buffers=None):
    B, N, D = x.shape
    H = params['expansion'].shape[0]
    dqk = params['wqk'].shape[1]
    dv = params['wv'].shape[1]
    tc, tq, tk = min(tc, N), min(tq, N), min(tk, N)
    assert N % tc == 0 and N % tq == 0 and N % tk == 0
    # tq == tk is assumed by the causal-tile skip, the clamped key-axis
    # index_maps and the Toeplitz bias tiling below.
    assert tq == tk

    # ------- chunk-local EMA tables (never materialize (H, N, N)) -------------
    alpha = jax.nn.sigmoid(params['alphas'])
    damp = jax.nn.sigmoid(params['dampen'])
    qf = (1.0 - alpha) * damp                                        # (H,)
    ii = jnp.arange(tc)[:, None]
    jj = jnp.arange(tc)[None, :]
    pw = jnp.maximum(ii - jj, 0).astype(jnp.float32)
    tri = (ii >= jj).astype(jnp.float32)
    dec_blk = (alpha[:, None, None] * (qf[:, None, None] ** pw[None]) *
               tri[None]).astype(jnp.float32)                        # (H,tc,tc)
    carry = (qf[:, None] ** jnp.arange(1, tc + 1, dtype=jnp.float32)[None, :]
             )[:, :, None].astype(jnp.float32)                       # (H,tc,1)
    exp_w = params['expansion'][:, None, :].astype(jnp.float32)      # (H,1,D)
    red_w = params['reduction'][:, None, :].astype(jnp.float32)      # (H,1,D)

    wqk_bf = params['wqk'].astype(jnp.bfloat16)
    wv_bf = params['wv'].astype(jnp.bfloat16)
    uh_bf = params['Uh'].astype(jnp.bfloat16)

    nchunk = N // tc
    flops1 = 2 * B * H * N * tc * D + 2 * B * N * D * (dqk + dv) + 4 * B * H * N * D
    trans1 = 2 * B * N * (dqk + dv)
    bytes1 = (4 * B * N * D + 2 * B * N * (D + dqk + dv)
              + 4 * (H * tc * tc + 2 * H * D + H * tc) + 2 * D * (dqk + dv))

    # TODO(synk): on v7x with tiny B a third "parallel" D-tile axis would keep
    # both TensorCores busy during the EMA, but it conflicts with the fused K/V
    # projections (which contract over full D); split K/V into a separate small
    # pallas_call if that case matters.
    ema, kmat, vmat = pl.pallas_call(
        ema_kv_kernel,
        out_shape=(jax.ShapeDtypeStruct((B, N, D), jnp.bfloat16),
                   jax.ShapeDtypeStruct((B, N, dqk), jnp.bfloat16),
                   jax.ShapeDtypeStruct((B, N, dv), jnp.bfloat16)),
        grid=(B, nchunk),
        in_specs=[
            pl.BlockSpec((1, tc, D), lambda b, c: (b, c, 0)),
            _full2(exp_w), _full2(red_w), _full2(dec_blk), _full2(carry),
            _full2(wqk_bf), _full2(params['bqk']),
            _full2(params['gamma']), _full2(params['beta']),
            _full2(wv_bf), _full2(params['bv']),
        ],
        out_specs=(
            pl.BlockSpec((1, tc, D), lambda b, c: (b, c, 0)),
            pl.BlockSpec((1, tc, dqk), lambda b, c: (b, c, 0)),
            pl.BlockSpec((1, tc, dv), lambda b, c: (b, c, 0)),
        ),
        scratch_shapes=[pltpu.VMEM((H, D), jnp.float32)],
        compiler_params=pltpu.CompilerParams(
            dimension_semantics=("parallel", "arbitrary"),
            vmem_limit_bytes=vmem_limit_bytes),
        cost_estimate=pl.CostEstimate(flops=flops1, transcendentals=trans1,
                                      bytes_accessed=bytes1),
    )(x, exp_w, red_w, dec_blk, carry, wqk_bf, params['bqk'],
      params['gamma'], params['beta'], wv_bf, params['bv'])

    # ------- Toeplitz-compressed T5 relative-position bias tiles ---------------
    nq, nkv = N // tq, N // tk
    bias_tiles = build_rel_pos_bias_tiles(nq, tq, params['emb'], scale=dqk ** 0.5)

    # ------- fused, lane-dense ema-side projection weights (bf16 operands) ----
    # column order [wu | wr | Wh | wqk] keeps slice starts 128-aligned here.
    w_fused = jnp.concatenate(
        [params['wu'], params['wr'], params['Wh'], params['wqk']],
        axis=1).astype(jnp.bfloat16)                                 # (D, wtot)
    b_fused = jnp.concatenate(
        [params['bu'], params['br'], params['bh'], params['bqk']],
        axis=1).astype(jnp.float32)                                  # (1, wtot)
    wtot = 2 * D + dv + dqk

    def _kvspec(shape, index_map):
        # Optional deeper buffering of the kj-varying streams (v5e, if DMA ever
        # becomes exposed after the compute reductions).
        if kv_buffers is None:
            return pl.BlockSpec(shape, index_map)
        return pl.BlockSpec(shape, index_map, pipeline_mode=pl.Buffered(kv_buffers))

    live_tiles = nq * (nq + 1) // 2                 # live (qi, kj) tiles / batch
    flops2 = 2 * B * (N * D * wtot + live_tiles * tq * tk * (dqk + dv) + N * dv * D)
    trans2 = B * (live_tiles * tq * tk + 2 * N * (dv + D))
    bytes2 = (B * (N * D * (2 + 4 + 4)
                   + live_tiles * (tk * (dqk + dv) * 2 + tq * tk * 4))
              + 2 * (D * wtot + dv * D))

    out = pl.pallas_call(
        attn_gate_kernel,
        out_shape=jax.ShapeDtypeStruct((B, N, D), x.dtype),
        grid=(B, nq, nkv),
        in_specs=[
            pl.BlockSpec((1, tq, D), lambda b, i, j: (b, i, 0)),   # ema (queries)
            pl.BlockSpec((1, tq, D), lambda b, i, j: (b, i, 0)),   # x (residual)
            # key-axis indices are clamped so fully-masked steps repeat the
            # previous block and Pallas elides their DMAs.
            _kvspec((1, tk, dqk), lambda b, i, j: (b, jnp.minimum(j, i), 0)),
            _kvspec((1, tk, dv),  lambda b, i, j: (b, jnp.minimum(j, i), 0)),
            _kvspec((1, tq, tk),  lambda b, i, j: (jnp.maximum(i - j, 0), 0, 0)),
            _full3(w_fused), _full3(b_fused),
            _full3(params['gamma']), _full3(params['beta']),
            _full3(uh_bf),
        ],
        out_specs=pl.BlockSpec((1, tq, D), lambda b, i, j: (b, i, 0)),
        scratch_shapes=[
            pltpu.VMEM((tq, wtot), jnp.float32),   # fused projection of ema_q
            pltpu.VMEM((tq, dqk), jnp.float32),    # pre-scaled q
            pltpu.VMEM((tq, 1), jnp.float32),      # running max
            pltpu.VMEM((tq, 1), jnp.float32),      # running denom
            pltpu.VMEM((tq, dv), jnp.float32),     # attention accumulator
        ],
        compiler_params=pltpu.CompilerParams(
            dimension_semantics=("parallel", "parallel", "arbitrary"),
            vmem_limit_bytes=vmem_limit_bytes),
        cost_estimate=pl.CostEstimate(flops=flops2, transcendentals=trans2,
                                      bytes_accessed=bytes2),
    )(ema, x, kmat, vmat, bias_tiles, w_fused, b_fused,
      params['gamma'], params['beta'], uh_bf)
    return out


# ----------------------- parameter construction --------------------------------
def init_params(key, dim, ema_heads, dim_qk, dim_value):
    ks = jax.random.split(key, 16)
    p = {}
    p['expansion'] = 0.5 * jax.random.normal(ks[0], (ema_heads, dim), jnp.float32)
    p['reduction'] = 0.5 * jax.random.normal(ks[1], (ema_heads, dim), jnp.float32)
    p['alphas'] = jax.random.normal(ks[2], (ema_heads,), jnp.float32)
    p['dampen'] = jax.random.normal(ks[3], (ema_heads,), jnp.float32)
    p['wqk'] = jax.random.normal(ks[4], (dim, dim_qk), jnp.float32) / math.sqrt(dim)
    p['bqk'] = jnp.zeros((1, dim_qk), jnp.float32)
    p['gamma'] = 1.0 + 0.02 * jax.random.normal(ks[5], (2, dim_qk), jnp.float32)
    p['beta'] = jnp.zeros((2, dim_qk), jnp.float32)
    p['wv'] = jax.random.normal(ks[6], (dim, dim_value), jnp.float32) / math.sqrt(dim)
    p['bv'] = jnp.zeros((1, dim_value), jnp.float32)
    p['emb'] = jax.random.normal(ks[7], (32, 1), jnp.float32)      # T5 bias table
    p['wr'] = jax.random.normal(ks[8], (dim, dim_value), jnp.float32) / math.sqrt(dim)
    p['br'] = jnp.zeros((1, dim_value), jnp.float32)
    p['wu'] = jax.random.normal(ks[9], (dim, dim), jnp.float32) / math.sqrt(dim)
    p['bu'] = jnp.zeros((1, dim), jnp.float32)
    p['Wh'] = jax.random.normal(ks[10], (dim, dim), jnp.float32) / math.sqrt(dim)
    p['Uh'] = jax.random.normal(ks[11], (dim_value, dim), jnp.float32) / math.sqrt(dim_value)
    p['bh'] = 0.1 * jax.random.normal(ks[12], (1, dim), jnp.float32)
    return p


# --------------------------- reference-only helpers ----------------------------
def build_decay(alphas, dampen, n):
    """Full (H, N, N) decay matrix -- reference path only (not used by kernels)."""
    alpha = jax.nn.sigmoid(alphas)
    damp = jax.nn.sigmoid(dampen)
    qf = (1.0 - alpha) * damp
    i = jnp.arange(n)[:, None]
    s = jnp.arange(n)[None, :]
    power = jnp.maximum(i - s, 0).astype(jnp.float32)
    mask = (i >= s).astype(jnp.float32)
    dec = alpha[:, None, None] * (qf[:, None, None] ** power[None]) * mask[None]
    return dec.astype(jnp.float32)


def build_rel_pos_bias(n, emb, scale, num_buckets=32, max_distance=128):
    """Full (N, N) T5 bias -- reference path only (not used by kernels)."""
    q_pos = jnp.arange(n)
    k_pos = jnp.arange(n)
    rel_pos = k_pos[None, :] - q_pos[:, None]
    nmat = jnp.maximum(-rel_pos, 0)                       # causal branch
    max_exact = num_buckets // 2
    is_small = nmat < max_exact
    nf = jnp.maximum(nmat, 1).astype(jnp.float32)
    val_if_large = max_exact + (jnp.log(nf / max_exact)
                                / math.log(max_distance / max_exact)
                                * (num_buckets - max_exact)).astype(jnp.int32)
    val_if_large = jnp.minimum(val_if_large, num_buckets - 1)
    bucket = jnp.where(is_small, nmat, val_if_large)
    return (emb[bucket, 0] * scale).astype(jnp.float32)


def mega_ref(x, p, decay, bias):
    hp = jax.lax.Precision.HIGHEST
    N, D = x.shape[1], x.shape[2]
    xe = x[:, None, :, :] * p['expansion'][None, :, None, :]
    y = jnp.einsum('hin,bhnd->bhid', decay, xe, precision=hp)
    ema = jnp.sum(y * p['reduction'][None, :, None, :], axis=1)
    qk = _silu(jnp.einsum('bnd,de->bne', ema, p['wqk'], precision=hp) + p['bqk'][0])
    q = qk * p['gamma'][0] + p['beta'][0]
    k = qk * p['gamma'][1] + p['beta'][1]
    v = _silu(jnp.einsum('bnd,de->bne', x, p['wv'], precision=hp) + p['bv'][0])
    sim = jnp.einsum('bid,bjd->bij', q, k, precision=hp) / math.sqrt(D) + bias[None]
    causal = jnp.triu(jnp.ones((N, N), bool), 1)
    sim = jnp.where(causal[None], -jnp.finfo(jnp.float32).max, sim)
    attn = jax.nn.softmax(sim, axis=-1)
    attn_out = jnp.einsum('bij,bje->bie', attn, v, precision=hp)
    reset = _silu(jnp.einsum('bnd,de->bne', ema, p['wr'], precision=hp) + p['br'][0])
    update = jax.nn.sigmoid(jnp.einsum('bnd,de->bne', ema, p['wu'], precision=hp) + p['bu'][0])
    gated = attn_out * reset
    Hm = _silu(jnp.einsum('bnd,de->bne', ema, p['Wh'], precision=hp)
               + jnp.einsum('bne,ed->bnd', gated, p['Uh'], precision=hp) + p['bh'][0])
    return update * Hm + (1.0 - update) * x


# ---------------------------------- main ---------------------------------------
if __name__ == "__main__":
    # Small shapes consistent with MegaLayer (dim=128, attn_dim_qk=64), sized so
    # the 256-wide tiles give a 2x2 causal tile grid: one fully-masked tile
    # (skipped), one interior tile, two diagonal tiles.
    B, N, D = 2, 512, 128
    EMA_HEADS, DIM_QK, DIM_V = 4, 64, 128

    key = jax.random.PRNGKey(0)
    kx, kp = jax.random.split(key)
    x = jax.random.normal(kx, (B, N, D), jnp.float32)
    params = init_params(kp, D, EMA_HEADS, DIM_QK, DIM_V)

    out = mega_layer_pallas(x, params)          # default 256 tiles
    out = jax.block_until_ready(out)

    decay_full = build_decay(params['alphas'], params['dampen'], N)
    bias_full = build_rel_pos_bias(N, params['emb'], scale=DIM_QK ** 0.5)
    ref = mega_ref(x, params, decay_full, bias_full)

    assert bool(jnp.all(jnp.isfinite(out)))
    # bf16 MXU operands (f32 accumulation) vs an all-f32 reference -> tolerance
    # is set for bf16 round-off, still far below any structural-error scale.
    assert jnp.allclose(out, ref, atol=5e-2, rtol=5e-2), \
        float(jnp.max(jnp.abs(out - ref)))
    print("KERNEL_OK")
</pallas_src>

<mosaic_0001>
module attributes {stable_mosaic.version = 11 : i64} {
  func.func @ema_kv_kernel(%arg0: i32, %arg1: i32, %arg2: memref<1x256x128xf32, #tpu.memory_space<vmem>>, %arg3: memref<4x1x128xf32, #tpu.memory_space<vmem>>, %arg4: memref<4x1x128xf32, #tpu.memory_space<vmem>>, %arg5: memref<4x256x256xf32, #tpu.memory_space<vmem>>, %arg6: memref<4x256x1xf32, #tpu.memory_space<vmem>>, %arg7: memref<128x64xbf16, #tpu.memory_space<vmem>>, %arg8: memref<1x64xf32, #tpu.memory_space<vmem>>, %arg9: memref<2x64xf32, #tpu.memory_space<vmem>>, %arg10: memref<2x64xf32, #tpu.memory_space<vmem>>, %arg11: memref<128x128xbf16, #tpu.memory_space<vmem>>, %arg12: memref<1x128xf32, #tpu.memory_space<vmem>>, %arg13: memref<1x256x128xbf16, #tpu.memory_space<vmem>>, %arg14: memref<1x256x64xbf16, #tpu.memory_space<vmem>>, %arg15: memref<1x256x128xbf16, #tpu.memory_space<vmem>>, %arg16: memref<4x128xf32, #tpu.memory_space<vmem>>) attributes {dimension_semantics = [#tpu.dimension_semantics<parallel>, #tpu.dimension_semantics<arbitrary>], iteration_bounds = array<i64: 2, 2>, scalar_prefetch = 0 : i64, scratch_operands = 1 : i64, tpu.core_type = #tpu.core_type<tc>, window_params = [{transform_indices = @transform_0, window_bounds = array<i64: 1, 256, 128>}, {pipeline_mode = #tpu.pipeline_mode<synchronous>, transform_indices = @transform_1, window_bounds = array<i64: 4, 1, 128>}, {pipeline_mode = #tpu.pipeline_mode<synchronous>, transform_indices = @transform_2, window_bounds = array<i64: 4, 1, 128>}, {pipeline_mode = #tpu.pipeline_mode<synchronous>, transform_indices = @transform_3, window_bounds = array<i64: 4, 256, 256>}, {pipeline_mode = #tpu.pipeline_mode<synchronous>, transform_indices = @transform_4, window_bounds = array<i64: 4, 256, 1>}, {pipeline_mode = #tpu.pipeline_mode<synchronous>, transform_indices = @transform_5, window_bounds = array<i64: 128, 64>}, {pipeline_mode = #tpu.pipeline_mode<synchronous>, transform_indices = @transform_6, window_bounds = array<i64: 1, 64>}, {pipeline_mode = #tpu.pipeline_mode<synchronous>, transform_indices = @transform_7, window_bounds = array<i64: 2, 64>}, {pipeline_mode = #tpu.pipeline_mode<synchronous>, transform_indices = @transform_8, window_bounds = array<i64: 2, 64>}, {pipeline_mode = #tpu.pipeline_mode<synchronous>, transform_indices = @transform_9, window_bounds = array<i64: 128, 128>}, {pipeline_mode = #tpu.pipeline_mode<synchronous>, transform_indices = @transform_10, window_bounds = array<i64: 1, 128>}, {transform_indices = @transform_11, window_bounds = array<i64: 1, 256, 128>}, {transform_indices = @transform_12, window_bounds = array<i64: 1, 256, 64>}, {transform_indices = @transform_13, window_bounds = array<i64: 1, 256, 128>}]} {
    %c0_i32 = arith.constant 0 : i32
    %0 = arith.cmpi eq, %arg1, %c0_i32 : i32
    %1 = arith.extui %0 : i1 to i32
    %c0_i32_0 = arith.constant 0 : i32
    %2 = arith.cmpi ne, %1, %c0_i32_0 : i32
    scf.if %2 {
      %cst_44 = arith.constant 0.000000e+00 : f32
      %68 = vector.broadcast %cst_44 : f32 to vector<4x128xf32>
      %c0_45 = arith.constant 0 : index
      %c0_46 = arith.constant 0 : index
      %69 = vector.load %arg16[%c0_45, %c0_46] : memref<4x128xf32, #tpu.memory_space<vmem>>, vector<4x128xf32>
      tpu.vector_store %arg16[%c0_45, %c0_46], %68 {strides = array<i32>} : memref<4x128xf32, #tpu.memory_space<vmem>>, vector<4x128xf32>,
    } else {
    }
    %c0 = arith.constant 0 : index
    %c0_1 = arith.constant 0 : index
    %c0_2 = arith.constant 0 : index
    %3 = vector.load %arg2[%c0, %c0_1, %c0_2] : memref<1x256x128xf32, #tpu.memory_space<vmem>>, vector<1x256x128xf32>
    %4 = vector.shape_cast %3 : vector<1x256x128xf32> to vector<256x128xf32>
    %5 = vector.shape_cast %4 : vector<256x128xf32> to vector<1x256x128xf32>
    %c0_3 = arith.constant 0 : index
    %c0_4 = arith.constant 0 : index
    %c0_5 = arith.constant 0 : index
    %6 = vector.load %arg3[%c0_3, %c0_4, %c0_5] : memref<4x1x128xf32, #tpu.memory_space<vmem>>, vector<4x1x128xf32>
    %7 = vector.broadcast %5 : vector<1x256x128xf32> to vector<4x256x128xf32>
    %8 = vector.broadcast %6 : vector<4x1x128xf32> to vector<4x256x128xf32>
    %9 = arith.mulf %7, %8 : vector<4x256x128xf32>
    %c0_6 = arith.constant 0 : index
    %c0_7 = arith.constant 0 : index
    %c0_8 = arith.constant 0 : index
    %10 = vector.load %arg5[%c0_6, %c0_7, %c0_8] : memref<4x256x256xf32, #tpu.memory_space<vmem>>, vector<4x256x256xf32>
    "tpu.trace_start"() <{level = 10 : i32, message = "hij,hjd->hid"}> : () -> ()
    %cst = arith.constant dense<0.000000e+00> : vector<4x256x128xf32>
    %11 = tpu.matmul %10, %9, %cst {dimension_numbers = #tpu.dot_dimension_numbers<[2], [1], [1], [2], [0, 0, 0, 1, 1, 2], [0], [0]>} : vector<4x256x256xf32>, vector<4x256x128xf32>, vector<4x256x128xf32> -> vector<4x256x128xf32>
    "tpu.trace_stop"() : () -> ()
    %c0_9 = arith.constant 0 : index
    %c0_10 = arith.constant 0 : index
    %c0_11 = arith.constant 0 : index
    %12 = vector.load %arg6[%c0_9, %c0_10, %c0_11] : memref<4x256x1xf32, #tpu.memory_space<vmem>>, vector<4x256x1xf32>
    %c0_12 = arith.constant 0 : index
    %c0_13 = arith.constant 0 : index
    %13 = vector.load %arg16[%c0_12, %c0_13] : memref<4x128xf32, #tpu.memory_space<vmem>>, vector<4x128xf32>
    %14 = vector.shape_cast %13 : vector<4x128xf32> to vector<4x1x128xf32>
    %15 = vector.broadcast %12 : vector<4x256x1xf32> to vector<4x256x128xf32>
    %16 = vector.broadcast %14 : vector<4x1x128xf32> to vector<4x256x128xf32>
    %17 = arith.mulf %15, %16 : vector<4x256x128xf32>
    %18 = arith.addf %11, %17 : vector<4x256x128xf32>
    %19 = vector.extract_strided_slice %18 {offsets = [0, 255, 0], sizes = [4, 1, 128], strides = [1, 1, 1]} : vector<4x256x128xf32> to vector<4x1x128xf32>
    %20 = vector.shape_cast %19 : vector<4x1x128xf32> to vector<4x128xf32>
    %c0_14 = arith.constant 0 : index
    %c0_15 = arith.constant 0 : index
    %21 = vector.load %arg16[%c0_14, %c0_15] : memref<4x128xf32, #tpu.memory_space<vmem>>, vector<4x128xf32>
    tpu.vector_store %arg16[%c0_14, %c0_15], %20 {strides = array<i32>} : memref<4x128xf32, #tpu.memory_space<vmem>>, vector<4x128xf32>,
    %c0_16 = arith.constant 0 : index
    %c0_17 = arith.constant 0 : index
    %c0_18 = arith.constant 0 : index
    %22 = vector.load %arg4[%c0_16, %c0_17, %c0_18] : memref<4x1x128xf32, #tpu.memory_space<vmem>>, vector<4x1x128xf32>
    %23 = vector.broadcast %22 : vector<4x1x128xf32> to vector<4x256x128xf32>
    %24 = arith.mulf %18, %23 : vector<4x256x128xf32>
    %cst_19 = arith.constant dense<0.000000e+00> : vector<256x128xf32>
    %25 = vector.multi_reduction <add>, %24, %cst_19 [0] : vector<4x256x128xf32> to vector<256x128xf32>
    %26 = arith.truncf %25 : vector<256x128xf32> to vector<256x128xbf16>
    %c0_20 = arith.constant 0 : index
    %c0_21 = arith.constant 0 : index
    %c0_22 = arith.constant 0 : index
    %27 = vector.load %arg13[%c0_20, %c0_21, %c0_22] : memref<1x256x128xbf16, #tpu.memory_space<vmem>>, vector<1x256x128xbf16>
    %28 = vector.shape_cast %27 : vector<1x256x128xbf16> to vector<256x128xbf16>
    %29 = vector.shape_cast %26 : vector<256x128xbf16> to vector<1x256x128xbf16>
    tpu.vector_store %arg13[%c0_20, %c0_21, %c0_22], %29 {strides = array<i32>} : memref<1x256x128xbf16, #tpu.memory_space<vmem>>, vector<1x256x128xbf16>,
    %30 = arith.truncf %25 : vector<256x128xf32> to vector<256x128xbf16>
    %c0_23 = arith.constant 0 : index
    %c0_24 = arith.constant 0 : index
    %31 = vector.load %arg7[%c0_23, %c0_24] : memref<128x64xbf16, #tpu.memory_space<vmem>>, vector<128x64xbf16>
    %cst_25 = arith.constant dense<0.000000e+00> : vector<256x64xf32>
    %32 = tpu.matmul %30, %31, %cst_25 {dimension_numbers = #tpu.dot_dimension_numbers<[1], [0], [0], [1], [0, 0, 1, 1], [], []>} : vector<256x128xbf16>, vector<128x64xbf16>, vector<256x64xf32> -> vector<256x64xf32>
    %c0_26 = arith.constant 0 : index
    %c0_27 = arith.constant 0 : index
    %33 = vector.load %arg8[%c0_26, %c0_27] : memref<1x64xf32, #tpu.memory_space<vmem>>, vector<1x64xf32>
    %34 = vector.broadcast %33 : vector<1x64xf32> to vector<256x64xf32>
    %35 = arith.addf %32, %34 : vector<256x64xf32>
    %36 = arith.negf %35 : vector<256x64xf32>
    %37 = math.exp %36 : vector<256x64xf32>
    %cst_28 = arith.constant 1.000000e+00 : f32
    %38 = vector.broadcast %cst_28 : f32 to vector<256x64xf32>
    %39 = arith.addf %38, %37 : vector<256x64xf32>
    %40 = arith.divf %38, %39 : vector<256x64xf32>
    %41 = arith.mulf %35, %40 : vector<256x64xf32>
    %c1 = arith.constant 1 : index
    %c0_29 = arith.constant 0 : index
    %42 = vector.load %arg9[%c1, %c0_29] : memref<2x64xf32, #tpu.memory_space<vmem>>, vector<1x64xf32>
    %43 = vector.broadcast %42 : vector<1x64xf32> to vector<256x64xf32>
    %44 = arith.mulf %41, %43 : vector<256x64xf32>
    %c1_30 = arith.constant 1 : index
    %c0_31 = arith.constant 0 : index
    %45 = vector.load %arg10[%c1_30, %c0_31] : memref<2x64xf32, #tpu.memory_space<vmem>>, vector<1x64xf32>
    %46 = vector.broadcast %45 : vector<1x64xf32> to vector<256x64xf32>
    %47 = arith.addf %44, %46 : vector<256x64xf32>
    %48 = arith.truncf %47 : vector<256x64xf32> to vector<256x64xbf16>
    %c0_32 = arith.constant 0 : index
    %c0_33 = arith.constant 0 : index
    %c0_34 = arith.constant 0 : index
    %49 = vector.load %arg14[%c0_32, %c0_33, %c0_34] : memref<1x256x64xbf16, #tpu.memory_space<vmem>>, vector<1x256x64xbf16>
    %50 = vector.shape_cast %49 : vector<1x256x64xbf16> to vector<256x64xbf16>
    %51 = vector.shape_cast %48 : vector<256x64xbf16> to vector<1x256x64xbf16>
    tpu.vector_store %arg14[%c0_32, %c0_33, %c0_34], %51 {strides = array<i32>} : memref<1x256x64xbf16, #tpu.memory_space<vmem>>, vector<1x256x64xbf16>,
    %52 = arith.truncf %4 : vector<256x128xf32> to vector<256x128xbf16>
    %c0_35 = arith.constant 0 : index
    %c0_36 = arith.constant 0 : index
    %53 = vector.load %arg11[%c0_35, %c0_36] : memref<128x128xbf16, #tpu.memory_space<vmem>>, vector<128x128xbf16>
    %cst_37 = arith.constant dense<0.000000e+00> : vector<256x128xf32>
    %54 = tpu.matmul %52, %53, %cst_37 {dimension_numbers = #tpu.dot_dimension_numbers<[1], [0], [0], [1], [0, 0, 1, 1], [], []>} : vector<256x128xbf16>, vector<128x128xbf16>, vector<256x128xf32> -> vector<256x128xf32>
    %c0_38 = arith.constant 0 : index
    %c0_39 = arith.constant 0 : index
    %55 = vector.load %arg12[%c0_38, %c0_39] : memref<1x128xf32, #tpu.memory_space<vmem>>, vector<1x128xf32>
    %56 = vector.broadcast %55 : vector<1x128xf32> to vector<256x128xf32>
    %57 = arith.addf %54, %56 : vector<256x128xf32>
    %58 = arith.negf %57 : vector<256x128xf32>
    %59 = math.exp %58 : vector<256x128xf32>
    %cst_40 = arith.constant 1.000000e+00 : f32
    %60 = vector.broadcast %cst_40 : f32 to vector<256x128xf32>
    %61 = arith.addf %60, %59 : vector<256x128xf32>
    %62 = arith.divf %60, %61 : vector<256x128xf32>
    %63 = arith.mulf %57, %62 : vector<256x128xf32>
    %64 = arith.truncf %63 : vector<256x128xf32> to vector<256x128xbf16>
    %c0_41 = arith.constant 0 : index
    %c0_42 = arith.constant 0 : index
    %c0_43 = arith.constant 0 : index
    %65 = vector.load %arg15[%c0_41, %c0_42, %c0_43] : memref<1x256x128xbf16, #tpu.memory_space<vmem>>, vector<1x256x128xbf16>
    %66 = vector.shape_cast %65 : vector<1x256x128xbf16> to vector<256x128xbf16>
    %67 = vector.shape_cast %64 : vector<256x128xbf16> to vector<1x256x128xbf16>
    tpu.vector_store %arg15[%c0_41, %c0_42, %c0_43], %67 {strides = array<i32>} : memref<1x256x128xbf16, #tpu.memory_space<vmem>>, vector<1x256x128xbf16>,
    return
  }
  func.func @transform_0(%arg0: i32, %arg1: i32) -> (i32, i32, i32) {
    %c0_i32 = arith.constant 0 : i32
    %c0_i32_0 = arith.constant 0 : i32
    return %arg0, %arg1, %c0_i32 : i32, i32, i32
  }
  func.func @transform_1(%arg0: i32, %arg1: i32) -> (i32, i32, i32) {
    %c0_i32 = arith.constant 0 : i32
    %c0_i32_0 = arith.constant 0 : i32
    %c0_i32_1 = arith.constant 0 : i32
    %c0_i32_2 = arith.constant 0 : i32
    return %c0_i32, %c0_i32_0, %c0_i32_1 : i32, i32, i32
  }
  func.func @transform_2(%arg0: i32, %arg1: i32) -> (i32, i32, i32) {
    %c0_i32 = arith.constant 0 : i32
    %c0_i32_0 = arith.constant 0 : i32
    %c0_i32_1 = arith.constant 0 : i32
    %c0_i32_2 = arith.constant 0 : i32
    return %c0_i32, %c0_i32_0, %c0_i32_1 : i32, i32, i32
  }
  func.func @transform_3(%arg0: i32, %arg1: i32) -> (i32, i32, i32) {
    %c0_i32 = arith.constant 0 : i32
    %c0_i32_0 = arith.constant 0 : i32
    %c0_i32_1 = arith.constant 0 : i32
    %c0_i32_2 = arith.constant 0 : i32
    return %c0_i32, %c0_i32_0, %c0_i32_1 : i32, i32, i32
  }
  func.func @transform_4(%arg0: i32, %arg1: i32) -> (i32, i32, i32) {
    %c0_i32 = arith.constant 0 : i32
    %c0_i32_0 = arith.constant 0 : i32
    %c0_i32_1 = arith.constant 0 : i32
    %c0_i32_2 = arith.constant 0 : i32
    return %c0_i32, %c0_i32_0, %c0_i32_1 : i32, i32, i32
  }
  func.func @transform_5(%arg0: i32, %arg1: i32) -> (i32, i32) {
    %c0_i32 = arith.constant 0 : i32
    %c0_i32_0 = arith.constant 0 : i32
    %c0_i32_1 = arith.constant 0 : i32
    return %c0_i32, %c0_i32_0 : i32, i32
  }
  func.func @transform_6(%arg0: i32, %arg1: i32) -> (i32, i32) {
    %c0_i32 = arith.constant 0 : i32
    %c0_i32_0 = arith.constant 0 : i32
    %c0_i32_1 = arith.constant 0 : i32
    return %c0_i32, %c0_i32_0 : i32, i32
  }
  func.func @transform_7(%arg0: i32, %arg1: i32) -> (i32, i32) {
    %c0_i32 = arith.constant 0 : i32
    %c0_i32_0 = arith.constant 0 : i32
    %c0_i32_1 = arith.constant 0 : i32
    return %c0_i32, %c0_i32_0 : i32, i32
  }
  func.func @transform_8(%arg0: i32, %arg1: i32) -> (i32, i32) {
    %c0_i32 = arith.constant 0 : i32
    %c0_i32_0 = arith.constant 0 : i32
    %c0_i32_1 = arith.constant 0 : i32
    return %c0_i32, %c0_i32_0 : i32, i32
  }
  func.func @transform_9(%arg0: i32, %arg1: i32) -> (i32, i32) {
    %c0_i32 = arith.constant 0 : i32
    %c0_i32_0 = arith.constant 0 : i32
    %c0_i32_1 = arith.constant 0 : i32
    return %c0_i32, %c0_i32_0 : i32, i32
  }
  func.func @transform_10(%arg0: i32, %arg1: i32) -> (i32, i32) {
    %c0_i32 = arith.constant 0 : i32
    %c0_i32_0 = arith.constant 0 : i32
    %c0_i32_1 = arith.constant 0 : i32
    return %c0_i32, %c0_i32_0 : i32, i32
  }
  func.func @transform_11(%arg0: i32, %arg1: i32) -> (i32, i32, i32) {
    %c0_i32 = arith.constant 0 : i32
    %c0_i32_0 = arith.constant 0 : i32
    return %arg0, %arg1, %c0_i32 : i32, i32, i32
  }
  func.func @transform_12(%arg0: i32, %arg1: i32) -> (i32, i32, i32) {
    %c0_i32 = arith.constant 0 : i32
    %c0_i32_0 = arith.constant 0 : i32
    return %arg0, %arg1, %c0_i32 : i32, i32, i32
  }
  func.func @transform_13(%arg0: i32, %arg1: i32) -> (i32, i32, i32) {
    %c0_i32 = arith.constant 0 : i32
    %c0_i32_0 = arith.constant 0 : i32
    return %arg0, %arg1, %c0_i32 : i32, i32, i32
  }
}

</mosaic_0001>

<bundles_post_ra>
// kernel: tpu_custom_call.1
= control target key start
LH: loop header
LB: loop body
LE: loop exit
PB: predicated region body
PF: predicated region fallthrough
CT: control target
= control target key end

     0   :  { %s8620_s0 = inlined_call_operand.vmem [shape: f32[2,512,128], index: 0, kind: input, shape index: {}]   ;;  %s8621_s1 = inlined_call_operand.vmem [shape: f32[4,1,128], index: 1, kind: input, shape index: {}]   ;;  %s8622_s2 = inlined_call_operand.vmem [shape: f32[4,1,128], index: 2, kind: input, shape index: {}]   ;;  %s8623_s3 = inlined_call_operand.hbm [shape: f32[4,256,256], index: 3, kind: input, shape index: {}]   ;;  %s8624_s4 = inlined_call_operand.vmem [shape: f32[4,256,1], index: 4, kind: input, shape index: {}]   ;;  %s8625_s5 = inlined_call_operand.vmem [shape: bf16[128,64], index: 5, kind: input, shape index: {}]   ;;  %s8626_s6 = inlined_call_operand.vmem [shape: f32[1,64], index: 6, kind: input, shape index: {}]   ;;  %s8627_s7 = inlined_call_operand.vmem [shape: f32[2,64], index: 7, kind: input, shape index: {}]   ;;  %s8628_s8 = inlined_call_operand.vmem [shape: f32[2,64], index: 8, kind: input, shape index: {}]   ;;  %s8629_s9 = inlined_call_operand.vmem [shape: bf16[128,128], index: 9, kind: input, shape index: {}]   ;;  %s8630_s10 = inlined_call_operand.vmem [shape: f32[1,128], index: 10, kind: input, shape index: {}]   ;;  %s8631_s11 = inlined_call_operand.hbm [shape: bf16[2,512,128], index: 11, kind: output, shape index: {0}]   ;;  %s8632_s12 = inlined_call_operand.vmem [shape: bf16[2,512,64], index: 12, kind: output, shape index: {1}]   ;;  %s8633_s13 = inlined_call_operand.hbm [shape: bf16[2,512,128], index: 13, kind: output, shape index: {2}]  }
   0x1   :  { %8654 = sst [smem:[#allocation74_spill]] %s8623_s3 }
   0x2   :  { %8655 = sst [smem:[#allocation75_spill]] %s8628_s8 }
   0x3   :  { %8656 = sst [smem:[#allocation76_spill]] %s8633_s13 }
   0x4   :  { %19 = vsyncpa [#allocation4], 0 }
   0x5   :  { %20 = vsyncpa [#allocation5], 0 }
   0x6   :  { %22 = vsyncpa [#allocation5 + $0x1], 0 }
   0x7   :  { %23 = vsyncpa [#allocation8], 0 }
   0x8   :  { %25 = vsyncpa [#allocation8 + $0x1], 0  ;;  %s6275_s25 = smov 0   ;;  %s6277_s26 = smov 0  }
   0x9   :  { %s6279_s27 = smov 0   ;;  %s6281_s28 = smov 0  }
   0xa   :  { %s6283_s29 = smov 0   ;;  %s6285_s30 = smov 0  }
   0xb   :  { %s6287_s14 = smov 0   ;;  %s6289_s15 = smov 0  }
   0xc LB: > { %8657 = sst [smem:[#allocation12_spill]] %s6164_s25  ;;  %s4782_s16 = sadd.s32 4294967295, %s6192_s15   ;;  %s6192_s15 = sphi %s6289_s15, %s31_s15   ;;  %s6188_s14 = sphi %s6287_s14, %s8803_s14   ;;  %s6184_s30 = sphi %s6285_s30, %s8802_s30   ;;  %s6180_s29 = sphi %s6283_s29, %s8801_s29   ;;  %s6176_s28 = sphi %s6281_s28, %s8800_s28   ;;  %s6172_s27 = sphi %s6279_s27, %s8799_s27   ;;  %s6168_s26 = sphi %s6277_s26, %s8798_s26   ;;  %s6164_s25 = sphi %s6275_s25, %s8797_s25  }
   0xd   : > { %8658 = sst [smem:[#allocation13_spill]] %s6168_s26  ;;  %s4783_s17 = sadd.s32 4294967294, %s6192_s15  }
   0xe   : > { %8659 = sst [smem:[#allocation14_spill]] %s6172_s27  ;;  %s40_s18 = sadd.s32 1, %s6184_s30 }
   0xf   : > { %8660 = sst [smem:[#allocation15_spill]] %s6184_s30  ;;  %s43_s19 = sadd.s32 1, %s6188_s14 }
  0x10   : > { %8661 = sst [smem:[#allocation16_spill]] %s6188_s14  ;;  %p41_p0 = scmp.ge.s32.totalorder %s40_s18, 2 }
  0x11   : > { %8662 = sst [smem:[#allocation17_spill]] %s6192_s15  ;;  %s290_s20 = sadd.s32 1, %s6172_s27 }
  0x12   : > { %p300_p1 = scmp.ne.s32.totalorder %s6172_s27, %s6168_s26  ;;  %p301_p2 = scmp.eq.s32.totalorder %s4782_s16, 3 }
  0x13   : > { %s8805_s18 = smov (%p41_p0, %s40_s18), 0  ;;  %s8807_s19 = smov (!%p41_p0, %s43_s19), %s6188_s14 }
  0x14   : > { %8663 = sst [smem:[#allocation18_spill]] %s8805_s18  ;;  %s286_s21 = ssub.s32 %s6184_s30, %s8805_s18 }
  0x15   : > { %p6327_p3 = por %p301_p2, %p300_p1  ;;  %p45_p4 = scmp.ge.s32.totalorder %s8807_s19, 2 }
  0x16   : > { %p306_p5 = scmp.ne.s32.totalorder %s6168_s26, %s6164_s25  ;;  %p307_p6 = scmp.eq.s32.totalorder %s4783_s17, 3 }
  0x17   : > { %s8664_s22 = scalar_select %p6327_p3, 1, 0 }
  0x18   : > { %p4784_p7 = scmp.ge.s32.totalorder %s6192_s15, 1  ;;  %s8809_s19 = smov (%p45_p4, %s8807_s19), 0 }
  0x19   : > { %8665 = sst [smem:[#allocation19_spill]] %s8809_s19  ;;  %p6336_p8 = por %p307_p6, %p306_p5 }
  0x1a   : > { %p370_p9 = scmp.lt.s32.totalorder %s6192_s15, 5  ;;  %s285_s24 = ssub.s32 %s6188_s14, %s8809_s19 }
  0x1b   : > { %s8666_s23 = scalar_select %p6336_p8, 1, 0 }
  0x1c   : > { %s287_s13 = sor.u32 %s286_s21, %s285_s24  ;;  %p6343_p10 = pnand %p4784_p7, %p370_p9 }
  0x1d   : > { %8667 = sst [smem:[#allocation20_spill]] %s8666_s23  ;;  %p288_p11 = scmp.eq.s32.totalorder %s287_s13, 0 }
  0x1e   : > { %s8668_s18 = scalar_select %p6343_p10, 1, 0 }
  0x1f   : > { %p6347_p12 = scmp.eq.s32.totalorder %s4782_s16, 0  ;;  %p5627_p13 = pneg %p6343_p10 }
  0x20   : > { %s6354_s17 = scalar_select %p288_p11, %s6172_s27, %s290_s20  }
  0x21   : > { %s8669_s30 = scalar_select %p6347_p12, 1, 0 }
  0x22   : > { %8670 = sst [smem:[#allocation21_spill]] %s6354_s17  ;;  %s6194_s25 = smov [#allocation3]  }
  0x23   : > { %s388_s23 = sshll.u32 %s6194_s25, 4  ;;  %p6358_p0 = pnand %p6347_p12, %p5627_p13  ;;  %s389_s23 = int_to_ptr.vmem [resolvable:$true] %s388_s23 }
  0x24   : > { %s8672_s3 = sld [smem:[#allocation74_spill]] }
  0x25   : > { %p6036_p2 = pneg %p6358_p0 }
  0x2a   : > { %s6034_s16 = scalar_lea.hbm %s8672_s3, 32768 }
  0x2b   : > { %p6035_p1 = scmp.ne.s32.totalorder %s8672_s3, %s6034_s16  ;;  %p6041_p6 = scmp.lt.u32.totalorder %s6034_s16, %s8672_s3 }
  0x2d   : > { %p6037_p4 = pnand %p6036_p2, %p6035_p1 }
  0x2f   : > { %p6038_p5 = pneg %p6037_p4 }
  0x31   : > { %p6043_p7 = pnand %p6041_p6, %p6038_p5 }
  0x33   : > { %6046 = shalt.err (!%p6043_p7)
}
  0x34   : > { %s6047_s17 = scalar_lea.vmem %s389_s23, 32768  ;;  %p6055_p8 = scmp.lt.s32.totalorder %s389_s23, %s389_s23 }
  0x35   : > { %p6048_p9 = scmp.ne.s32.totalorder %s389_s23, %s6047_s17  ;;  %p6056_p3 = scmp.lt.s32.totalorder %s6047_s17, %s6047_s17 }
  0x37   : > { %p6050_p11 = pnand %p6048_p9, %p6036_p2  ;;  %p6057_p12 = por %p6056_p3, %p6055_p8 }
  0x39   : > { %p6051_p13 = pneg %p6050_p11 }
  0x3b   : > { %p6058_p10 = pnand %p6057_p12, %p6051_p13 }
  0x3d   : > { %6061 = shalt.err (!%p6058_p10)
}
  0x3e   : > { %s6195_s14 = smov 256   ;;  %s6196_s19 = smov 16  }
  0x3f   : > { %5630 = dma.hbm_to_vmem [thread:$0]  (!%p6358_p0), %s8672_s3, 32768, %s389_s23, [#allocation4], %s6195_s14, %s6195_s14, %s6196_s19  }
  0x40   : > { %p8673_p1 = scmp.ne.s32.totalorder %s8668_s18, 0 }
  0x42   : > { %438 = sbr.rel (%p8673_p1) target bundleno = 930 (0x3a2), region = 64 }
  0x49   : > { %p8674_p4 = scmp.ne.s32.totalorder %s8669_s30, 0 }
  0x4b   : > { %6151 = dma.done.wait (%p8674_p4), [#allocation4], 32768  }
  0x4c   : > { %6153 = vsyncadd (%p8674_p4), [#allocation4], 4294934528  ;;  %s6385_s17 = sand.u32 1, %s6168_s26   ;;  %s6388_s21 = sshll.u32 %s6176_s28, 5 }
  0x4d   : > { %s4789_s23 = sshll.u32 %s6385_s17, 7  ;;  %p501_p3 = scmp.lt.s32.totalorder %s6180_s29, 1 }
  0x4e   : > { %p503_p8 = scmp.lt.s32.totalorder %s6388_s21, 63  ;;  %s6405_s15 = scalar_lea.vmem [#allocation6], %s4789_s23 }
  0x4f   : > { %s502_s18 = scalar_select %p501_p3, %s6180_s29, 1 }
  0x50   : > { %s504_s25 = scalar_select %p503_p8, %s6388_s21, 63 }
  0x51   : > { %s4792_s16 = sshll.u32 %s502_s18, 6  ;;  %s6407_s8 = scalar_lea.vmem [#allocation7], %s4789_s23 }
  0x52   : > { %s506_s20 = sadd.s32 %s4792_s16, %s504_s25  ;;  %p4797_p10 = scmp.ne.s32.totalorder %s6176_s28, 0 }
  0x53   : > { %s4793_s30 = sshll.u32 %s506_s20, 3  ;;  %s4796_s14 = sshll.u32 %s506_s20, 2  ;;  %v6197_v0 = vmov (!%p4797_p10), 0.0  }
  0x54   : > { %s6398_s13 = scalar_lea.vmem %s8620_s0, %s4793_s30  ;;  %s6403_s26 = scalar_lea.vmem %s8632_s12, %s4796_s14  ;;  %527 = vst [vmem:[#allocation2] sm:$0xf] (!%p4797_p10), %v6197_v0 }
  0x55   : > { %526 = sbr.rel (%p4797_p10) target bundleno = 92 (0x5c), region = 72 }
  0x5c PF: > { %v974_v1 = vld [vmem:[%s8624_s4 + $0x10] sm:$0xff]  ;;  %v972_v2 = vld [vmem:[%s8624_s4] sm:$0xff]  ;;  %v6198_v4 = vmov 0   ;;  %v6420_v5 = vld [vmem:[%s6398_s13 + $0x8] sm:$0xff]  ;;  %v6199_v12 = vmov 0.0|0.0   ;;  %vm2820_vm0 = vcmask 1041409  }
  0x5d   : > { %v6417_v3 = vld [vmem:[%s6398_s13] sm:$0xff]  ;;  %5715 = vset.pattern.permute.xlu1 %v6198_v4  ;;  %5714 = vset.pattern.permute.xlu0 %v6198_v4  ;;  %v6439_v11 = vld [vmem:[%s6398_s13 + $0x10] sm:$0xff]  ;;  %v975_v14 = vld [vmem:[%s8624_s4 + $0x18] sm:$0xff]  ;;  %vm2823_vm1 = vcmask 1042434   ;;  %s4990_s27 = sshll.u32 %s6180_s29, 6  ;;  %s4594_s23 = sshll.u32 %s6405_s15, 4  ;;  %s8271_s23 = int_to_ptr.vmem [resolvable:$true] %s4594_s23 }
  0x5e   : > { %v6425_v6 = vld [vmem:[%s8621_s1] ss:$0 sm:$0xff]  ;;  %v6430_v7 = vld [vmem:[%s8621_s1 + $0x1] ss:$0 sm:$0xff]  ;;  %1138 = vperm.xlu1 %5715, %v974_v1   ;;  %1128 = vperm.xlu0 %5714, %v972_v2   ;;  %v6449_v15 = vld [vmem:[%s6398_s13 + $0x18] sm:$0xff]  ;;  %s4565_s24 = scalar_lea.sflag [#allocation5], %s6385_s17 }
  0x5f   : > { %v588_v8 = vmul.f32 %v6425_v6, %v6417_v3  ;;  %v589_v9 = vmul.f32 %v6425_v6, %v6420_v5  ;;  %v620_v10 = vmul.f32 %v6430_v7, %v6417_v3  ;;  %5427 = vmatprep.subr.bf16.mxu0 %v6199_v12  ;;  %5475 = vmatprep.subr.bf16.mxu1 %v6199_v12  ;;  %v973_v19 = vld [vmem:[%s8624_s4 + $0x8] sm:$0xff]  ;;  %v6463_v22 = vld [vmem:[%s6398_s13 + $0x20] sm:$0xff]  ;;  %v6480_v32 = vld [vmem:[%s6398_s13 + $0x30] sm:$0xff]  ;;  %s6062_s18 = scalar_lea.vmem %s8271_s23, 2048  ;;  %p8790_p0 = scmp.ne.s32.totalorder %s8664_s22, 0 }
  0x60   : > { %v621_v13 = vmul.f32 %v6430_v7, %v6420_v5  ;;  %v590_v16 = vmul.f32 %v6425_v6, %v6439_v11  ;;  %v622_v17 = vmul.f32 %v6430_v7, %v6439_v11  ;;  %v591_v20 = vmul.f32 %v6425_v6, %v6449_v15  ;;  %v6466_v23 = vld [vmem:[%s6398_s13 + $0x28] sm:$0xff]  ;;  %v6483_v33 = vld [vmem:[%s6398_s13 + $0x38] sm:$0xff]  ;;  %v976_v34 = vld [vmem:[%s8624_s4 + $0x20] sm:$0xff]  ;;  %p6063_p12 = scmp.ne.s32.totalorder %s8271_s23, %s6062_s18  ;;  %s6201_s16 = smov [#allocation6]  }
  0x61   : > { %v5428_v18 = vpack.c.bf16 %v589_v9, %v588_v8  ;;  %v623_v21 = vmul.f32 %v6430_v7, %v6449_v15  ;;  %v592_v26 = vmul.f32 %v6425_v6, %v6463_v22  ;;  %v593_v27 = vmul.f32 %v6425_v6, %v6466_v23  ;;  %v977_v29 = vld [vmem:[%s8624_s4 + $0x28] sm:$0xff]  ;;  %v979_v39 = vld [vmem:[%s8624_s4 + $0x38] sm:$0xff]  ;;  %v6502_v42 = vld [vmem:[%s6398_s13 + $0x40] sm:$0xff]  ;;  %s6066_s3 = sshll.u32 %s6201_s16, 4  ;;  %s6067_s3 = int_to_ptr.vmem [resolvable:$false] %s6066_s3 }
  0x62   : > { %v5476_v24 = vpack.c.bf16 %v621_v13, %v620_v10  ;;  %1143 = vperm.xlu1 %5715, %v975_v14   ;;  %v5431_v25 = vpack.c.bf16 %v591_v20, %v590_v16  ;;  %1133 = vperm.xlu0 %5714, %v973_v19   ;;  %v624_v30 = vmul.f32 %v6430_v7, %v6463_v22  ;;  %v6505_v43 = vld [vmem:[%s6398_s13 + $0x48] sm:$0xff]  ;;  %v978_v44 = vld [vmem:[%s8624_s4 + $0x30] sm:$0xff]  ;;  %v6527_v53 = vld [vmem:[%s6398_s13 + $0x58] sm:$0xff]  ;;  %p6064_p2 = pnand %p6063_p12, %p8790_p0  ;;  %p6069_p6 = scmp.lt.s32.totalorder %s8271_s23, %s6067_s3 }
  0x63   : > { %5429 = vmatpush1.bf16.msra.mxu0 %v5428_v18  ;;  %v5479_v28 = vpack.c.bf16 %v623_v21, %v622_v17  ;;  %v625_v31 = vmul.f32 %v6430_v7, %v6466_v23  ;;  %v5434_v35 = vpack.c.bf16 %v593_v27, %v592_v26  ;;  %v594_v36 = vmul.f32 %v6425_v6, %v6480_v32  ;;  %v981_v49 = vld [vmem:[%s8624_s4 + $0x48] sm:$0xff]  ;;  %v6524_v52 = vld [vmem:[%s6398_s13 + $0x50] sm:$0xff]  ;;  %v980_v54 = vld [vmem:[%s8624_s4 + $0x40] sm:$0xff] }
  0x64   : > { %5477 = vmatpush1.bf16.msra.mxu1 %v5476_v24  ;;  %5430 = vmatprep.subr.bf16.mxu0 %v6199_v12  ;;  %v595_v37 = vmul.f32 %v6425_v6, %v6483_v33  ;;  %v626_v40 = vmul.f32 %v6430_v7, %v6480_v32  ;;  %v627_v41 = vmul.f32 %v6430_v7, %v6483_v33  ;;  %v983_v59 = vld [vmem:[%s8624_s4 + $0x58] sm:$0xff]  ;;  %v6546_v62 = vld [vmem:[%s6398_s13 + $0x60] sm:$0xff]  ;;  %v6549_v63 = vld [vmem:[%s6398_s13 + $0x68] sm:$0xff]  ;;  %p6065_p5 = pneg %p6064_p2 }
  0x65   : > { %5478 = vmatprep.subr.bf16.mxu1 %v6199_v12  ;;  %v5482_v38 = vpack.c.bf16 %v625_v31, %v624_v30  ;;  %v596_v46 = vmul.f32 %v6425_v6, %v6502_v42  ;;  %v597_v47 = vmul.f32 %v6425_v6, %v6505_v43  ;;  %v628_v50 = vmul.f32 %v6430_v7, %v6502_v42  ;;  %v982_v0 = vld [vmem:[%s8624_s4 + $0x50] sm:$0xff]  ;;  %v985_v10 = vld [vmem:[%s8624_s4 + $0x68] sm:$0xff]  ;;  %v6571_v17 = vld [vmem:[%s6398_s13 + $0x78] sm:$0xff] }
  0x66   : > { %1153 = vperm.xlu1 %5715, %v977_v29   ;;  %1148 = vperm.xlu0 %5714, %v976_v34   ;;  %v5437_v45 = vpack.c.bf16 %v595_v37, %v594_v36  ;;  %v5485_v48 = vpack.c.bf16 %v627_v41, %v626_v40  ;;  %v629_v51 = vmul.f32 %v6430_v7, %v6505_v43  ;;  %v717_v8 = vld [vmem:[#allocation3 + $0x8] sm:$0xff]  ;;  %v984_v18 = vld [vmem:[%s8624_s4 + $0x60] sm:$0xff]  ;;  %v987_v26 = vld [vmem:[%s8624_s4 + $0x78] sm:$0xff] }
  0x67   : > { %5432 = vmatpush1.bf16.msra.mxu0 %v5431_v25  ;;  %v5440_v55 = vpack.c.bf16 %v597_v47, %v596_v46  ;;  %v598_v56 = vmul.f32 %v6425_v6, %v6524_v52  ;;  %v599_v57 = vmul.f32 %v6425_v6, %v6527_v53  ;;  %v630_v60 = vmul.f32 %v6430_v7, %v6524_v52  ;;  %v6568_v16 = vld [vmem:[%s6398_s13 + $0x70] sm:$0xff]  ;;  %v6590_v29 = vld [vmem:[%s6398_s13 + $0x80] sm:$0xff]  ;;  %v6593_v30 = vld [vmem:[%s6398_s13 + $0x88] sm:$0xff] }
  0x68   : > { %5480 = vmatpush1.bf16.msra.mxu1 %v5479_v28  ;;  %5433 = vmatprep.subr.bf16.mxu0 %v6199_v12  ;;  %v5488_v58 = vpack.c.bf16 %v629_v51, %v628_v50  ;;  %v631_v61 = vmul.f32 %v6430_v7, %v6527_v53  ;;  %v600_v2 = vmul.f32 %v6425_v6, %v6546_v62  ;;  %v781_v24 = vld [vmem:[#allocation3 + $0x208] sm:$0xff]  ;;  %v991_v50 = vld [vmem:[%s8624_s4 + $0x98] sm:$0xff] }
  0x69   : > { %5481 = vmatprep.subr.bf16.mxu1 %v6199_v12  ;;  %v5443_v1 = vpack.c.bf16 %v599_v57, %v598_v56  ;;  %v601_v4 = vmul.f32 %v6425_v6, %v6549_v63  ;;  %v632_v13 = vmul.f32 %v6430_v7, %v6546_v62  ;;  %v633_v14 = vmul.f32 %v6430_v7, %v6549_v63  ;;  %v986_v31 = vld [vmem:[%s8624_s4 + $0x70] sm:$0xff]  ;;  %v6637_v56 = vld [vmem:[%s6398_s13 + $0xa8] sm:$0xff] }
  0x6a   : > { %1163 = vperm.xlu1 %5715, %v979_v39   ;;  %1158 = vperm.xlu0 %5714, %v978_v44   ;;  %v5491_v9 = vpack.c.bf16 %v631_v61, %v630_v60  ;;  %v602_v20 = vmul.f32 %v6425_v6, %v6568_v16  ;;  %v603_v21 = vmul.f32 %v6425_v6, %v6571_v17  ;;  %v6612_v41 = vld [vmem:[%s6398_s13 + $0x90] sm:$0xff]  ;;  %v6615_v44 = vld [vmem:[%s6398_s13 + $0x98] sm:$0xff] }
  0x6b   : > { %5435 = vmatpush1.bf16.msra.mxu0 %v5434_v35  ;;  %1978 = vmatprep.mubr.f32.mxu0 %v717_v8  ;;  %v5446_v19 = vpack.c.bf16 %v601_v4, %v600_v2  ;;  %v5494_v25 = vpack.c.bf16 %v633_v14, %v632_v13  ;;  %v634_v27 = vmul.f32 %v6430_v7, %v6568_v16  ;;  %v990_v57 = vld [vmem:[%s8624_s4 + $0x90] sm:$0xff]  ;;  %v6659_v8 = vld [vmem:[%s6398_s13 + $0xb8] sm:$0xff] }
  0x6c   : > { %5483 = vmatpush1.bf16.msra.mxu1 %v5482_v38  ;;  %5436 = vmatprep.subr.bf16.mxu0 %v6199_v12  ;;  %v635_v28 = vmul.f32 %v6430_v7, %v6571_v17  ;;  %v5449_v34 = vpack.c.bf16 %v603_v21, %v602_v20  ;;  %v604_v35 = vmul.f32 %v6425_v6, %v6590_v29  ;;  %v989_v38 = vld [vmem:[%s8624_s4 + $0x88] sm:$0xff]  ;;  %v6656_v4 = vld [vmem:[%s6398_s13 + $0xb0] sm:$0xff] }
  0x6d   : > { %5484 = vmatprep.subr.bf16.mxu1 %v6199_v12  ;;  %2203 = vmatprep.mubr.f32.mxu1 %v781_v24  ;;  %v605_v36 = vmul.f32 %v6425_v6, %v6593_v30  ;;  %v636_v39 = vmul.f32 %v6430_v7, %v6590_v29  ;;  %v637_v40 = vmul.f32 %v6430_v7, %v6593_v30  ;;  %v552_v24 = vld [vmem:[%s6398_s13 + $0xc0] sm:$0xff] }
  0x6e   : > { %1173 = vperm.xlu1 %5715, %v981_v49   ;;  %1168 = vperm.xlu0 %5714, %v980_v54   ;;  %v5497_v37 = vpack.c.bf16 %v635_v28, %v634_v27  ;;  %v606_v47 = vmul.f32 %v6425_v6, %v6612_v41  ;;  %v638_v51 = vmul.f32 %v6430_v7, %v6612_v41 }
  0x6f   : > { %5438 = vmatpush1.bf16.msra.mxu0 %v5437_v45  ;;  %v988_v45 = vld [vmem:[%s8624_s4 + $0x80] sm:$0xff]  ;;  %v5452_v46 = vpack.c.bf16 %v605_v36, %v604_v35  ;;  %v5500_v49 = vpack.c.bf16 %v637_v40, %v636_v39  ;;  %v639_v54 = vmul.f32 %v6430_v7, %v6615_v44  ;;  %v609_v60 = vmul.f32 %v6425_v6, %v6637_v56  ;;  %v997_v35 = vld [vmem:[%s8624_s4 + $0xc8] sm:$0xff]  ;;  %v555_v39 = vld [vmem:[%s6398_s13 + $0xd8] sm:$0xff] }
  0x70   : > { %5486 = vmatpush1.bf16.msra.mxu1 %v5485_v48  ;;  %5439 = vmatprep.subr.bf16.mxu0 %v6199_v12  ;;  %v607_v48 = vmul.f32 %v6425_v6, %v6615_v44  ;;  %v641_v2 = vmul.f32 %v6430_v7, %v6637_v56  ;;  %v610_v13 = vmul.f32 %v6425_v6, %v6656_v4  ;;  %v996_v40 = vld [vmem:[%s8624_s4 + $0xc0] sm:$0xff] }
  0x71   : > { %5487 = vmatprep.subr.bf16.mxu1 %v6199_v12  ;;  %v5503_v61 = vpack.c.bf16 %v639_v54, %v638_v51  ;;  %v611_v14 = vmul.f32 %v6425_v6, %v6659_v8  ;;  %v642_v20 = vmul.f32 %v6430_v7, %v6656_v4  ;;  %v643_v21 = vmul.f32 %v6430_v7, %v6659_v8  ;;  %v556_v54 = vld [vmem:[%s6398_s13 + $0xe0] sm:$0xff] }
  0x72   : > { %1183 = vperm.xlu1 %5715, %v983_v59   ;;  %1178 = vperm.xlu0 %5714, %v982_v0   ;;  %v993_v0 = vld [vmem:[%s8624_s4 + $0xa8] sm:$0xff]  ;;  %v612_v28 = vmul.f32 %v6425_v6, %v552_v24  ;;  %v644_v36 = vmul.f32 %v6430_v7, %v552_v24  ;;  %v647_v51 = vmul.f32 %v6430_v7, %v555_v39  ;;  %v1003_v24 = vld [vmem:[%s8624_s4 + $0xf8] sm:$0xff] }
  0x73   : > { %5441 = vmatpush1.bf16.msra.mxu0 %v5440_v55  ;;  %v6634_v55 = vld [vmem:[%s6398_s13 + $0xa0] sm:$0xff]  ;;  %v5461_v27 = vpack.c.bf16 %v611_v14, %v610_v13  ;;  %v559_v13 = vld [vmem:[%s6398_s13 + $0xf8] sm:$0xff] }
  0x74   : > { %5489 = vmatpush1.bf16.msra.mxu1 %v5488_v58  ;;  %5442 = vmatprep.subr.bf16.mxu0 %v6199_v12  ;;  %v5455_v58 = vpack.c.bf16 %v607_v48, %v606_v47  ;;  %v608_v59 = vmul.f32 %v6425_v6, %v6634_v55  ;;  %v615_v47 = vmul.f32 %v6425_v6, %v555_v39  ;;  %v1000_v14 = vld [vmem:[%s8624_s4 + $0xe0] sm:$0xff] }
  0x75   : > { %5490 = vmatprep.subr.bf16.mxu1 %v6199_v12 }
  0x76   : > { %1193 = vperm.xlu1 %5715, %v985_v10   ;;  %1188 = vperm.xlu0 %5714, %v984_v18   ;;  %v5458_v10 = vpack.c.bf16 %v609_v60, %v608_v59  ;;  %v616_v60 = vmul.f32 %v6425_v6, %v556_v54 }
  0x77   : > { %5444 = vmatpush1.bf16.msra.mxu0 %v5443_v1  ;;  %v640_v1 = vmul.f32 %v6430_v7, %v6634_v55 }
  0x78   : > { %5492 = vmatpush1.bf16.msra.mxu1 %v5491_v9  ;;  %5445 = vmatprep.subr.bf16.mxu0 %v6199_v12  ;;  %v992_v9 = vld [vmem:[%s8624_s4 + $0xa0] sm:$0xff] }
  0x79   : > { %5493 = vmatprep.subr.bf16.mxu1 %v6199_v12  ;;  %v5506_v18 = vpack.c.bf16 %v641_v2, %v640_v1  ;;  %v1001_v1 = vld [vmem:[%s8624_s4 + $0xe8] sm:$0xff]  ;;  %v648_v2 = vmul.f32 %v6430_v7, %v556_v54 }
  0x7a   : > { %1203 = vperm.xlu1 %5715, %v987_v26   ;;  %1198 = vperm.xlu0 %5714, %v986_v31   ;;  %v994_v26 = vld [vmem:[%s8624_s4 + $0xb0] sm:$0xff] }
  0x7b   : > { %5447 = vmatpush1.bf16.msra.mxu0 %v5446_v19  ;;  %v995_v19 = vld [vmem:[%s8624_s4 + $0xb8] sm:$0xff] }
  0x7c   : > { %5495 = vmatpush1.bf16.msra.mxu1 %v5494_v25  ;;  %5448 = vmatprep.subr.bf16.mxu0 %v6199_v12  ;;  %v553_v25 = vld [vmem:[%s6398_s13 + $0xc8] sm:$0xff] }
  0x7d   : > { %5496 = vmatprep.subr.bf16.mxu1 %v6199_v12  ;;  %v613_v31 = vmul.f32 %v6425_v6, %v553_v25 }
  0x7e   : > { %1213 = vperm.xlu1 %5715, %v989_v38   ;;  %1208 = vperm.xlu0 %5714, %v988_v45   ;;  %v554_v38 = vld [vmem:[%s6398_s13 + $0xd0] sm:$0xff] }
  0x7f   : > { %5450 = vmatpush1.bf16.msra.mxu0 %v5449_v34  ;;  %v5509_v34 = vpack.c.bf16 %v643_v21, %v642_v20  ;;  %v5464_v45 = vpack.c.bf16 %v613_v31, %v612_v28  ;;  %v619_v20 = vmul.f32 %v6425_v6, %v559_v13 }
  0x80   : > { %5498 = vmatpush1.bf16.msra.mxu1 %v5497_v37  ;;  %5451 = vmatprep.subr.bf16.mxu0 %v6199_v12  ;;  %v645_v37 = vmul.f32 %v6430_v7, %v553_v25 }
  0x81   : > { %5499 = vmatprep.subr.bf16.mxu1 %v6199_v12 }
  0x82   : > { %1223 = vperm.xlu1 %5715, %v991_v50   ;;  %1218 = vperm.xlu0 %5714, %v990_v57   ;;  %v5512_v48 = vpack.c.bf16 %v645_v37, %v644_v36  ;;  %v646_v50 = vmul.f32 %v6430_v7, %v554_v38  ;;  %v557_v57 = vld [vmem:[%s6398_s13 + $0xe8] sm:$0xff]  ;;  %v1004_v37 = vld [vmem:[%s8624_s4 + $0x100] sm:$0xff] }
  0x83   : > { %5453 = vmatpush1.bf16.msra.mxu0 %v5452_v46  ;;  %v614_v46 = vmul.f32 %v6425_v6, %v554_v38  ;;  %v1005_v36 = vld [vmem:[%s8624_s4 + $0x108] sm:$0xff] }
  0x84   : > { %5501 = vmatpush1.bf16.msra.mxu1 %v5500_v49  ;;  %5454 = vmatprep.subr.bf16.mxu0 %v6199_v12  ;;  %v999_v49 = vld [vmem:[%s8624_s4 + $0xd8] sm:$0xff] }
  0x85   : > { %5502 = vmatprep.subr.bf16.mxu1 %v6199_v12  ;;  %v5467_v59 = vpack.c.bf16 %v615_v47, %v614_v46  ;;  %v780_v46 = vld [vmem:[#allocation3 + $0x200] sm:$0xff]  ;;  %v1007_v47 = vld [vmem:[%s8624_s4 + $0x118] sm:$0xff] }
  0x86   : > { %1233 = vperm.xlu1 %5715, %v993_v0   ;;  %1228 = vperm.xlu0 %5714, %v992_v9   ;;  %v5515_v0 = vpack.c.bf16 %v647_v51, %v646_v50  ;;  %v649_v9 = vmul.f32 %v6430_v7, %v557_v57  ;;  %v718_v50 = vld [vmem:[#allocation3 + $0x10] sm:$0xff] }
  0x87   : > { %5456 = vmatpush1.bf16.msra.mxu0 %v5455_v58  ;;  %v998_v58 = vld [vmem:[%s8624_s4 + $0xd0] sm:$0xff] }
  0x88   : > { %5504 = vmatpush1.bf16.msra.mxu1 %v5503_v61  ;;  %5457 = vmatprep.subr.bf16.mxu0 %v6199_v12  ;;  %v617_v61 = vmul.f32 %v6425_v6, %v557_v57  ;;  %v5518_v21 = vpack.c.bf16 %v649_v9, %v648_v2  ;;  %v782_v57 = vld [vmem:[#allocation3 + $0x210] sm:$0xff]  ;;  %v720_v2 = vld [vmem:[#allocation3 + $0x20] sm:$0xff] }
  0x89   : > { %5505 = vmatprep.subr.bf16.mxu1 %v6199_v12 }
  0x8a   : > { %1243 = vperm.xlu1 %5715, %v995_v19   ;;  %1238 = vperm.xlu0 %5714, %v994_v26   ;;  %v651_v26 = vmul.f32 %v6430_v7, %v559_v13  ;;  %v1039_v13 = vld [vmem:[%s8624_s4 + $0x218] sm:$0xff] }
  0x8b   : > { %5459 = vmatpush1.bf16.msra.mxu0 %v5458_v10  ;;  %v558_v10 = vld [vmem:[%s6398_s13 + $0xf0] sm:$0xff] }
  0x8c   : > { %5507 = vmatpush1.bf16.msra.mxu1 %v5506_v18  ;;  %5460 = vmatprep.subr.bf16.mxu0 %v6199_v12  ;;  %v5470_v18 = vpack.c.bf16 %v617_v61, %v616_v60  ;;  %v618_v19 = vmul.f32 %v6425_v6, %v558_v10  ;;  %v650_v25 = vmul.f32 %v6430_v7, %v558_v10  ;;  %v1002_v6 = vld [vmem:[%s8624_s4 + $0xf0] sm:$0xff]  ;;  %v1036_v60 = vld [vmem:[%s8624_s4 + $0x200] sm:$0xff] }
  0x8d   : > { %5508 = vmatprep.subr.bf16.mxu1 %v6199_v12  ;;  %v785_v61 = vld [vmem:[#allocation3 + $0x228] sm:$0xff]  ;;  %v784_v10 = vld [vmem:[#allocation3 + $0x220] sm:$0xff] }
  0x8e   : > { %1253 = vperm.xlu1 %5715, %v997_v35   ;;  %1248 = vperm.xlu0 %5714, %v996_v40   ;;  %v5473_v28 = vpack.c.bf16 %v619_v20, %v618_v19  ;;  %v5521_v35 = vpack.c.bf16 %v651_v26, %v650_v25  ;;  %v716_v40 = vld [vmem:[#allocation3] sm:$0xff]  ;;  %v722_v19 = vld [vmem:[#allocation3 + $0x30] sm:$0xff]  ;;  %v725_v25 = vld [vmem:[#allocation3 + $0x48] sm:$0xff] }
  0x8f   : > { %5462 = vmatpush1.bf16.msra.mxu0 %v5461_v27  ;;  %v6736_v27 = vld [vmem:[%s8621_s1 + $0x2] ss:$0 sm:$0xff]  ;;  %v1069_v26 = vld [vmem:[%s8624_s4 + $0x308] sm:$0xff] }
  0x90   : > { %5510 = vmatpush1.bf16.msra.mxu1 %v5509_v34  ;;  %5463 = vmatprep.subr.bf16.mxu0 %v6199_v12  ;;  %v652_v31 = vmul.f32 %v6736_v27, %v6417_v3  ;;  %v653_v7 = vmul.f32 %v6736_v27, %v6420_v5  ;;  %v6750_v34 = vld [vmem:[%s8621_s1 + $0x3] ss:$0 sm:$0xff]  ;;  %v654_v51 = vmul.f32 %v6736_v27, %v6439_v11 }
  0x91   : > { %5511 = vmatprep.subr.bf16.mxu1 %v6199_v12  ;;  %v684_v38 = vmul.f32 %v6750_v34, %v6417_v3  ;;  %v685_v39 = vmul.f32 %v6750_v34, %v6420_v5  ;;  %v1006_v3 = vld [vmem:[%s8624_s4 + $0x110] sm:$0xff]  ;;  %v719_v5 = vld [vmem:[#allocation3 + $0x18] sm:$0xff]  ;;  %v655_v54 = vmul.f32 %v6736_v27, %v6449_v15  ;;  %v656_v20 = vmul.f32 %v6736_v27, %v6463_v22 }
  0x92   : > { %1263 = vperm.xlu1 %5715, %v999_v49   ;;  %1258 = vperm.xlu0 %5714, %v998_v58   ;;  %v721_v58 = vld [vmem:[#allocation3 + $0x28] sm:$0xff] }
  0x93   : > { %5465 = vmatpush1.bf16.msra.mxu0 %v5464_v45  ;;  %v5524_v45 = vpack.c.bf16 %v653_v7, %v652_v31  ;;  %v5572_v49 = vpack.c.bf16 %v685_v39, %v684_v38  ;;  %v5527_v9 = vpack.c.bf16 %v655_v54, %v654_v51  ;;  %v688_v31 = vmul.f32 %v6750_v34, %v6463_v22  ;;  %v1071_v38 = vld [vmem:[%s8624_s4 + $0x318] sm:$0xff]  ;;  %v1070_v22 = vld [vmem:[%s8624_s4 + $0x310] sm:$0xff] }
  0x94   : > { %5513 = vmatpush1.bf16.msra.mxu1 %v5512_v48  ;;  %5466 = vmatprep.subr.bf16.mxu0 %v6199_v12  ;;  %v783_v48 = vld [vmem:[#allocation3 + $0x218] sm:$0xff]  ;;  %v689_v7 = vmul.f32 %v6750_v34, %v6466_v23  ;;  %v690_v51 = vmul.f32 %v6750_v34, %v6480_v32  ;;  %v691_v54 = vmul.f32 %v6750_v34, %v6483_v33 }
  0x95   : > { %5514 = vmatprep.subr.bf16.mxu1 %v6199_v12  ;;  %v791_v39 = vld [vmem:[#allocation3 + $0x258] sm:$0xff] }
  0x96   : > { %1273 = vperm.xlu1 %5715, %v1001_v1   ;;  %1268 = vperm.xlu0 %5714, %v1000_v14   ;;  %v687_v1 = vmul.f32 %v6750_v34, %v6449_v15  ;;  %v723_v15 = vld [vmem:[#allocation3 + $0x38] sm:$0xff] }
  0x97   : > { %5468 = vmatpush1.bf16.msra.mxu0 %v5467_v59  ;;  %v1037_v59 = vld [vmem:[%s8624_s4 + $0x208] sm:$0xff]  ;;  %v787_v14 = vld [vmem:[#allocation3 + $0x238] sm:$0xff] }
  0x98   : > { %5516 = vmatpush1.bf16.msra.mxu1 %v5515_v0  ;;  %5469 = vmatprep.subr.bf16.mxu0 %v6199_v12  ;;  %v686_v0 = vmul.f32 %v6750_v34, %v6439_v11  ;;  %v1038_v11 = vld [vmem:[%s8624_s4 + $0x210] sm:$0xff] }
  0x99   : > { %5517 = vmatprep.subr.bf16.mxu1 %v6199_v12 }
  0x9a   : > { %1283 = vperm.xlu1 %5715, %v1003_v24   ;;  %1278 = vperm.xlu0 %5714, %v1002_v6   ;;  %v786_v24 = vld [vmem:[#allocation3 + $0x230] sm:$0xff]  ;;  %v1068_v6 = vld [vmem:[%s8624_s4 + $0x300] sm:$0xff] }
  0x9b   : > { %5471 = vmatpush1.bf16.msra.mxu0 %v5470_v18  ;;  %v5575_v18 = vpack.c.bf16 %v687_v1, %v686_v0  ;;  %v5581_v0 = vpack.c.bf16 %v691_v54, %v690_v51  ;;  %v730_v1 = vld [vmem:[#allocation3 + $0x70] sm:$0xff]  ;;  %v1013_v54 = vld [vmem:[%s8624_s4 + $0x148] sm:$0xff] }
  0x9c   : > { %5519 = vmatpush1.bf16.msra.mxu1 %v5518_v21  ;;  %5472 = vmatprep.subr.bf16.mxu0 %v6199_v12  ;;  %v657_v21 = vmul.f32 %v6736_v27, %v6466_v23  ;;  %v727_v23 = vld [vmem:[#allocation3 + $0x58] sm:$0xff]  ;;  %v802_v51 = vld [vmem:[#allocation3 + $0x2b0] sm:$0xff] }
  0x9d   : > { %5520 = vmatprep.subr.bf16.mxu1 %v6199_v12 }
  0x9e   : > { %1293 = vperm.xlu1 %5715, %v1005_v36   ;;  %1288 = vperm.xlu0 %5714, %v1004_v37   ;;  %v5530_v36 = vpack.c.bf16 %v657_v21, %v656_v20  ;;  %v788_v37 = vld [vmem:[#allocation3 + $0x240] sm:$0xff] }
  0x9f   : > { %5474 = vmatpush1.bf16.msra.mxu0 %v5473_v28  ;;  %v789_v28 = vld [vmem:[#allocation3 + $0x248] sm:$0xff]  ;;  %v732_v20 = vld [vmem:[#allocation3 + $0x80] sm:$0xff] }
  0xa0   : > { %5522 = vmatpush1.bf16.msra.mxu1 %v5521_v35  ;;  %5523 = vmatprep.subr.bf16.mxu0 %v6199_v12  ;;  %v724_v35 = vld [vmem:[#allocation3 + $0x40] sm:$0xff] }
  0xa1   : > { %5571 = vmatprep.subr.bf16.mxu1 %v6199_v12 }
  0xa2   : > { %1979 = vmatmul.mubr.f32.vlgmr.msra.gmra.mrb[0].mxu0 %v716_v40  ;;  %1303 = vperm.xlu1 %5715, %v1007_v47   ;;  %v5578_v40 = vpack.c.bf16 %v689_v7, %v688_v31  ;;  %v659_v47 = vmul.f32 %v6736_v27, %v6483_v33  ;;  %v731_v33 = vld [vmem:[#allocation3 + $0x78] sm:$0xff]  ;;  %v662_v31 = vmul.f32 %v6736_v27, %v6524_v52 }
  0xa3   : > { %2204 = vmatmul.mubr.f32.vlgmr.msra.gmra.mrb[0].mxu1 %v780_v46  ;;  %5525 = vmatpush1.bf16.msra.mxu0 %v5524_v45  ;;  %v726_v45 = vld [vmem:[#allocation3 + $0x50] sm:$0xff]  ;;  %v658_v46 = vmul.f32 %v6736_v27, %v6480_v32  ;;  %v663_v7 = vmul.f32 %v6736_v27, %v6527_v53 }
  0xa4   : > { %1298 = vperm.xlu0 %5714, %v1006_v3   ;;  %1983 = vmatprep.mubr.f32.mxu0 %v719_v5  ;;  %v790_v3 = vld [vmem:[#allocation3 + $0x250] sm:$0xff]  ;;  %v729_v5 = vld [vmem:[#allocation3 + $0x68] sm:$0xff] }
  0xa5   : > { %2208 = vmatprep.mubr.f32.mxu1 %v783_v48  ;;  %5573 = vmatpush1.bf16.msra.mxu1 %v5572_v49  ;;  %v1009_v48 = vld [vmem:[%s8624_s4 + $0x128] sm:$0xff]  ;;  %v1008_v49 = vld [vmem:[%s8624_s4 + $0x120] sm:$0xff]  ;;  %v1010_v32 = vld [vmem:[%s8624_s4 + $0x130] sm:$0xff] }
  0xa6   : > { %1984 = vmatmul.mubr.f32.gmra.mrb[2].mxu0 %v718_v50  ;;  %1453 = vperm.xlu1 %5715, %v1037_v59   ;;  %v793_v50 = vld [vmem:[#allocation3 + $0x268] sm:$0xff]  ;;  %v792_v59 = vld [vmem:[#allocation3 + $0x260] sm:$0xff] }
  0xa7   : > { %2209 = vmatmul.mubr.f32.gmra.mrb[2].mxu1 %v782_v57  ;;  %1988 = vmatprep.mubr.f32.mxu0 %v721_v58  ;;  %v728_v57 = vld [vmem:[#allocation3 + $0x60] sm:$0xff]  ;;  %v5533_v58 = vpack.c.bf16 %v659_v47, %v658_v46  ;;  %v1075_v47 = vld [vmem:[%s8624_s4 + $0x338] sm:$0xff] }
  0xa8   : > { %1448 = vperm.xlu0 %5714, %v1036_v60   ;;  %2213 = vmatprep.mubr.f32.mxu1 %v785_v61  ;;  %v1011_v60 = vld [vmem:[%s8624_s4 + $0x138] sm:$0xff]  ;;  %v800_v46 = vld [vmem:[#allocation3 + $0x2a0] sm:$0xff] }
  0xa9   : > { %5526 = vmatprep.subr.bf16.mxu0 %v6199_v12  ;;  %5574 = vmatprep.subr.bf16.mxu1 %v6199_v12  ;;  %v795_v61 = vld [vmem:[#allocation3 + $0x278] sm:$0xff] }
  0xaa   : > { %1989 = vmatmul.mubr.f32.gmra.mrb[4].mxu0 %v720_v2  ;;  %1463 = vperm.xlu1 %5715, %v1039_v13   ;;  %v660_v2 = vmul.f32 %v6736_v27, %v6502_v42  ;;  %v733_v13 = vld [vmem:[#allocation3 + $0x88] sm:$0xff] }
  0xab   : > { %2214 = vmatmul.mubr.f32.gmra.mrb[4].mxu1 %v784_v10  ;;  %5528 = vmatpush1.bf16.msra.mxu0 %v5527_v9  ;;  %v661_v9 = vmul.f32 %v6736_v27, %v6505_v43  ;;  %v794_v10 = vld [vmem:[#allocation3 + $0x270] sm:$0xff] }
  0xac   : > { %1458 = vperm.xlu0 %5714, %v1038_v11   ;;  %1993 = vmatprep.mubr.f32.mxu0 %v723_v15  ;;  %v1041_v11 = vld [vmem:[%s8624_s4 + $0x228] sm:$0xff]  ;;  %v1040_v15 = vld [vmem:[%s8624_s4 + $0x220] sm:$0xff] }
  0xad   : > { %2218 = vmatprep.mubr.f32.mxu1 %v787_v14  ;;  %5576 = vmatpush1.bf16.msra.mxu1 %v5575_v18  ;;  %v797_v14 = vld [vmem:[#allocation3 + $0x288] sm:$0xff]  ;;  %v692_v18 = vmul.f32 %v6750_v34, %v6502_v42  ;;  %v5536_v21 = vpack.c.bf16 %v661_v9, %v660_v2  ;;  %v807_v9 = vld [vmem:[#allocation3 + $0x2d8] sm:$0xff] }
  0xae   : > { %1994 = vmatmul.mubr.f32.gmra.mrb[6].mxu0 %v722_v19  ;;  %1613 = vperm.xlu1 %5715, %v1069_v26   ;;  %v693_v19 = vmul.f32 %v6750_v34, %v6505_v43  ;;  %v1042_v42 = vld [vmem:[%s8624_s4 + $0x230] sm:$0xff]  ;;  %v735_v43 = vld [vmem:[#allocation3 + $0x98] sm:$0xff] }
  0xaf   : > { %2219 = vmatmul.mubr.f32.gmra.mrb[6].mxu1 %v786_v24  ;;  %1998 = vmatprep.mubr.f32.mxu0 %v725_v25  ;;  %v796_v24 = vld [vmem:[#allocation3 + $0x280] sm:$0xff]  ;;  %v1043_v25 = vld [vmem:[%s8624_s4 + $0x238] sm:$0xff]  ;;  %v1014_v2 = vld [vmem:[%s8624_s4 + $0x150] sm:$0xff] }
  0xb0   : > { %1608 = vperm.xlu0 %5714, %v1068_v6   ;;  %2223 = vmatprep.mubr.f32.mxu1 %v789_v28  ;;  %v799_v26 = vld [vmem:[#allocation3 + $0x298] sm:$0xff]  ;;  %v5584_v6 = vpack.c.bf16 %v693_v19, %v692_v18  ;;  %v734_v28 = vld [vmem:[#allocation3 + $0x90] sm:$0xff]  ;;  %v745_v18 = vld [vmem:[#allocation3 + $0xe8] sm:$0xff] }
  0xb1   : > { %5529 = vmatprep.subr.bf16.mxu0 %v6199_v12  ;;  %5577 = vmatprep.subr.bf16.mxu1 %v6199_v12  ;;  %v1044_v19 = vld [vmem:[%s8624_s4 + $0x240] sm:$0xff] }
  0xb2   : > { %1999 = vmatmul.mubr.f32.gmra.mrb[8].mxu0 %v724_v35  ;;  %1623 = vperm.xlu1 %5715, %v1071_v38   ;;  %v798_v35 = vld [vmem:[#allocation3 + $0x290] sm:$0xff]  ;;  %v1072_v38 = vld [vmem:[%s8624_s4 + $0x320] sm:$0xff] }
  0xb3   : > { %2224 = vmatmul.mubr.f32.gmra.mrb[8].mxu1 %v788_v37  ;;  %5531 = vmatpush1.bf16.msra.mxu0 %v5530_v36  ;;  %v737_v36 = vld [vmem:[#allocation3 + $0xa8] sm:$0xff] }
  0xb4   : > { %1618 = vperm.xlu0 %5714, %v1070_v22   ;;  %2003 = vmatprep.mubr.f32.mxu0 %v727_v23  ;;  %v1073_v37 = vld [vmem:[%s8624_s4 + $0x328] sm:$0xff]  ;;  %v694_v23 = vmul.f32 %v6750_v34, %v6524_v52  ;;  %v739_v52 = vld [vmem:[#allocation3 + $0xb8] sm:$0xff] }
  0xb5   : > { %2228 = vmatprep.mubr.f32.mxu1 %v791_v39  ;;  %5579 = vmatpush1.bf16.msra.mxu1 %v5578_v40  ;;  %v801_v22 = vld [vmem:[#allocation3 + $0x2a8] sm:$0xff]  ;;  %v695_v39 = vmul.f32 %v6750_v34, %v6527_v53  ;;  %v736_v40 = vld [vmem:[#allocation3 + $0xa0] sm:$0xff]  ;;  %v803_v53 = vld [vmem:[#allocation3 + $0x2b8] sm:$0xff] }
  0xb6   : > { %2004 = vmatmul.mubr.f32.gmra.mrb[10].mxu0 %v726_v45  ;;  %1313 = vperm.xlu1 %5715, %v1009_v48   ;;  %v5539_v45 = vpack.c.bf16 %v663_v7, %v662_v31  ;;  %v738_v48 = vld [vmem:[#allocation3 + $0xb0] sm:$0xff]  ;;  %v668_v7 = vmul.f32 %v6736_v27, %v6590_v29 }
  0xb7   : > { %2229 = vmatmul.mubr.f32.gmra.mrb[10].mxu1 %v790_v3  ;;  %2008 = vmatprep.mubr.f32.mxu0 %v729_v5  ;;  %v1074_v3 = vld [vmem:[%s8624_s4 + $0x330] sm:$0xff]  ;;  %v5587_v5 = vpack.c.bf16 %v695_v39, %v694_v23 }
  0xb8   : > { %1308 = vperm.xlu0 %5714, %v1008_v49   ;;  %2233 = vmatprep.mubr.f32.mxu1 %v793_v50  ;;  %v664_v49 = vmul.f32 %v6736_v27, %v6546_v62  ;;  %v665_v50 = vmul.f32 %v6736_v27, %v6549_v63  ;;  %v746_v31 = vld [vmem:[#allocation3 + $0xf0] sm:$0xff] }
  0xb9   : > { %5532 = vmatprep.subr.bf16.mxu0 %v6199_v12  ;;  %5580 = vmatprep.subr.bf16.mxu1 %v6199_v12 }
  0xba   : > { %2009 = vmatmul.mubr.f32.gmra.mrb[12].mxu0 %v728_v57  ;;  %1323 = vperm.xlu1 %5715, %v1011_v60   ;;  %v741_v57 = vld [vmem:[#allocation3 + $0xc8] sm:$0xff]  ;;  %v740_v60 = vld [vmem:[#allocation3 + $0xc0] sm:$0xff] }
  0xbb   : > { %2234 = vmatmul.mubr.f32.gmra.mrb[12].mxu1 %v792_v59  ;;  %5534 = vmatpush1.bf16.msra.mxu0 %v5533_v58  ;;  %v1012_v58 = vld [vmem:[%s8624_s4 + $0x140] sm:$0xff]  ;;  %v805_v59 = vld [vmem:[#allocation3 + $0x2c8] sm:$0xff] }
  0xbc   : > { %1318 = vperm.xlu0 %5714, %v1010_v32   ;;  %2013 = vmatprep.mubr.f32.mxu0 %v731_v33  ;;  %v696_v32 = vmul.f32 %v6750_v34, %v6546_v62  ;;  %v697_v33 = vmul.f32 %v6750_v34, %v6549_v63  ;;  %v743_v62 = vld [vmem:[#allocation3 + $0xd8] sm:$0xff] }
  0xbd   : > { %2238 = vmatprep.mubr.f32.mxu1 %v795_v61  ;;  %5582 = vmatpush1.bf16.msra.mxu1 %v5581_v0  ;;  %v5542_v61 = vpack.c.bf16 %v665_v50, %v664_v49  ;;  %v804_v0 = vld [vmem:[#allocation3 + $0x2c0] sm:$0xff] }
  0xbe   : > { %2014 = vmatmul.mubr.f32.gmra.mrb[14].mxu0 %v730_v1  ;;  %1473 = vperm.xlu1 %5715, %v1041_v11   ;;  %v1015_v1 = vld [vmem:[%s8624_s4 + $0x158] sm:$0xff]  ;;  %v5590_v63 = vpack.c.bf16 %v697_v33, %v696_v32  ;;  %v667_v11 = vmul.f32 %v6736_v27, %v6571_v17  ;;  %v1016_v32 = vld [vmem:[%s8624_s4 + $0x160] sm:$0xff] }
  0xbf   : > { %2239 = vmatmul.mubr.f32.gmra.mrb[14].mxu1 %v794_v10  ;;  %2018 = vmatprep.mubr.f32.mxu0 %v733_v13  ;;  %v742_v10 = vld [vmem:[#allocation3 + $0xd0] sm:$0xff]  ;;  %v666_v13 = vmul.f32 %v6736_v27, %v6568_v16 }
  0xc0   : > { %1468 = vperm.xlu0 %5714, %v1040_v15   ;;  %2243 = vmatprep.mubr.f32.mxu1 %v797_v14  ;;  %v806_v15 = vld [vmem:[#allocation3 + $0x2d0] sm:$0xff]  ;;  %v1045_v14 = vld [vmem:[%s8624_s4 + $0x248] sm:$0xff] }
  0xc1   : > { %5535 = vmatprep.subr.bf16.mxu0 %v6199_v12  ;;  %5583 = vmatprep.subr.bf16.mxu1 %v6199_v12 }
  0xc2   : > { %2019 = vmatmul.mubr.f32.gmra.mrb[16].mxu0 %v732_v20  ;;  %1483 = vperm.xlu1 %5715, %v1043_v25   ;;  %v809_v20 = vld [vmem:[#allocation3 + $0x2e8] sm:$0xff]  ;;  %v699_v25 = vmul.f32 %v6750_v34, %v6571_v17 }
  0xc3   : > { %2244 = vmatmul.mubr.f32.gmra.mrb[16].mxu1 %v796_v24  ;;  %5537 = vmatpush1.bf16.msra.mxu0 %v5536_v21  ;;  %v744_v21 = vld [vmem:[#allocation3 + $0xe0] sm:$0xff]  ;;  %v698_v24 = vmul.f32 %v6750_v34, %v6568_v16  ;;  %v747_v16 = vld [vmem:[#allocation3 + $0xf8] sm:$0xff] }
  0xc4   : > { %1478 = vperm.xlu0 %5714, %v1042_v42   ;;  %2023 = vmatprep.mubr.f32.mxu0 %v735_v43  ;;  %v5545_v42 = vpack.c.bf16 %v667_v11, %v666_v13  ;;  %v808_v43 = vld [vmem:[#allocation3 + $0x2e0] sm:$0xff]  ;;  %v755_v13 = vld [vmem:[#allocation3 + $0x138] sm:$0xff] }
  0xc5   : > { %2248 = vmatprep.mubr.f32.mxu1 %v799_v26  ;;  %5585 = vmatpush1.bf16.msra.mxu1 %v5584_v6  ;;  %v1047_v26 = vld [vmem:[%s8624_s4 + $0x258] sm:$0xff]  ;;  %v1046_v6 = vld [vmem:[%s8624_s4 + $0x250] sm:$0xff]  ;;  %v5593_v17 = vpack.c.bf16 %v699_v25, %v698_v24  ;;  %v1049_v25 = vld [vmem:[%s8624_s4 + $0x268] sm:$0xff] }
  0xc6   : > { %2024 = vmatmul.mubr.f32.gmra.mrb[18].mxu0 %v734_v28  ;;  %1633 = vperm.xlu1 %5715, %v1073_v37   ;;  %v811_v28 = vld [vmem:[#allocation3 + $0x2f8] sm:$0xff]  ;;  %v749_v37 = vld [vmem:[#allocation3 + $0x108] sm:$0xff] }
  0xc7   : > { %2249 = vmatmul.mubr.f32.gmra.mrb[18].mxu1 %v798_v35  ;;  %2028 = vmatprep.mubr.f32.mxu0 %v737_v36  ;;  %v669_v35 = vmul.f32 %v6736_v27, %v6593_v30  ;;  %v810_v36 = vld [vmem:[#allocation3 + $0x2f0] sm:$0xff]  ;;  %v819_v11 = vld [vmem:[#allocation3 + $0x338] sm:$0xff]  ;;  %v757_v24 = vld [vmem:[#allocation3 + $0x148] sm:$0xff] }
  0xc8   : > { %1628 = vperm.xlu0 %5714, %v1072_v38   ;;  %2253 = vmatprep.mubr.f32.mxu1 %v801_v22  ;;  %v1077_v38 = vld [vmem:[%s8624_s4 + $0x348] sm:$0xff]  ;;  %v1076_v22 = vld [vmem:[%s8624_s4 + $0x340] sm:$0xff] }
  0xc9   : > { %5538 = vmatprep.subr.bf16.mxu0 %v6199_v12  ;;  %5586 = vmatprep.subr.bf16.mxu1 %v6199_v12 }
  0xca   : > { %2029 = vmatmul.mubr.f32.gmra.mrb[20].mxu0 %v736_v40  ;;  %1643 = vperm.xlu1 %5715, %v1075_v47   ;;  %v813_v40 = vld [vmem:[#allocation3 + $0x308] sm:$0xff]  ;;  %v748_v47 = vld [vmem:[#allocation3 + $0x100] sm:$0xff] }
  0xcb   : > { %2254 = vmatmul.mubr.f32.gmra.mrb[20].mxu1 %v800_v46  ;;  %5540 = vmatpush1.bf16.msra.mxu0 %v5539_v45  ;;  %v700_v45 = vmul.f32 %v6750_v34, %v6590_v29  ;;  %v701_v46 = vmul.f32 %v6750_v34, %v6593_v30  ;;  %v1078_v29 = vld [vmem:[%s8624_s4 + $0x350] sm:$0xff] }
  0xcc   : > { %1638 = vperm.xlu0 %5714, %v1074_v3   ;;  %2033 = vmatprep.mubr.f32.mxu0 %v739_v52  ;;  %v5548_v3 = vpack.c.bf16 %v669_v35, %v668_v7  ;;  %v812_v52 = vld [vmem:[#allocation3 + $0x300] sm:$0xff]  ;;  %v1051_v35 = vld [vmem:[%s8624_s4 + $0x278] sm:$0xff] }
  0xcd   : > { %2258 = vmatprep.mubr.f32.mxu1 %v803_v53  ;;  %5588 = vmatpush1.bf16.msra.mxu1 %v5587_v5  ;;  %v1079_v53 = vld [vmem:[%s8624_s4 + $0x358] sm:$0xff]  ;;  %v5596_v49 = vpack.c.bf16 %v701_v46, %v700_v45  ;;  %v820_v7 = vld [vmem:[#allocation3 + $0x340] sm:$0xff]  ;;  %v674_v45 = vmul.f32 %v6736_v27, %v6656_v4  ;;  %v675_v46 = vmul.f32 %v6736_v27, %v6659_v8  ;;  %v5988_v8 = vld [vmem:[%s6398_s13 + $0xb0] sm:$0xff] }
  0xce   : > { %2034 = vmatmul.mubr.f32.gmra.mrb[22].mxu0 %v738_v48  ;;  %1333 = vperm.xlu1 %5715, %v1013_v54   ;;  %v751_v5 = vld [vmem:[#allocation3 + $0x118] sm:$0xff]  ;;  %v670_v54 = vmul.f32 %v6736_v27, %v6612_v41 }
  0xcf   : > { %2259 = vmatmul.mubr.f32.gmra.mrb[22].mxu1 %v802_v51  ;;  %2038 = vmatprep.mubr.f32.mxu0 %v741_v57  ;;  %v815_v48 = vld [vmem:[#allocation3 + $0x318] sm:$0xff]  ;;  %v750_v51 = vld [vmem:[#allocation3 + $0x110] sm:$0xff]  ;;  %v671_v57 = vmul.f32 %v6736_v27, %v6615_v44 }
  0xd0   : > { %1328 = vperm.xlu0 %5714, %v1012_v58   ;;  %2263 = vmatprep.mubr.f32.mxu1 %v805_v59  ;;  %v814_v58 = vld [vmem:[#allocation3 + $0x310] sm:$0xff]  ;;  %v753_v59 = vld [vmem:[#allocation3 + $0x128] sm:$0xff] }
  0xd1   : > { %5541 = vmatprep.subr.bf16.mxu0 %v6199_v12  ;;  %5589 = vmatprep.subr.bf16.mxu1 %v6199_v12 }
  0xd2   : > { %2039 = vmatmul.mubr.f32.gmra.mrb[24].mxu0 %v740_v60  ;;  %1343 = vperm.xlu1 %5715, %v1015_v1   ;;  %v1017_v60 = vld [vmem:[%s8624_s4 + $0x168] sm:$0xff]  ;;  %v703_v1 = vmul.f32 %v6750_v34, %v6615_v44 }
  0xd3   : > { %2264 = vmatmul.mubr.f32.gmra.mrb[24].mxu1 %v804_v0  ;;  %5543 = vmatpush1.bf16.msra.mxu0 %v5542_v61  ;;  %v817_v61 = vld [vmem:[#allocation3 + $0x328] sm:$0xff]  ;;  %v702_v0 = vmul.f32 %v6750_v34, %v6612_v41 }
  0xd4   : > { %1338 = vperm.xlu0 %5714, %v1014_v2   ;;  %2043 = vmatprep.mubr.f32.mxu0 %v743_v62  ;;  %v752_v62 = vld [vmem:[#allocation3 + $0x120] sm:$0xff]  ;;  %v1018_v41 = vld [vmem:[%s8624_s4 + $0x170] sm:$0xff] }
  0xd5   : > { %2268 = vmatprep.mubr.f32.mxu1 %v807_v9  ;;  %5591 = vmatpush1.bf16.msra.mxu1 %v5590_v63  ;;  %v5551_v9 = vpack.c.bf16 %v671_v57, %v670_v54  ;;  %v816_v63 = vld [vmem:[#allocation3 + $0x320] sm:$0xff]  ;;  %v5557_v57 = vpack.c.bf16 %v675_v46, %v674_v45  ;;  %v5993_v46 = vld [vmem:[%s6398_s13 + $0xd8] sm:$0xff] }
  0xd6   : > { %2044 = vmatmul.mubr.f32.gmra.mrb[26].mxu0 %v742_v10  ;;  %1493 = vperm.xlu1 %5715, %v1045_v14   ;;  %v1019_v10 = vld [vmem:[%s8624_s4 + $0x178] sm:$0xff]  ;;  %v760_v54 = vld [vmem:[#allocation3 + $0x160] sm:$0xff] }
  0xd7   : > { %2269 = vmatmul.mubr.f32.gmra.mrb[26].mxu1 %v806_v15  ;;  %2048 = vmatprep.mubr.f32.mxu0 %v745_v18  ;;  %v5599_v15 = vpack.c.bf16 %v703_v1, %v702_v0  ;;  %v754_v18 = vld [vmem:[#allocation3 + $0x130] sm:$0xff]  ;;  %v827_v0 = vld [vmem:[#allocation3 + $0x378] sm:$0xff] }
  0xd8   : > { %1488 = vperm.xlu0 %5714, %v1044_v19   ;;  %2273 = vmatprep.mubr.f32.mxu1 %v809_v20  ;;  %v672_v19 = vmul.f32 %v6736_v27, %v6634_v55  ;;  %v673_v20 = vmul.f32 %v6736_v27, %v6637_v56 }
  0xd9   : > { %5544 = vmatprep.subr.bf16.mxu0 %v6199_v12  ;;  %5592 = vmatprep.subr.bf16.mxu1 %v6199_v12 }
  0xda   : > { %2049 = vmatmul.mubr.f32.gmra.mrb[28].mxu0 %v744_v21  ;;  %1503 = vperm.xlu1 %5715, %v1047_v26   ;;  %v818_v21 = vld [vmem:[#allocation3 + $0x330] sm:$0xff]  ;;  %v821_v26 = vld [vmem:[#allocation3 + $0x348] sm:$0xff] }
  0xdb   : > { %2274 = vmatmul.mubr.f32.gmra.mrb[28].mxu1 %v808_v43  ;;  %5546 = vmatpush1.bf16.msra.mxu0 %v5545_v42  ;;  %v1048_v42 = vld [vmem:[%s8624_s4 + $0x260] sm:$0xff] }
  0xdc   : > { %1498 = vperm.xlu0 %5714, %v1046_v6   ;;  %2053 = vmatprep.mubr.f32.mxu0 %v747_v16  ;;  %v704_v6 = vmul.f32 %v6750_v34, %v6634_v55  ;;  %v705_v16 = vmul.f32 %v6750_v34, %v6637_v56  ;;  %v1050_v55 = vld [vmem:[%s8624_s4 + $0x270] sm:$0xff] }
  0xdd   : > { %2278 = vmatprep.mubr.f32.mxu1 %v811_v28  ;;  %5594 = vmatpush1.bf16.msra.mxu1 %v5593_v17  ;;  %v6936_v23 = vpop.permute.xlu1 %1138  ;;  %v6938_v39 = vpop.permute.xlu0 %1128  ;;  %v756_v17 = vld [vmem:[#allocation3 + $0x140] sm:$0xff] }
  0xde   : > { %2054 = vmatmul.mubr.f32.gmra.mrb[30].mxu0 %v746_v31  ;;  %1653 = vperm.xlu1 %5715, %v1077_v38   ;;  %v5554_v31 = vpack.c.bf16 %v673_v20, %v672_v19  ;;  %v5602_v38 = vpack.c.bf16 %v705_v16, %v704_v6  ;;  %v1020_v19 = vld [vmem:[%s8624_s4 + $0x180] sm:$0xff] }
  0xdf   : > { %2279 = vmatmul.mubr.f32.gmra.mrb[30].mxu1 %v810_v36  ;;  %2058 = vmatprep.mubr.f32.mxu0 %v749_v37  ;;  %v759_v36 = vld [vmem:[#allocation3 + $0x158] sm:$0xff]  ;;  %v828_v16 = vld [vmem:[#allocation3 + $0x380] sm:$0xff] }
  0xe0   : > { %1648 = vperm.xlu0 %5714, %v1076_v22   ;;  %2283 = vmatprep.mubr.f32.mxu1 %v813_v40  ;;  %v823_v37 = vld [vmem:[#allocation3 + $0x358] sm:$0xff]  ;;  %v758_v40 = vld [vmem:[#allocation3 + $0x150] sm:$0xff] }
  0xe1   : > { %5547 = vmatprep.subr.bf16.mxu0 %v6199_v12  ;;  %v6951_v30 = vpop.permute.xlu1 %1143  ;;  %5595 = vmatprep.subr.bf16.mxu1 %v6199_v12  ;;  %v6954_v50 = vpop.permute.xlu0 %1133 }
  0xe2   : > { %2059 = vmatmul.mubr.f32.gmra.mrb[32].mxu0 %v748_v47  ;;  %1663 = vperm.xlu1 %5715, %v1079_v53   ;;  %v822_v47 = vld [vmem:[#allocation3 + $0x350] sm:$0xff]  ;;  %v1080_v53 = vld [vmem:[%s8624_s4 + $0x360] sm:$0xff] }
  0xe3   : > { %2284 = vmatmul.mubr.f32.gmra.mrb[32].mxu1 %v812_v52  ;;  %5549 = vmatpush1.bf16.msra.mxu0 %v5548_v3  ;;  %v761_v3 = vld [vmem:[#allocation3 + $0x168] sm:$0xff] }
  0xe4   : > { %1658 = vperm.xlu0 %5714, %v1078_v29   ;;  %2063 = vmatprep.mubr.f32.mxu0 %v751_v5  ;;  %v1081_v52 = vld [vmem:[%s8624_s4 + $0x368] sm:$0xff]  ;;  %v706_v5 = vmul.f32 %v5988_v8, %v6750_v34 }
  0xe5   : > { %2288 = vmatprep.mubr.f32.mxu1 %v815_v48  ;;  %5597 = vmatpush1.bf16.msra.mxu1 %v5596_v49  ;;  %v6966_v33 = vpop.permute.xlu1 %1153  ;;  %v6972_v2 = vpop.permute.xlu0 %1148  ;;  %v825_v29 = vld [vmem:[#allocation3 + $0x368] sm:$0xff]  ;;  %v5989_v48 = vld [vmem:[%s6398_s13 + $0xb8] sm:$0xff] }
  0xe6   : > { %2064 = vmatmul.mubr.f32.gmra.mrb[34].mxu0 %v750_v51  ;;  %1353 = vperm.xlu1 %5715, %v1017_v60   ;;  %v707_v49 = vmul.f32 %v5989_v48, %v6750_v34  ;;  %v1082_v60 = vld [vmem:[%s8624_s4 + $0x370] sm:$0xff]  ;;  %v711_v48 = vmul.f32 %v5993_v46, %v6750_v34 }
  0xe7   : > { %2289 = vmatmul.mubr.f32.gmra.mrb[34].mxu1 %v814_v58  ;;  %2068 = vmatprep.mubr.f32.mxu0 %v753_v59  ;;  %v824_v58 = vld [vmem:[#allocation3 + $0x360] sm:$0xff]  ;;  %v1083_v59 = vld [vmem:[%s8624_s4 + $0x378] sm:$0xff] }
  0xe8   : > { %1348 = vperm.xlu0 %5714, %v1016_v32   ;;  %2293 = vmatprep.mubr.f32.mxu1 %v817_v61  ;;  %v763_v61 = vld [vmem:[#allocation3 + $0x178] sm:$0xff]  ;;  %v5605_v1 = vpack.c.bf16 %v707_v49, %v706_v5  ;;  %v833_v5 = vld [vmem:[#allocation3 + $0x3a8] sm:$0xff] }
  0xe9   : > { %5550 = vmatprep.subr.bf16.mxu0 %v6199_v12  ;;  %v6981_v44 = vpop.permute.xlu1 %1163  ;;  %5598 = vmatprep.subr.bf16.mxu1 %v6199_v12  ;;  %v6984_v14 = vpop.permute.xlu0 %1158 }
  0xea   : > { %2069 = vmatmul.mubr.f32.gmra.mrb[36].mxu0 %v752_v62  ;;  %1363 = vperm.xlu1 %5715, %v1019_v10  }
  0xeb   : > { %2294 = vmatmul.mubr.f32.gmra.mrb[36].mxu1 %v816_v63  ;;  %5552 = vmatpush1.bf16.msra.mxu0 %v5551_v9  ;;  %v762_v9 = vld [vmem:[#allocation3 + $0x170] sm:$0xff]  ;;  %v5990_v63 = vld [vmem:[%s6398_s13 + $0xc0] sm:$0xff] }
  0xec   : > { %1358 = vperm.xlu0 %5714, %v1018_v41   ;;  %2073 = vmatprep.mubr.f32.mxu0 %v755_v13  ;;  %v676_v10 = vmul.f32 %v5990_v63, %v6736_v27  ;;  %v5991_v41 = vld [vmem:[%s6398_s13 + $0xc8] sm:$0xff] }
  0xed   : > { %2298 = vmatprep.mubr.f32.mxu1 %v819_v11  ;;  %5600 = vmatpush1.bf16.msra.mxu1 %v5599_v15  ;;  %v6996_v43 = vpop.permute.xlu1 %1173  ;;  %v7002_v28 = vpop.permute.xlu0 %1168  ;;  %v677_v13 = vmul.f32 %v5991_v41, %v6736_v27  ;;  %v826_v11 = vld [vmem:[#allocation3 + $0x370] sm:$0xff]  ;;  %v765_v15 = vld [vmem:[#allocation3 + $0x188] sm:$0xff] }
  0xee   : > { %2074 = vmatmul.mubr.f32.gmra.mrb[38].mxu0 %v754_v18  ;;  %1513 = vperm.xlu1 %5715, %v1049_v25   ;;  %v1021_v18 = vld [vmem:[%s8624_s4 + $0x188] sm:$0xff]  ;;  %v709_v25 = vmul.f32 %v5991_v41, %v6750_v34 }
  0xef   : > { %2299 = vmatmul.mubr.f32.gmra.mrb[38].mxu1 %v818_v21  ;;  %2078 = vmatprep.mubr.f32.mxu0 %v757_v24  ;;  %v829_v21 = vld [vmem:[#allocation3 + $0x388] sm:$0xff]  ;;  %v708_v24 = vmul.f32 %v5990_v63, %v6750_v34  ;;  %v5560_v6 = vpack.c.bf16 %v677_v13, %v676_v10  ;;  %v835_v63 = vld [vmem:[#allocation3 + $0x3b8] sm:$0xff]  ;;  %v770_v13 = vld [vmem:[#allocation3 + $0x1b0] sm:$0xff] }
  0xf0   : > { %1508 = vperm.xlu0 %5714, %v1048_v42   ;;  %2303 = vmatprep.mubr.f32.mxu1 %v821_v26  ;;  %v764_v26 = vld [vmem:[#allocation3 + $0x180] sm:$0xff] }
  0xf1   : > { %5553 = vmatprep.subr.bf16.mxu0 %v6199_v12  ;;  %v7011_v56 = vpop.permute.xlu1 %1183  ;;  %5601 = vmatprep.subr.bf16.mxu1 %v6199_v12  ;;  %v7014_v22 = vpop.permute.xlu0 %1178 }
  0xf2   : > { %2079 = vmatmul.mubr.f32.gmra.mrb[40].mxu0 %v756_v17  ;;  %1523 = vperm.xlu1 %5715, %v1051_v35   ;;  %v1023_v17 = vld [vmem:[%s8624_s4 + $0x198] sm:$0xff] }
  0xf3   : > { %2304 = vmatmul.mubr.f32.gmra.mrb[40].mxu1 %v820_v7  ;;  %5555 = vmatpush1.bf16.msra.mxu0 %v5554_v31  ;;  %v1022_v31 = vld [vmem:[%s8624_s4 + $0x190] sm:$0xff]  ;;  %v767_v35 = vld [vmem:[#allocation3 + $0x198] sm:$0xff] }
  0xf4   : > { %1518 = vperm.xlu0 %5714, %v1050_v55   ;;  %2083 = vmatprep.mubr.f32.mxu0 %v759_v36  ;;  %v831_v55 = vld [vmem:[#allocation3 + $0x398] sm:$0xff]  ;;  %v5608_v36 = vpack.c.bf16 %v709_v25, %v708_v24  ;;  %v834_v24 = vld [vmem:[#allocation3 + $0x3b0] sm:$0xff]  ;;  %v773_v25 = vld [vmem:[#allocation3 + $0x1c8] sm:$0xff] }
  0xf5   : > { %2308 = vmatprep.mubr.f32.mxu1 %v823_v37  ;;  %5603 = vmatpush1.bf16.msra.mxu1 %v5602_v38  ;;  %v7026_v4 = vpop.permute.xlu1 %1193  ;;  %v7032_v51 = vpop.permute.xlu0 %1188  ;;  %v766_v38 = vld [vmem:[#allocation3 + $0x190] sm:$0xff] }
  0xf6   : > { %2084 = vmatmul.mubr.f32.gmra.mrb[42].mxu0 %v758_v40  ;;  %1673 = vperm.xlu1 %5715, %v1081_v52   ;;  %v5992_v40 = vld [vmem:[%s6398_s13 + $0xd0] sm:$0xff] }
  0xf7   : > { %2309 = vmatmul.mubr.f32.gmra.mrb[42].mxu1 %v822_v47  ;;  %2088 = vmatprep.mubr.f32.mxu0 %v761_v3  ;;  %v678_v45 = vmul.f32 %v5992_v40, %v6736_v27  ;;  %v679_v47 = vmul.f32 %v5993_v46, %v6736_v27  ;;  %v830_v3 = vld [vmem:[#allocation3 + $0x390] sm:$0xff]  ;;  %v769_v52 = vld [vmem:[#allocation3 + $0x1a8] sm:$0xff]  ;;  %v710_v27 = vmul.f32 %v5992_v40, %v6750_v34 }
  0xf8   : > { %1668 = vperm.xlu0 %5714, %v1080_v53   ;;  %2313 = vmatprep.mubr.f32.mxu1 %v825_v29  ;;  %v1053_v53 = vld [vmem:[%s8624_s4 + $0x288] sm:$0xff]  ;;  %v1052_v29 = vld [vmem:[%s8624_s4 + $0x280] sm:$0xff]  ;;  %v1054_v34 = vld [vmem:[%s8624_s4 + $0x290] sm:$0xff] }
  0xf9   : > { %5556 = vmatprep.subr.bf16.mxu0 %v6199_v12  ;;  %v7041_v32 = vpop.permute.xlu1 %1203  ;;  %5604 = vmatprep.subr.bf16.mxu1 %v6199_v12  ;;  %v7044_v62 = vpop.permute.xlu0 %1198  ;;  %v5611_v10 = vpack.c.bf16 %v711_v48, %v710_v27  ;;  %v839_v27 = vld [vmem:[#allocation3 + $0x3d8] sm:$0xff] }
  0xfa   : > { %2089 = vmatmul.mubr.f32.gmra.mrb[44].mxu0 %v760_v54  ;;  %1683 = vperm.xlu1 %5715, %v1083_v59   ;;  %v768_v54 = vld [vmem:[#allocation3 + $0x1a0] sm:$0xff]  ;;  %v1055_v59 = vld [vmem:[%s8624_s4 + $0x298] sm:$0xff] }
  0xfb   : > { %2314 = vmatmul.mubr.f32.gmra.mrb[44].mxu1 %v824_v58  ;;  %5558 = vmatpush1.bf16.msra.mxu0 %v5557_v57  ;;  %v5563_v57 = vpack.c.bf16 %v679_v47, %v678_v45  ;;  %v832_v58 = vld [vmem:[#allocation3 + $0x3a0] sm:$0xff] }
  0xfc   : > { %1678 = vperm.xlu0 %5714, %v1082_v60   ;;  %2093 = vmatprep.mubr.f32.mxu0 %v763_v61  ;;  %v6200_v60 = vmov 1966171168   ;;  %v772_v45 = vld [vmem:[#allocation3 + $0x1c0] sm:$0xff] }
  0xfd   : > { %2318 = vmatprep.mubr.f32.mxu1 %v827_v0  ;;  %5606 = vmatpush1.bf16.msra.mxu1 %v5605_v1  ;;  %v7056_v20 = vpop.permute.xlu1 %1213  ;;  %v7060_v42 = vpop.permute.xlu0 %1208  ;;  %v1111_v61 = vunpack.c.l.s4 %v6200_v60  ;;  %v1113_v0 = vlaneseq  ;;  %v836_v47 = vld [vmem:[#allocation3 + $0x3c0] sm:$0xff] }
  0xfe   : > { %2094 = vmatmul.mubr.f32.gmra.mrb[46].mxu0 %v762_v9  ;;  %1373 = vperm.xlu1 %5715, %v1021_v18   ;;  %v771_v9 = vld [vmem:[#allocation3 + $0x1b8] sm:$0xff] }
  0xff   : > { %2319 = vmatmul.mubr.f32.gmra.mrb[46].mxu1 %v826_v11  ;;  %2098 = vmatprep.mubr.f32.mxu0 %v765_v15  ;;  %v5994_v11 = vld [vmem:[%s6398_s13 + $0xe0] sm:$0xff] }
 0x100   : > { %1368 = vperm.xlu0 %5714, %v1020_v19   ;;  %2323 = vmatprep.mubr.f32.mxu1 %v829_v21  ;;  %v5995_v15 = vld [vmem:[%s8621_s1 + $0x2] ss:$0 sm:$0xff]  ;;  %v5996_v19 = vld [vmem:[%s6398_s13 + $0xe8] sm:$0xff] }
 0x101   : > { %5559 = vmatprep.subr.bf16.mxu0 %v6199_v12  ;;  %v7069_v7 = vpop.permute.xlu1 %1223  ;;  %5607 = vmatprep.subr.bf16.mxu1 %v6199_v12  ;;  %v7072_v37 = vpop.permute.xlu0 %1218  ;;  %v680_v18 = vmul.f32 %v5995_v15, %v5994_v11  ;;  %v681_v21 = vmul.f32 %v5996_v19, %v5995_v15 }
 0x102   : > { %2099 = vmatmul.mubr.f32.gmra.mrb[48].mxu0 %v764_v26  ;;  %1383 = vperm.xlu1 %5715, %v1023_v17   ;;  %v1085_v26 = vld [vmem:[%s8624_s4 + $0x388] sm:$0xff]  ;;  %v1114_v17 = vshrl.u32 %v1113_v0, 7 }
 0x103   : > { %2324 = vmatmul.mubr.f32.gmra.mrb[48].mxu1 %v828_v16  ;;  %5561 = vmatpush1.bf16.msra.mxu0 %v5560_v6  ;;  %v1084_v6 = vld [vmem:[%s8624_s4 + $0x380] sm:$0xff]  ;;  %v1112_v16 = vunpack.c.0.s8 %v1111_v61  ;;  %v5566_v46 = vpack.c.bf16 %v681_v21, %v680_v18  ;;  %v838_v61 = vld [vmem:[#allocation3 + $0x3d0] sm:$0xff]  ;;  %v777_v0 = vld [vmem:[#allocation3 + $0x1e8] sm:$0xff] }
 0x104   : > { %1378 = vperm.xlu0 %5714, %v1022_v31   ;;  %2103 = vmatprep.mubr.f32.mxu0 %v767_v35  ;;  %v837_v35 = vld [vmem:[#allocation3 + $0x3c8] sm:$0xff] }
 0x105   : > { %2328 = vmatprep.mubr.f32.mxu1 %v831_v55  ;;  %5609 = vmatpush1.bf16.msra.mxu1 %v5608_v36  ;;  %v7084_v8 = vpop.permute.xlu1 %1233  ;;  %v7088_v49 = vpop.permute.xlu0 %1228  ;;  %v5997_v55 = vld [vmem:[%s8621_s1 + $0x3] ss:$0 sm:$0xff]  ;;  %v841_v18 = vld [vmem:[#allocation3 + $0x3e8] sm:$0xff] }
 0x106   : > { %2104 = vmatmul.mubr.f32.gmra.mrb[50].mxu0 %v766_v38  ;;  %1533 = vperm.xlu1 %5715, %v1053_v53   ;;  %v712_v36 = vmul.f32 %v5997_v55, %v5994_v11  ;;  %v713_v38 = vmul.f32 %v5997_v55, %v5996_v19  ;;  %v7127_v53 = vsub.s32 %v1112_v16, %v1114_v17  ;;  %v7148_v11 = vsub.s32 0, %v1114_v17  ;;  %v1027_v16 = vld [vmem:[%s8624_s4 + $0x1b8] sm:$0xff]  ;;  %v1026_v17 = vld [vmem:[%s8624_s4 + $0x1b0] sm:$0xff] }
 0x107   : > { %2329 = vmatmul.mubr.f32.gmra.mrb[50].mxu1 %v830_v3  ;;  %2108 = vmatprep.mubr.f32.mxu0 %v769_v52  ;;  %v1087_v3 = vld [vmem:[%s8624_s4 + $0x398] sm:$0xff]  ;;  %v1086_v52 = vld [vmem:[%s8624_s4 + $0x390] sm:$0xff] }
 0x108   : > { %1528 = vperm.xlu0 %5714, %v1052_v29   ;;  %2333 = vmatprep.mubr.f32.mxu1 %v833_v5  ;;  %v775_v5 = vld [vmem:[#allocation3 + $0x1d8] sm:$0xff]  ;;  %v5614_v48 = vpack.c.bf16 %v713_v38, %v712_v36  ;;  %8676 = vst [vmem:[#allocation23_spill] sm:$0xff] %v7148_v11 }
 0x109   : > { %5562 = vmatprep.subr.bf16.mxu0 %v6199_v12  ;;  %v7097_v1 = vpop.permute.xlu1 %1243  ;;  %5610 = vmatprep.subr.bf16.mxu1 %v6199_v12  ;;  %v7100_v41 = vpop.permute.xlu0 %1238  ;;  %v779_v36 = vld [vmem:[#allocation3 + $0x1f8] sm:$0xff] }
 0x10a   : > { %2109 = vmatmul.mubr.f32.gmra.mrb[52].mxu0 %v768_v54  ;;  %1543 = vperm.xlu1 %5715, %v1055_v59   ;;  %v843_v38 = vld [vmem:[#allocation3 + $0x3f8] sm:$0xff] }
 0x10b   : > { %2334 = vmatmul.mubr.f32.gmra.mrb[52].mxu1 %v832_v58  ;;  %5564 = vmatpush1.bf16.msra.mxu0 %v5563_v57  ;;  %v774_v57 = vld [vmem:[#allocation3 + $0x1d0] sm:$0xff] }
 0x10c   : > { %1538 = vperm.xlu0 %5714, %v1054_v34   ;;  %2113 = vmatprep.mubr.f32.mxu0 %v771_v9  ;;  %v5998_v58 = vld [vmem:[%s6398_s13 + $0xf0] sm:$0xff]  ;;  %v5999_v34 = vld [vmem:[%s6398_s13 + $0xf8] sm:$0xff]  ;;  %v7136_v9 = vld.sshfl [vmem:[#allocation2] sm:$0x33 pattern:$0x75316420] }
 0x10d   : > { %2338 = vmatprep.mubr.f32.mxu1 %v835_v63  ;;  %5612 = vmatpush1.bf16.msra.mxu1 %v5611_v10  ;;  %v7113_v31 = vpop.permute.xlu1 %1253  ;;  %v7118_v40 = vpop.permute.xlu0 %1248  ;;  %v682_v59 = vmul.f32 %v5998_v58, %v5995_v15  ;;  %v683_v60 = vmul.f32 %v5999_v34, %v5995_v15  ;;  %v1025_v63 = vld [vmem:[%s8624_s4 + $0x1a8] sm:$0xff]  ;;  %v1024_v10 = vld [vmem:[%s8624_s4 + $0x1a0] sm:$0xff]  ;;  %v714_v19 = vmul.f32 %v5998_v58, %v5997_v55 }
 0x10e   : > { %2114 = vmatmul.mubr.f32.gmra.mrb[54].mxu0 %v770_v13  ;;  %1693 = vperm.xlu1 %5715, %v1085_v26   ;;  %v7146_v13 = vrot.slane %v7136_v9, %v7127_v53  ;;  %v715_v21 = vmul.f32 %v5999_v34, %v5997_v55  ;;  %v908_v34 = vld [vmem:[#allocation3 + $0x600] sm:$0xff] }
 0x10f   : > { %2339 = vmatmul.mubr.f32.gmra.mrb[54].mxu1 %v834_v24  ;;  %2118 = vmatprep.mubr.f32.mxu0 %v773_v25  ;;  %v776_v25 = vld [vmem:[#allocation3 + $0x1e0] sm:$0xff]  ;;  %v5569_v26 = vpack.c.bf16 %v683_v60, %v682_v59  ;;  %v847_v60 = vld [vmem:[#allocation3 + $0x418] sm:$0xff] }
 0x110   : > { %1688 = vperm.xlu0 %5714, %v1084_v6   ;;  %2343 = vmatprep.mubr.f32.mxu1 %v837_v35  ;;  %8675 = vst [vmem:[#allocation22_spill] sm:$0xff] %v7146_v13  ;;  %v840_v6 = vld [vmem:[#allocation3 + $0x3e0] sm:$0xff]  ;;  %v7163_v35 = vrot.slane %v7146_v13, %v7148_v11 }
 0x111   : > { %5565 = vmatprep.subr.bf16.mxu0 %v6199_v12  ;;  %v7129_v29 = vpop.permute.xlu1 %1263  ;;  %5613 = vmatprep.subr.bf16.mxu1 %v6199_v12  ;;  %v7132_v54 = vpop.permute.xlu0 %1258  ;;  %v844_v59 = vld [vmem:[#allocation3 + $0x400] sm:$0xff] }
 0x112   : > { %2119 = vmatmul.mubr.f32.gmra.mrb[56].mxu0 %v772_v45  ;;  %1703 = vperm.xlu1 %5715, %v1087_v3   ;;  %v5617_v45 = vpack.c.bf16 %v715_v21, %v714_v19  ;;  %v846_v19 = vld [vmem:[#allocation3 + $0x410] sm:$0xff] }
 0x113   : > { %2344 = vmatmul.mubr.f32.gmra.mrb[56].mxu1 %v836_v47  ;;  %5567 = vmatpush1.bf16.msra.mxu0 %v5566_v46  ;;  %v778_v47 = vld [vmem:[#allocation3 + $0x1f0] sm:$0xff] }
 0x114   : > { %1698 = vperm.xlu0 %5714, %v1086_v52   ;;  %2123 = vmatprep.mubr.f32.mxu0 %v775_v5  ;;  %v842_v52 = vld [vmem:[#allocation3 + $0x3f0] sm:$0xff]  ;;  %v845_v5 = vld [vmem:[#allocation3 + $0x408] sm:$0xff] }
 0x115   : > { %2348 = vmatprep.mubr.f32.mxu1 %v839_v27  ;;  %5615 = vmatpush1.bf16.msra.mxu1 %v5614_v48  ;;  %v7150_v15 = vpop.permute.xlu1 %1273  ;;  %v7152_v24 = vpop.permute.xlu0 %1268  ;;  %v1056_v27 = vld [vmem:[%s8624_s4 + $0x2a0] sm:$0xff]  ;;  %v910_v21 = vld [vmem:[#allocation3 + $0x610] sm:$0xff] }
 0x116   : > { %2124 = vmatmul.mubr.f32.gmra.mrb[58].mxu0 %v774_v57  ;;  %8677 = vst [vmem:[#allocation24_spill] sm:$0xff] %v7150_v15  ;;  %8678 = vst [vmem:[#allocation25_spill] sm:$0xff] %v7152_v24  ;;  %1393 = vperm.xlu1 %5715, %v1025_v63   ;;  %v909_v57 = vld [vmem:[#allocation3 + $0x608] sm:$0xff]  ;;  %v911_v63 = vld [vmem:[#allocation3 + $0x618] sm:$0xff] }
 0x117   : > { %2349 = vmatmul.mubr.f32.gmra.mrb[58].mxu1 %v838_v61  ;;  %2128 = vmatprep.mubr.f32.mxu0 %v777_v0  ;;  %v1059_v61 = vld [vmem:[%s8624_s4 + $0x2b8] sm:$0xff]  ;;  %v1058_v0 = vld [vmem:[%s8624_s4 + $0x2b0] sm:$0xff] }
 0x118   : > { %1388 = vperm.xlu0 %5714, %v1024_v10   ;;  %2353 = vmatprep.mubr.f32.mxu1 %v841_v18 }
 0x119   : > { %5568 = vmatprep.subr.bf16.mxu0 %v6199_v12  ;;  %v7165_v55 = vpop.permute.xlu1 %1283  ;;  %5616 = vmatprep.subr.bf16.mxu1 %v6199_v12  ;;  %v1279_v46 = vpop.permute.xlu0 %1278  ;;  %v1057_v12 = vld [vmem:[%s8624_s4 + $0x2a8] sm:$0xff] }
 0x11a   : > { %2129 = vmatmul.mubr.f32.gmra.mrb[60].mxu0 %v776_v25  ;;  %8679 = vst [vmem:[#allocation26_spill] sm:$0xff] %v7165_v55  ;;  %v7169_v3 = vmul.f32 %v7163_v35, %v1279_v46  ;;  %1403 = vperm.xlu1 %5715, %v1027_v16   ;;  %v849_v25 = vld [vmem:[#allocation3 + $0x428] sm:$0xff]  ;;  %v851_v46 = vld [vmem:[#allocation3 + $0x438] sm:$0xff] }
 0x11b   : > { %2354 = vmatmul.mubr.f32.gmra.mrb[60].mxu1 %v840_v6  ;;  %5570 = vmatpush1.bf16.msra.mxu0 %v5569_v26  ;;  %v1089_v26 = vld [vmem:[%s8624_s4 + $0x3a8] sm:$0xff]  ;;  %v1088_v6 = vld [vmem:[%s8624_s4 + $0x3a0] sm:$0xff] }
 0x11c   : > { %8680 = vst [vmem:[#allocation27_spill] sm:$0xff] %v7169_v3  ;;  %1398 = vperm.xlu0 %5714, %v1026_v17   ;;  %2133 = vmatprep.mubr.f32.mxu0 %v779_v36  ;;  %v913_v16 = vld [vmem:[#allocation3 + $0x628] sm:$0xff]  ;;  %v951_v55 = vld [vmem:[#allocation3 + $0x758] sm:$0xff] }
 0x11d   : > { %2358 = vmatprep.mubr.f32.mxu1 %v843_v38  ;;  %5618 = vmatpush1.bf16.msra.mxu1 %v5617_v45  ;;  %v7177_v48 = vpop.permute.xlu1 %1293  ;;  %v7179_v58 = vpop.permute.xlu0 %1288  ;;  %v848_v38 = vld [vmem:[#allocation3 + $0x420] sm:$0xff] }
 0x11e   : > { %2134 = vmatmul.mubr.f32.gmra.mrb[62].mxu0 %v778_v47  ;;  %1553 = vperm.xlu1 %5715, %v1057_v12   ;;  %v912_v45 = vld [vmem:[#allocation3 + $0x620] sm:$0xff]  ;;  %v1091_v47 = vld [vmem:[%s8624_s4 + $0x3b8] sm:$0xff] }
 0x11f   : > { %2359 = vmatmul.mubr.f32.gmra.mrb[62].mxu1 %v842_v52  ;;  %2428 = vmatprep.mubr.f32.mxu0 %v845_v5  ;;  %v1090_v52 = vld [vmem:[%s8624_s4 + $0x3b0] sm:$0xff]  ;;  %v915_v5 = vld [vmem:[#allocation3 + $0x638] sm:$0xff] }
 0x120   : > { %1548 = vperm.xlu0 %5714, %v1056_v27   ;;  %2653 = vmatprep.mubr.f32.mxu1 %v909_v57  ;;  %v850_v57 = vld [vmem:[#allocation3 + $0x430] sm:$0xff] }
 0x121   : > { %v7187_v10 = vpop.permute.xlu1 %1303 }
 0x122   : > { %2429 = vmatmul.mubr.f32.vlgmr.msra.gmra.mrb[64].mxu0 %v844_v59  ;;  %1563 = vperm.xlu1 %5715, %v1059_v61   ;;  %v914_v59 = vld [vmem:[#allocation3 + $0x630] sm:$0xff]  ;;  %v1028_v61 = vld [vmem:[%s8624_s4 + $0x1c0] sm:$0xff] }
 0x123   : > { %2654 = vmatmul.mubr.f32.vlgmr.msra.gmra.mrb[64].mxu1 %v908_v34  ;;  %v7189_v18 = vpop.permute.xlu0 %1298  ;;  %2433 = vmatprep.mubr.f32.mxu0 %v847_v60  ;;  %v853_v34 = vld [vmem:[#allocation3 + $0x448] sm:$0xff] }
 0x124   : > { %1558 = vperm.xlu0 %5714, %v1058_v0   ;;  %2658 = vmatprep.mubr.f32.mxu1 %v911_v63  ;;  %v1029_v60 = vld [vmem:[%s8624_s4 + $0x1c8] sm:$0xff] }
 0x125   : > { %v7197_v17 = vpop.permute.xlu1 %1453  ;;  %v917_v0 = vld [vmem:[#allocation3 + $0x648] sm:$0xff] }
 0x126   : > { %2434 = vmatmul.mubr.f32.gmra.mrb[66].mxu0 %v846_v19  ;;  %8681 = vst [vmem:[#allocation28_spill] sm:$0xff] %v7197_v17  ;;  %1713 = vperm.xlu1 %5715, %v1089_v26   ;;  %v855_v26 = vld [vmem:[#allocation3 + $0x458] sm:$0xff]  ;;  %v877_v17 = vld [vmem:[#allocation3 + $0x508] sm:$0xff] }
 0x127   : > { %2659 = vmatmul.mubr.f32.gmra.mrb[66].mxu1 %v910_v21  ;;  %v7199_v36 = vpop.permute.xlu0 %1448  ;;  %2438 = vmatprep.mubr.f32.mxu0 %v849_v25  ;;  %v852_v21 = vld [vmem:[#allocation3 + $0x440] sm:$0xff] }
 0x128   : > { %8682 = vst [vmem:[#allocation29_spill] sm:$0xff] %v7199_v36  ;;  %1708 = vperm.xlu0 %5714, %v1088_v6   ;;  %2663 = vmatprep.mubr.f32.mxu1 %v913_v16  ;;  %v916_v25 = vld [vmem:[#allocation3 + $0x640] sm:$0xff]  ;;  %v1031_v6 = vld [vmem:[%s8624_s4 + $0x1d8] sm:$0xff]  ;;  %v1030_v16 = vld [vmem:[%s8624_s4 + $0x1d0] sm:$0xff] }
 0x129   : > { %v7207_v12 = vpop.permute.xlu1 %1463  ;;  %v949_v36 = vld [vmem:[#allocation3 + $0x748] sm:$0xff] }
 0x12a   : > { %2439 = vmatmul.mubr.f32.gmra.mrb[68].mxu0 %v848_v38  ;;  %8683 = vst [vmem:[#allocation30_spill] sm:$0xff] %v7207_v12  ;;  %1723 = vperm.xlu1 %5715, %v1091_v47   ;;  %v919_v38 = vld [vmem:[#allocation3 + $0x658] sm:$0xff]  ;;  %v854_v47 = vld [vmem:[#allocation3 + $0x450] sm:$0xff]  ;;  %v869_v12 = vld [vmem:[#allocation3 + $0x4c8] sm:$0xff] }
 0x12b   : > { %2664 = vmatmul.mubr.f32.gmra.mrb[68].mxu1 %v912_v45  ;;  %v7209_v27 = vpop.permute.xlu0 %1458  ;;  %2443 = vmatprep.mubr.f32.mxu0 %v851_v46 }
 0x12c   : > { %8684 = vst [vmem:[#allocation31_spill] sm:$0xff] %v7209_v27  ;;  %1718 = vperm.xlu0 %5714, %v1090_v52   ;;  %2668 = vmatprep.mubr.f32.mxu1 %v915_v5  ;;  %v918_v52 = vld [vmem:[#allocation3 + $0x650] sm:$0xff]  ;;  %v857_v5 = vld [vmem:[#allocation3 + $0x468] sm:$0xff] }
 0x12d   : > { %v7217_v63 = vpop.permute.xlu1 %1613  ;;  %v1097_v27 = vld [vmem:[%s8624_s4 + $0x3e8] sm:$0xff] }
 0x12e   : > { %2444 = vmatmul.mubr.f32.gmra.mrb[70].mxu0 %v850_v57  ;;  %8685 = vst [vmem:[#allocation32_spill] sm:$0xff] %v7217_v63  ;;  %1413 = vperm.xlu1 %5715, %v1029_v60   ;;  %v1061_v57 = vld [vmem:[%s8624_s4 + $0x2c8] sm:$0xff]  ;;  %v875_v63 = vld [vmem:[#allocation3 + $0x4f8] sm:$0xff] }
 0x12f   : > { %2669 = vmatmul.mubr.f32.gmra.mrb[70].mxu1 %v914_v59  ;;  %v7219_v19 = vpop.permute.xlu0 %1608  ;;  %2448 = vmatprep.mubr.f32.mxu0 %v853_v34  ;;  %v1060_v59 = vld [vmem:[%s8624_s4 + $0x2c0] sm:$0xff]  ;;  %v921_v34 = vld [vmem:[#allocation3 + $0x668] sm:$0xff] }
 0x130   : > { %8686 = vst [vmem:[#allocation33_spill] sm:$0xff] %v7219_v19  ;;  %1408 = vperm.xlu0 %5714, %v1028_v61   ;;  %2673 = vmatprep.mubr.f32.mxu1 %v917_v0  ;;  %v856_v0 = vld [vmem:[#allocation3 + $0x460] sm:$0xff]  ;;  %v941_v19 = vld [vmem:[#allocation3 + $0x708] sm:$0xff] }
 0x131   : > { %v7227_v45 = vpop.permute.xlu1 %1623 }
 0x132   : > { %2449 = vmatmul.mubr.f32.gmra.mrb[72].mxu0 %v852_v21  ;;  %8687 = vst [vmem:[#allocation34_spill] sm:$0xff] %v7227_v45  ;;  %1423 = vperm.xlu1 %5715, %v1031_v6   ;;  %v920_v21 = vld [vmem:[#allocation3 + $0x660] sm:$0xff]  ;;  %v1062_v6 = vld [vmem:[%s8624_s4 + $0x2d0] sm:$0xff]  ;;  %v1095_v45 = vld [vmem:[%s8624_s4 + $0x3d8] sm:$0xff] }
 0x133   : > { %2674 = vmatmul.mubr.f32.gmra.mrb[72].mxu1 %v916_v25  ;;  %v7229_v46 = vpop.permute.xlu0 %1618  ;;  %2453 = vmatprep.mubr.f32.mxu0 %v855_v26  ;;  %v859_v25 = vld [vmem:[#allocation3 + $0x478] sm:$0xff] }
 0x134   : > { %8688 = vst [vmem:[#allocation35_spill] sm:$0xff] %v7229_v46  ;;  %1418 = vperm.xlu0 %5714, %v1030_v16   ;;  %2678 = vmatprep.mubr.f32.mxu1 %v919_v38  ;;  %v1063_v26 = vld [vmem:[%s8624_s4 + $0x2d8] sm:$0xff] }
 0x135   : > { %v7237_v60 = vpop.permute.xlu1 %1313  ;;  %v923_v16 = vld [vmem:[#allocation3 + $0x678] sm:$0xff] }
 0x136   : > { %2454 = vmatmul.mubr.f32.gmra.mrb[74].mxu0 %v854_v47  ;;  %1573 = vperm.xlu1 %5715, %v1061_v57   ;;  %v861_v57 = vld [vmem:[#allocation3 + $0x488] sm:$0xff]  ;;  %v1067_v46 = vld [vmem:[%s8624_s4 + $0x2f8] sm:$0xff] }
 0x137   : > { %2679 = vmatmul.mubr.f32.gmra.mrb[74].mxu1 %v918_v52  ;;  %v7239_v61 = vpop.permute.xlu0 %1308  ;;  %2458 = vmatprep.mubr.f32.mxu0 %v857_v5  ;;  %v858_v52 = vld [vmem:[#allocation3 + $0x470] sm:$0xff] }
 0x138   : > { %1568 = vperm.xlu0 %5714, %v1060_v59   ;;  %2683 = vmatprep.mubr.f32.mxu1 %v921_v34  ;;  %v922_v5 = vld [vmem:[#allocation3 + $0x670] sm:$0xff]  ;;  %v1093_v59 = vld [vmem:[%s8624_s4 + $0x3c8] sm:$0xff]  ;;  %v1092_v34 = vld [vmem:[%s8624_s4 + $0x3c0] sm:$0xff] }
 0x139   : > { %v7247_v38 = vpop.permute.xlu1 %1323 }
 0x13a   : > { %2459 = vmatmul.mubr.f32.gmra.mrb[76].mxu0 %v856_v0  ;;  %1583 = vperm.xlu1 %5715, %v1063_v26   ;;  %v925_v0 = vld [vmem:[#allocation3 + $0x688] sm:$0xff]  ;;  %v860_v26 = vld [vmem:[#allocation3 + $0x480] sm:$0xff] }
 0x13b   : > { %2684 = vmatmul.mubr.f32.gmra.mrb[76].mxu1 %v920_v21  ;;  %v7249_v47 = vpop.permute.xlu0 %1318  ;;  %2463 = vmatprep.mubr.f32.mxu0 %v859_v25 }
 0x13c   : > { %1578 = vperm.xlu0 %5714, %v1062_v6   ;;  %2688 = vmatprep.mubr.f32.mxu1 %v923_v16  ;;  %v924_v6 = vld [vmem:[#allocation3 + $0x680] sm:$0xff]  ;;  %v863_v16 = vld [vmem:[#allocation3 + $0x498] sm:$0xff] }
 0x13d   : > { %v7257_v21 = vpop.permute.xlu1 %1473 }
 0x13e   : > { %2464 = vmatmul.mubr.f32.gmra.mrb[78].mxu0 %v858_v52  ;;  %8689 = vst [vmem:[#allocation36_spill] sm:$0xff] %v7257_v21  ;;  %1733 = vperm.xlu1 %5715, %v1093_v59   ;;  %v1094_v52 = vld [vmem:[%s8624_s4 + $0x3d0] sm:$0xff] }
 0x13f   : > { %2689 = vmatmul.mubr.f32.gmra.mrb[78].mxu1 %v922_v5  ;;  %v7259_v25 = vpop.permute.xlu0 %1468  ;;  %2468 = vmatprep.mubr.f32.mxu0 %v861_v57  ;;  %v927_v5 = vld [vmem:[#allocation3 + $0x698] sm:$0xff]  ;;  %v862_v59 = vld [vmem:[#allocation3 + $0x490] sm:$0xff] }
 0x140   : > { %8690 = vst [vmem:[#allocation37_spill] sm:$0xff] %v7259_v25  ;;  %1728 = vperm.xlu0 %5714, %v1092_v34   ;;  %2693 = vmatprep.mubr.f32.mxu1 %v925_v0  ;;  %v926_v34 = vld [vmem:[#allocation3 + $0x690] sm:$0xff]  ;;  %v865_v0 = vld [vmem:[#allocation3 + $0x4a8] sm:$0xff] }
 0x141   : > { %v7267_v21 = vpop.permute.xlu1 %1483  ;;  %v1033_v25 = vld [vmem:[%s8624_s4 + $0x1e8] sm:$0xff] }
 0x142   : > { %2469 = vmatmul.mubr.f32.gmra.mrb[80].mxu0 %v860_v26  ;;  %8691 = vst [vmem:[#allocation38_spill] sm:$0xff] %v7267_v21  ;;  %1743 = vperm.xlu1 %5715, %v1095_v45   ;;  %v1032_v26 = vld [vmem:[%s8624_s4 + $0x1e0] sm:$0xff] }
 0x143   : > { %2694 = vmatmul.mubr.f32.gmra.mrb[80].mxu1 %v924_v6  ;;  %v7269_v57 = vpop.permute.xlu0 %1478  ;;  %2473 = vmatprep.mubr.f32.mxu0 %v863_v16  ;;  %v929_v6 = vld [vmem:[#allocation3 + $0x6a8] sm:$0xff]  ;;  %v864_v45 = vld [vmem:[#allocation3 + $0x4a0] sm:$0xff] }
 0x144   : > { %8692 = vst [vmem:[#allocation39_spill] sm:$0xff] %v7269_v57  ;;  %1738 = vperm.xlu0 %5714, %v1094_v52   ;;  %2698 = vmatprep.mubr.f32.mxu1 %v927_v5  ;;  %v5716_v52 = vld [vmem:[%s8625_s5] sm:$0xff]  }
 0x145   : > { %v7277_v21 = vpop.permute.xlu1 %1633  ;;  %v928_v5 = vld [vmem:[#allocation3 + $0x6a0] sm:$0xff]  ;;  %v867_v57 = vld [vmem:[#allocation3 + $0x4b8] sm:$0xff]  ;;  %5331 = vmatprep.subr.bf16.mxu0 %v5716_v52 }
 0x146   : > { %2474 = vmatmul.mubr.f32.gmra.mrb[82].mxu0 %v862_v59  ;;  %8693 = vst [vmem:[#allocation40_spill] sm:$0xff] %v7277_v21  ;;  %1433 = vperm.xlu1 %5715, %v1033_v25   ;;  %v1035_v59 = vld [vmem:[%s8624_s4 + $0x1f8] sm:$0xff] }
 0x147   : > { %2699 = vmatmul.mubr.f32.gmra.mrb[82].mxu1 %v926_v34  ;;  %v7279_v16 = vpop.permute.xlu0 %1628  ;;  %2478 = vmatprep.mubr.f32.mxu0 %v865_v0  ;;  %v1034_v34 = vld [vmem:[%s8624_s4 + $0x1f0] sm:$0xff]  ;;  %v931_v0 = vld [vmem:[#allocation3 + $0x6b8] sm:$0xff] }
 0x148   : > { %8694 = vst [vmem:[#allocation41_spill] sm:$0xff] %v7279_v16  ;;  %1428 = vperm.xlu0 %5714, %v1032_v26   ;;  %2703 = vmatprep.mubr.f32.mxu1 %v929_v6  ;;  %v866_v25 = vld [vmem:[#allocation3 + $0x4b0] sm:$0xff]  ;;  %v5717_v26 = vld [vmem:[%s8629_s9] sm:$0xff]  }
 0x149   : > { %v7290_v21 = vpop.permute.xlu1 %1643  ;;  %v930_v6 = vld [vmem:[#allocation3 + $0x6b0] sm:$0xff]  ;;  %5332 = vmatpush3.bf16.msra.mxu0 %v5716_v52  ;;  %5379 = vmatprep.subr.bf16.mxu1 %v5717_v26 }
 0x14a   : > { %2479 = vmatmul.mubr.f32.gmra.mrb[84].mxu0 %v864_v45  ;;  %8695 = vst [vmem:[#allocation42_spill] sm:$0xff] %v7290_v21  ;;  %1443 = vperm.xlu1 %5715, %v1035_v59   ;;  %v1065_v45 = vld [vmem:[%s8624_s4 + $0x2e8] sm:$0xff]  ;;  %v1066_v52 = vld [vmem:[%s8624_s4 + $0x2f0] sm:$0xff] }
 0x14b   : > { %2704 = vmatmul.mubr.f32.gmra.mrb[84].mxu1 %v928_v5  ;;  %v7292_v16 = vpop.permute.xlu0 %1638  ;;  %2483 = vmatprep.mubr.f32.mxu0 %v867_v57  ;;  %v1064_v5 = vld [vmem:[%s8624_s4 + $0x2e0] sm:$0xff]  ;;  %v933_v57 = vld [vmem:[#allocation3 + $0x6c8] sm:$0xff] }
 0x14c   : > { %8696 = vst [vmem:[#allocation43_spill] sm:$0xff] %v7292_v16  ;;  %1438 = vperm.xlu0 %5714, %v1034_v34   ;;  %2708 = vmatprep.mubr.f32.mxu1 %v931_v0  ;;  %v868_v34 = vld [vmem:[#allocation3 + $0x4c0] sm:$0xff]  ;;  %v871_v16 = vld [vmem:[#allocation3 + $0x4d8] sm:$0xff] }
 0x14d   : > { %v7303_v21 = vpop.permute.xlu1 %1333  ;;  %v932_v0 = vld [vmem:[#allocation3 + $0x6c0] sm:$0xff]  ;;  %5380 = vmatpush3.bf16.msra.mxu1 %v5717_v26 }
 0x14e   : > { %2484 = vmatmul.mubr.f32.gmra.mrb[86].mxu0 %v866_v25  ;;  %1593 = vperm.xlu1 %5715, %v1065_v45   ;;  %v935_v25 = vld [vmem:[#allocation3 + $0x6d8] sm:$0xff]  ;;  %v870_v45 = vld [vmem:[#allocation3 + $0x4d0] sm:$0xff] }
 0x14f   : > { %2709 = vmatmul.mubr.f32.gmra.mrb[86].mxu1 %v930_v6  ;;  %v7305_v59 = vpop.permute.xlu0 %1328  ;;  %2488 = vmatprep.mubr.f32.mxu0 %v869_v12  ;;  %v1096_v26 = vld [vmem:[%s8624_s4 + $0x3e0] sm:$0xff] }
 0x150   : > { %1588 = vperm.xlu0 %5714, %v1064_v5   ;;  %2713 = vmatprep.mubr.f32.mxu1 %v933_v57  ;;  %v934_v5 = vld [vmem:[#allocation3 + $0x6d0] sm:$0xff]  ;;  %v873_v57 = vld [vmem:[#allocation3 + $0x4e8] sm:$0xff] }
 0x151   : > { %v7313_v6 = vpop.permute.xlu1 %1343 }
 0x152   : > { %2489 = vmatmul.mubr.f32.gmra.mrb[88].mxu0 %v868_v34  ;;  %1603 = vperm.xlu1 %5715, %v1067_v46   ;;  %v937_v34 = vld [vmem:[#allocation3 + $0x6e8] sm:$0xff]  ;;  %v872_v46 = vld [vmem:[#allocation3 + $0x4e0] sm:$0xff] }
 0x153   : > { %2714 = vmatmul.mubr.f32.gmra.mrb[88].mxu1 %v932_v0  ;;  %v7315_v12 = vpop.permute.xlu0 %1338  ;;  %2493 = vmatprep.mubr.f32.mxu0 %v871_v16 }
 0x154   : > { %1598 = vperm.xlu0 %5714, %v1066_v52   ;;  %2718 = vmatprep.mubr.f32.mxu1 %v935_v25  ;;  %v5718_v52 = vld [vmem:[%s8625_s5 + $0x8] sm:$0xff]  }
 0x155   : > { %v7323_v0 = vpop.permute.xlu1 %1493  ;;  %v936_v25 = vld [vmem:[#allocation3 + $0x6e0] sm:$0xff]  ;;  %5333 = vmatprep.subr.bf16.mxu0 %v5718_v52 }
 0x156   : > { %2494 = vmatmul.mubr.f32.gmra.mrb[90].mxu0 %v870_v45  ;;  %8697 = vst [vmem:[#allocation44_spill] sm:$0xff] %v7323_v0  ;;  %1753 = vperm.xlu1 %5715, %v1097_v27   ;;  %v1099_v45 = vld [vmem:[%s8624_s4 + $0x3f8] sm:$0xff] }
 0x157   : > { %2719 = vmatmul.mubr.f32.gmra.mrb[90].mxu1 %v934_v5  ;;  %v7325_v16 = vpop.permute.xlu0 %1488  ;;  %2498 = vmatprep.mubr.f32.mxu0 %v873_v57  ;;  %v1098_v5 = vld [vmem:[%s8624_s4 + $0x3f0] sm:$0xff]  ;;  %v939_v57 = vld [vmem:[#allocation3 + $0x6f8] sm:$0xff] }
 0x158   : > { %8698 = vst [vmem:[#allocation45_spill] sm:$0xff] %v7325_v16  ;;  %1748 = vperm.xlu0 %5714, %v1096_v26   ;;  %2723 = vmatprep.mubr.f32.mxu1 %v937_v34  ;;  %v874_v27 = vld [vmem:[#allocation3 + $0x4f0] sm:$0xff]  ;;  %v5719_v26 = vld [vmem:[%s8629_s9 + $0x8] sm:$0xff]  }
 0x159   : > { %v7336_v0 = vpop.permute.xlu1 %1503  ;;  %v938_v34 = vld [vmem:[#allocation3 + $0x6f0] sm:$0xff]  ;;  %5334 = vmatpush3.bf16.msra.mxu0 %v5718_v52  ;;  %5381 = vmatprep.subr.bf16.mxu1 %v5719_v26 }
 0x15a   : > { %2499 = vmatmul.mubr.f32.gmra.mrb[92].mxu0 %v872_v46  ;;  %8699 = vst [vmem:[#allocation46_spill] sm:$0xff] %v7336_v0  ;;  %1763 = vperm.xlu1 %5715, %v1099_v45   ;;  %v940_v0 = vld [vmem:[#allocation3 + $0x700] sm:$0xff]  ;;  %v943_v45 = vld [vmem:[#allocation3 + $0x718] sm:$0xff]  ;;  %v878_v52 = vld [vmem:[#allocation3 + $0x510] sm:$0xff] }
 0x15b   : > { %2724 = vmatmul.mubr.f32.gmra.mrb[92].mxu1 %v936_v25  ;;  %v7338_v16 = vpop.permute.xlu0 %1498  ;;  %2503 = vmatprep.mubr.f32.mxu0 %v875_v63  ;;  %v876_v63 = vld [vmem:[#allocation3 + $0x500] sm:$0xff] }
 0x15c   : > { %8700 = vst [vmem:[#allocation47_spill] sm:$0xff] %v7338_v16  ;;  %1758 = vperm.xlu0 %5714, %v1098_v5   ;;  %2728 = vmatprep.mubr.f32.mxu1 %v939_v57  ;;  %v879_v16 = vld [vmem:[#allocation3 + $0x518] sm:$0xff] }
 0x15d   : > { %v7343_v46 = vpop.permute.xlu1 %1653  ;;  %5382 = vmatpush3.bf16.msra.mxu1 %v5719_v26 }
 0x15e   : > { %2504 = vmatmul.mubr.f32.gmra.mrb[94].mxu0 %v874_v27  ;;  %8701 = vst [vmem:[#allocation48_spill] sm:$0xff] %v7343_v46  ;;  %v942_v27 = vld [vmem:[#allocation3 + $0x710] sm:$0xff]  ;;  %v945_v46 = vld [vmem:[#allocation3 + $0x728] sm:$0xff] }
 0x15f   : > { %2729 = vmatmul.mubr.f32.gmra.mrb[94].mxu1 %v938_v34  ;;  %v7345_v25 = vpop.permute.xlu0 %1648  ;;  %2508 = vmatprep.mubr.f32.mxu0 %v877_v17  ;;  %v881_v34 = vld [vmem:[#allocation3 + $0x528] sm:$0xff]  ;;  %v1109_v17 = vcombine.high %v7136_v9, %v7136_v9 }
 0x160   : > { %8702 = vst [vmem:[#allocation49_spill] sm:$0xff] %v7345_v25  ;;  %2733 = vmatprep.mubr.f32.mxu1 %v941_v19  ;;  %v885_v25 = vld [vmem:[#allocation3 + $0x548] sm:$0xff] }
 0x161   : > { %v7347_v5 = vpop.permute.xlu1 %1663 }
 0x162   : > { %2509 = vmatmul.mubr.f32.gmra.mrb[96].mxu0 %v876_v63  ;;  %8703 = vst [vmem:[#allocation50_spill] sm:$0xff] %v7347_v5  ;;  %v944_v63 = vld [vmem:[#allocation3 + $0x720] sm:$0xff]  ;;  %v947_v5 = vld [vmem:[#allocation3 + $0x738] sm:$0xff] }
 0x163   : > { %2734 = vmatmul.mubr.f32.gmra.mrb[96].mxu1 %v940_v0  ;;  %v7349_v57 = vpop.permute.xlu0 %1658  ;;  %2513 = vmatprep.mubr.f32.mxu0 %v879_v16  ;;  %v880_v0 = vld [vmem:[#allocation3 + $0x520] sm:$0xff]  ;;  %v5720_v16 = vld [vmem:[%s8625_s5 + $0x10] sm:$0xff]  }
 0x164   : > { %8704 = vst [vmem:[#allocation51_spill] sm:$0xff] %v7349_v57  ;;  %2738 = vmatprep.mubr.f32.mxu1 %v943_v45  ;;  %v883_v45 = vld [vmem:[#allocation3 + $0x538] sm:$0xff]  ;;  %5335 = vmatprep.subr.bf16.mxu0 %v5720_v16  ;;  %v5721_v57 = vld [vmem:[%s8629_s9 + $0x10] sm:$0xff]  }
 0x165   : > { %v7353_v19 = vpop.permute.xlu1 %1353  ;;  %5336 = vmatpush3.bf16.msra.mxu0 %v5720_v16  ;;  %5383 = vmatprep.subr.bf16.mxu1 %v5721_v57  ;;  %v1786_v16 = vmul.f32 %v7163_v35, %v6938_v39  ;;  %v953_v39 = vld [vmem:[#allocation3 + $0x768] sm:$0xff] }
 0x166   : > { %2514 = vmatmul.mubr.f32.gmra.mrb[98].mxu0 %v878_v52  ;;  %v7361_v52 = vrot.slane %v1109_v17, %v7127_v53  ;;  %5384 = vmatpush3.bf16.msra.mxu1 %v5721_v57 }
 0x167   : > { %2739 = vmatmul.mubr.f32.gmra.mrb[98].mxu1 %v942_v27  ;;  %v7355_v26 = vpop.permute.xlu0 %1348  ;;  %2518 = vmatprep.mubr.f32.mxu0 %v881_v34  ;;  %v882_v34 = vld [vmem:[#allocation3 + $0x530] sm:$0xff] }
 0x168   : > { %2743 = vmatprep.mubr.f32.mxu1 %v945_v46  ;;  %8705 = vst [vmem:[#allocation52_spill] sm:$0xff] %v7361_v52  ;;  %v946_v46 = vld [vmem:[#allocation3 + $0x730] sm:$0xff]  ;;  %v7372_v53 = vrot.slane %v7361_v52, %v7148_v11  ;;  %v7389_v11 = vld [vmem:[%s8622_s2] ss:$0 sm:$0xff] }
 0x169   : > { %v7363_v9 = vpop.permute.xlu1 %1363 }
 0x16a   : > { %2519 = vmatmul.mubr.f32.gmra.mrb[100].mxu0 %v880_v0  ;;  %v1818_v57 = vmul.f32 %v7372_v53, %v7179_v58 }
 0x16b   : > { %2744 = vmatmul.mubr.f32.gmra.mrb[100].mxu1 %v944_v63  ;;  %v7365_v27 = vpop.permute.xlu0 %1358  ;;  %2523 = vmatprep.mubr.f32.mxu0 %v883_v45  ;;  %v884_v63 = vld [vmem:[#allocation3 + $0x540] sm:$0xff]  ;;  %v887_v45 = vld [vmem:[#allocation3 + $0x558] sm:$0xff] }
 0x16c   : > { %2748 = vmatprep.mubr.f32.mxu1 %v947_v5  ;;  %v948_v5 = vld [vmem:[#allocation3 + $0x740] sm:$0xff] }
 0x16d   : > { %v7374_v17 = vpop.permute.xlu1 %1513 }
 0x16e   : > { %2524 = vmatmul.mubr.f32.gmra.mrb[102].mxu0 %v882_v34  ;;  %8706 = vst [vmem:[#allocation53_spill] sm:$0xff] %v7374_v17  ;;  %v886_v17 = vld [vmem:[#allocation3 + $0x550] sm:$0xff] }
 0x16f   : > { %2749 = vmatmul.mubr.f32.gmra.mrb[102].mxu1 %v946_v46  ;;  %v7376_v0 = vpop.permute.xlu0 %1508  ;;  %2528 = vmatprep.mubr.f32.mxu0 %v885_v25  ;;  %v950_v25 = vld [vmem:[#allocation3 + $0x750] sm:$0xff] }
 0x170   : > { %8707 = vst [vmem:[#allocation54_spill] sm:$0xff] %v7376_v0  ;;  %2753 = vmatprep.mubr.f32.mxu1 %v949_v36  ;;  %v889_v36 = vld [vmem:[#allocation3 + $0x568] sm:$0xff] }
 0x171   : > { %v7382_v34 = vpop.permute.xlu1 %1523 }
 0x172   : > { %2529 = vmatmul.mubr.f32.gmra.mrb[104].mxu0 %v884_v63  ;;  %8708 = vst [vmem:[#allocation55_spill] sm:$0xff] %v7382_v34 }
 0x173   : > { %2754 = vmatmul.mubr.f32.gmra.mrb[104].mxu1 %v948_v5  ;;  %v7384_v46 = vpop.permute.xlu0 %1518  ;;  %2533 = vmatprep.mubr.f32.mxu0 %v887_v45  ;;  %v7394_v5 = vld [vmem:[%s8622_s2 + $0x1] ss:$0 sm:$0xff] }
 0x174   : > { %8709 = vst [vmem:[#allocation56_spill] sm:$0xff] %v7384_v46  ;;  %2758 = vmatprep.mubr.f32.mxu1 %v951_v55  ;;  %v888_v46 = vld [vmem:[#allocation3 + $0x560] sm:$0xff] }
 0x175   : > { %v1980_v0 = vpop.f32.mrb[0].mxu0  ;;  %v7396_v55 = vpop.permute.xlu1 %1673 }
 0x176   : > { %v1981_v63 = vadd.f32 %v1980_v0, %v1786_v16  ;;  %v1982_v3 = vpop.f32.mrb[1].mxu0  ;;  %v2205_v58 = vpop.f32.mrb[0].mxu1  ;;  %2534 = vmatmul.mubr.f32.gmra.mrb[106].mxu0 %v886_v17  ;;  %8710 = vst [vmem:[#allocation57_spill] sm:$0xff] %v7396_v55  ;;  %v5722_v0 = vld [vmem:[%s8625_s5 + $0x18] sm:$0xff]   ;;  %v952_v17 = vld [vmem:[#allocation3 + $0x760] sm:$0xff] }
 0x177   : > { %v2206_v45 = vadd.f32 %v2205_v58, %v1818_v57  ;;  %2759 = vmatmul.mubr.f32.gmra.mrb[106].mxu1 %v950_v25  ;;  %v7398_v34 = vpop.permute.xlu0 %1668  ;;  %2538 = vmatprep.mubr.f32.mxu0 %v889_v36  ;;  %v1787_v3 = vmul.f32 %v7163_v35, %v6954_v50  ;;  %v2207_v52 = vpop.f32.mrb[1].mxu1  ;;  %v891_v57 = vld [vmem:[#allocation3 + $0x578] sm:$0xff]  ;;  %v1819_v25 = vmul.f32 %v7372_v53, %v7177_v48 }
 0x178   : > { %8711 = vst [vmem:[#allocation58_spill] sm:$0xff] %v7398_v34  ;;  %v2857_v16 = vmul.f32 %v7389_v11, %v1981_v63  ;;  %2763 = vmatprep.mubr.f32.mxu1 %v953_v39  ;;  %v955_v55 = vld [vmem:[#allocation3 + $0x778] sm:$0xff]  ;;  %5337 = vmatprep.subr.bf16.mxu0 %v5722_v0  ;;  %v890_v63 = vld [vmem:[#allocation3 + $0x570] sm:$0xff] }
 0x179   : > { %v2889_v58 = vmul.f32 %v7394_v5, %v2206_v45  ;;  %v1985_v36 = vpop.f32.mrb[2].mxu0  ;;  %v7411_v52 = vpop.permute.xlu1 %1683  ;;  %v5724_v48 = vld [vmem:[%s8625_s5 + $0x20] sm:$0xff]   ;;  %v1788_v45 = vmul.f32 %v7163_v35, %v6936_v23  ;;  %5338 = vmatpush3.bf16.msra.mxu0 %v5722_v0 }
 0x17a   : > { %v1986_v34 = vadd.f32 %v1985_v36, %v1787_v3  ;;  %v2210_v13 = vpop.f32.mrb[2].mxu1  ;;  %v1987_v15 = vpop.f32.mrb[3].mxu0  ;;  %2539 = vmatmul.mubr.f32.gmra.mrb[108].mxu0 %v888_v46  ;;  %8712 = vst [vmem:[#allocation59_spill] sm:$0xff] %v7411_v52  ;;  %v954_v3 = vld [vmem:[#allocation3 + $0x770] sm:$0xff]  ;;  %5339 = vmatprep.subr.bf16.mxu0 %v5724_v48 }
 0x17b   : > { %v7409_v24 = vadd.f32 %v2889_v58, %v2857_v16  ;;  %v2211_v50 = vadd.f32 %v2210_v13, %v1819_v25  ;;  %2764 = vmatmul.mubr.f32.gmra.mrb[108].mxu1 %v952_v17  ;;  %v7413_v39 = vpop.permute.xlu0 %1678  ;;  %2543 = vmatprep.mubr.f32.mxu0 %v891_v57  ;;  %v2212_v46 = vpop.f32.mrb[3].mxu1  ;;  %v893_v13 = vld [vmem:[#allocation3 + $0x588] sm:$0xff]  ;;  %v5723_v16 = vld [vmem:[%s8629_s9 + $0x18] sm:$0xff]   ;;  %v1820_v17 = vmul.f32 %v7372_v53, %v7189_v18  ;;  %v892_v18 = vld [vmem:[#allocation3 + $0x580] sm:$0xff] }
 0x17c   : > { %8713 = vst [vmem:[#allocation60_spill] sm:$0xff] %v7413_v39  ;;  %v2858_v15 = vmul.f32 %v7389_v11, %v1986_v34  ;;  %2768 = vmatprep.mubr.f32.mxu1 %v955_v55  ;;  %v957_v58 = vld [vmem:[#allocation3 + $0x788] sm:$0xff]  ;;  %5385 = vmatprep.subr.bf16.mxu1 %v5723_v16 }
 0x17d   : > { %v2890_v57 = vmul.f32 %v7394_v5, %v2211_v50  ;;  %v1990_v25 = vpop.f32.mrb[4].mxu0  ;;  %v7429_v46 = vpop.permute.xlu1 %1373  ;;  %v5725_v50 = vld [vmem:[%s8625_s5 + $0x28] sm:$0xff]   ;;  %5386 = vmatpush3.bf16.msra.mxu1 %v5723_v16  ;;  %5340 = vmatpush3.bf16.msra.mxu0 %v5724_v48  ;;  %v1790_v48 = vmul.f32 %v7163_v35, %v6972_v2 }
 0x17e   : > { %v1991_v23 = vadd.f32 %v1990_v25, %v1788_v45  ;;  %v2215_v36 = vpop.f32.mrb[4].mxu1  ;;  %v1992_v34 = vpop.f32.mrb[5].mxu0  ;;  %2544 = vmatmul.mubr.f32.gmra.mrb[110].mxu0 %v890_v63  ;;  %v1789_v45 = vmul.f32 %v7163_v35, %v6951_v30  ;;  %5341 = vmatprep.subr.bf16.mxu0 %v5725_v50 }
 0x17f   : > { %v7427_v55 = vadd.f32 %v2890_v57, %v2858_v15  ;;  %v2216_v0 = vadd.f32 %v2215_v36, %v1820_v17  ;;  %2769 = vmatmul.mubr.f32.gmra.mrb[110].mxu1 %v954_v3  ;;  %v7431_v52 = vpop.permute.xlu0 %1368  ;;  %2548 = vmatprep.mubr.f32.mxu0 %v893_v13  ;;  %v2217_v25 = vpop.f32.mrb[5].mxu1  ;;  %v956_v15 = vld [vmem:[#allocation3 + $0x780] sm:$0xff]  ;;  %v895_v17 = vld [vmem:[#allocation3 + $0x598] sm:$0xff]  ;;  %v1821_v3 = vmul.f32 %v7372_v53, %v7187_v10  ;;  %v894_v10 = vld [vmem:[#allocation3 + $0x590] sm:$0xff] }
 0x180   : > { %v2859_v63 = vmul.f32 %v7389_v11, %v1991_v23  ;;  %2773 = vmatprep.mubr.f32.mxu1 %v957_v58  ;;  %v959_v36 = vld [vmem:[#allocation3 + $0x798] sm:$0xff] }
 0x181   : > { %8714 = vst [vmem:[#allocation61_spill] sm:$0xff] %v7427_v55  ;;  %v2891_v13 = vmul.f32 %v7394_v5, %v2216_v0  ;;  %v1995_v57 = vpop.f32.mrb[6].mxu0  ;;  %v7444_v58 = vpop.permute.xlu1 %1383  ;;  %v5726_v0 = vld [vmem:[%s8625_s5 + $0x30] sm:$0xff]   ;;  %5342 = vmatpush3.bf16.msra.mxu0 %v5725_v50  ;;  %v1791_v50 = vmul.f32 %v7163_v35, %v6966_v33 }
 0x182   : > { %v1996_v34 = vadd.f32 %v1995_v57, %v1789_v45  ;;  %v2220_v39 = vpop.f32.mrb[6].mxu1  ;;  %v1997_v55 = vpop.f32.mrb[7].mxu0  ;;  %2549 = vmatmul.mubr.f32.gmra.mrb[112].mxu0 %v892_v18  ;;  %v958_v45 = vld [vmem:[#allocation3 + $0x790] sm:$0xff]  ;;  %5343 = vmatprep.subr.bf16.mxu0 %v5726_v0 }
 0x183   : > { %v7442_v30 = vadd.f32 %v2891_v13, %v2859_v63  ;;  %v2221_v23 = vadd.f32 %v2220_v39, %v1821_v3  ;;  %2774 = vmatmul.mubr.f32.gmra.mrb[112].mxu1 %v956_v15  ;;  %v7446_v16 = vpop.permute.xlu0 %1378  ;;  %2553 = vmatprep.mubr.f32.mxu0 %v895_v17  ;;  %v2222_v18 = vpop.f32.mrb[7].mxu1  ;;  %v897_v39 = vld [vmem:[#allocation3 + $0x5a8] sm:$0xff]  ;;  %v1822_v63 = vmul.f32 %v7372_v53, %v7239_v61  ;;  %v896_v61 = vld [vmem:[#allocation3 + $0x5a0] sm:$0xff] }
 0x184   : > { %v2860_v55 = vmul.f32 %v7389_v11, %v1996_v34  ;;  %2778 = vmatprep.mubr.f32.mxu1 %v959_v36  ;;  %v961_v17 = vld [vmem:[#allocation3 + $0x7a8] sm:$0xff] }
 0x185   : > { %v2892_v25 = vmul.f32 %v7394_v5, %v2221_v23  ;;  %v2000_v15 = vpop.f32.mrb[8].mxu0  ;;  %v7459_v36 = vpop.permute.xlu1 %1533  ;;  %v5728_v23 = vld [vmem:[%s8625_s5 + $0x38] sm:$0xff]   ;;  %5344 = vmatpush3.bf16.msra.mxu0 %v5726_v0 }
 0x186   : > { %v2001_v3 = vadd.f32 %v2000_v15, %v1790_v48  ;;  %v2225_v13 = vpop.f32.mrb[8].mxu1  ;;  %v2002_v57 = vpop.f32.mrb[9].mxu0  ;;  %2554 = vmatmul.mubr.f32.gmra.mrb[114].mxu0 %v894_v10  ;;  %8715 = vst [vmem:[#allocation62_spill] sm:$0xff] %v7459_v36  ;;  %v963_v15 = vld [vmem:[#allocation3 + $0x7b8] sm:$0xff]  ;;  %5345 = vmatprep.subr.bf16.mxu0 %v5728_v23 }
 0x187   : > { %v7457_v2 = vadd.f32 %v2892_v25, %v2860_v55  ;;  %v2226_v34 = vadd.f32 %v2225_v13, %v1822_v63  ;;  %2779 = vmatmul.mubr.f32.gmra.mrb[114].mxu1 %v958_v45  ;;  %v7461_v18 = vpop.permute.xlu0 %1528  ;;  %2558 = vmatprep.mubr.f32.mxu0 %v897_v39  ;;  %v2227_v48 = vpop.f32.mrb[9].mxu1  ;;  %v960_v55 = vld [vmem:[#allocation3 + $0x7a0] sm:$0xff]  ;;  %v899_v63 = vld [vmem:[#allocation3 + $0x5b8] sm:$0xff]  ;;  %v1823_v45 = vmul.f32 %v7372_v53, %v7237_v60  ;;  %v898_v60 = vld [vmem:[#allocation3 + $0x5b0] sm:$0xff] }
 0x188   : > { %v2861_v10 = vmul.f32 %v7389_v11, %v2001_v3  ;;  %2783 = vmatprep.mubr.f32.mxu1 %v961_v17 }
 0x189   : > { %v2893_v25 = vmul.f32 %v7394_v5, %v2226_v34  ;;  %v2005_v39 = vpop.f32.mrb[10].mxu0  ;;  %v7474_v17 = vpop.permute.xlu1 %1543  ;;  %v1792_v34 = vmul.f32 %v7163_v35, %v6984_v14  ;;  %5346 = vmatpush3.bf16.msra.mxu0 %v5728_v23  ;;  %v964_v23 = vld [vmem:[#allocation3 + $0x7c0] sm:$0xff] }
 0x18a   : > { %v2006_v13 = vadd.f32 %v2005_v39, %v1791_v50  ;;  %v2230_v57 = vpop.f32.mrb[10].mxu1  ;;  %v2007_v36 = vpop.f32.mrb[11].mxu0  ;;  %2559 = vmatmul.mubr.f32.gmra.mrb[116].mxu0 %v896_v61  ;;  %8716 = vst [vmem:[#allocation63_spill] sm:$0xff] %v7474_v17  ;;  %v901_v61 = vld [vmem:[#allocation3 + $0x5c8] sm:$0xff]  ;;  %v900_v17 = vld [vmem:[#allocation3 + $0x5c0] sm:$0xff] }
 0x18b   : > { %v7472_v33 = vadd.f32 %v2893_v25, %v2861_v10  ;;  %v2231_v3 = vadd.f32 %v2230_v57, %v1823_v45  ;;  %2784 = vmatmul.mubr.f32.gmra.mrb[116].mxu1 %v960_v55  ;;  %v7476_v48 = vpop.permute.xlu0 %1538  ;;  %2563 = vmatprep.mubr.f32.mxu0 %v899_v63  ;;  %v2232_v50 = vpop.f32.mrb[11].mxu1  ;;  %v962_v36 = vld [vmem:[#allocation3 + $0x7b0] sm:$0xff]  ;;  %v5727_v10 = vld [vmem:[%s8629_s9 + $0x20] sm:$0xff]   ;;  %v1824_v55 = vmul.f32 %v7372_v53, %v7249_v47  ;;  %v965_v25 = vld [vmem:[#allocation3 + $0x7c8] sm:$0xff] }
 0x18c   : > { %8717 = vst [vmem:[#allocation64_spill] sm:$0xff] %v7476_v48  ;;  %v2862_v0 = vmul.f32 %v7389_v11, %v2006_v13  ;;  %2788 = vmatprep.mubr.f32.mxu1 %v963_v15  ;;  %5387 = vmatprep.subr.bf16.mxu1 %v5727_v10  ;;  %v1793_v47 = vmul.f32 %v7163_v35, %v6981_v44 }
 0x18d   : > { %v2894_v45 = vmul.f32 %v7394_v5, %v2231_v3  ;;  %v2010_v63 = vpop.f32.mrb[12].mxu0  ;;  %5388 = vmatpush3.bf16.msra.mxu1 %v5727_v10  ;;  %v902_v10 = vld [vmem:[#allocation3 + $0x5d0] sm:$0xff] }
 0x18e   : > { %v2011_v39 = vadd.f32 %v2010_v63, %v1792_v34  ;;  %v2235_v14 = vpop.f32.mrb[12].mxu1  ;;  %v2012_v57 = vpop.f32.mrb[13].mxu0  ;;  %2564 = vmatmul.mubr.f32.gmra.mrb[118].mxu0 %v898_v60  ;;  %v903_v34 = vld [vmem:[#allocation3 + $0x5d8] sm:$0xff]  ;;  %v1825_v60 = vmul.f32 %v7372_v53, %v7247_v38  ;;  %v1794_v38 = vmul.f32 %v7163_v35, %v7002_v28 }
 0x18f   : > { %v7487_v15 = vadd.f32 %v2894_v45, %v2862_v0  ;;  %v2236_v13 = vadd.f32 %v2235_v14, %v1824_v55  ;;  %2789 = vmatmul.mubr.f32.gmra.mrb[118].mxu1 %v962_v36  ;;  %v7489_v50 = vpop.permute.xlu0 %1688  ;;  %2568 = vmatprep.mubr.f32.mxu0 %v901_v61  ;;  %v2237_v48 = vpop.f32.mrb[13].mxu1  ;;  %v967_v61 = vld [vmem:[#allocation3 + $0x7d8] sm:$0xff] }
 0x190   : > { %v2863_v3 = vmul.f32 %v7389_v11, %v2011_v39  ;;  %2793 = vmatprep.mubr.f32.mxu1 %v965_v25  ;;  %v7497_v36 = vpop.permute.xlu1 %1693 }
 0x191   : > { %v2895_v0 = vmul.f32 %v7394_v5, %v2236_v13  ;;  %v2015_v55 = vpop.f32.mrb[14].mxu0  ;;  %v966_v13 = vld [vmem:[#allocation3 + $0x7d0] sm:$0xff] }
 0x192   : > { %v2016_v45 = vadd.f32 %v2015_v55, %v1793_v47  ;;  %v2240_v63 = vpop.f32.mrb[14].mxu1  ;;  %v2017_v14 = vpop.f32.mrb[15].mxu0  ;;  %2569 = vmatmul.mubr.f32.gmra.mrb[120].mxu0 %v900_v17  ;;  %v905_v47 = vld [vmem:[#allocation3 + $0x5e8] sm:$0xff]  ;;  %v1826_v17 = vmul.f32 %v7372_v53, %v7305_v59 }
 0x193   : > { %v7499_v44 = vadd.f32 %v2895_v0, %v2863_v3  ;;  %v2241_v48 = vadd.f32 %v2240_v63, %v1825_v60  ;;  %2794 = vmatmul.mubr.f32.gmra.mrb[120].mxu1 %v964_v23  ;;  %v7501_v25 = vpop.permute.xlu0 %1698  ;;  %2573 = vmatprep.mubr.f32.mxu0 %v903_v34  ;;  %v2242_v57 = vpop.f32.mrb[15].mxu1  ;;  %v969_v23 = vld [vmem:[#allocation3 + $0x7e8] sm:$0xff]  ;;  %v1795_v14 = vmul.f32 %v7163_v35, %v6996_v43 }
 0x194   : > { %v2864_v39 = vmul.f32 %v7389_v11, %v2016_v45  ;;  %2798 = vmatprep.mubr.f32.mxu1 %v967_v61  ;;  %v7511_v28 = vpop.permute.xlu1 %1703  ;;  %v904_v61 = vld [vmem:[#allocation3 + $0x5e0] sm:$0xff] }
 0x195   : > { %v2896_v3 = vmul.f32 %v7394_v5, %v2241_v48  ;;  %v2020_v60 = vpop.f32.mrb[16].mxu0  ;;  %v968_v57 = vld [vmem:[#allocation3 + $0x7e0] sm:$0xff] }
 0x196   : > { %v2021_v0 = vadd.f32 %v2020_v60, %v1794_v38  ;;  %v2245_v55 = vpop.f32.mrb[16].mxu1  ;;  %v2022_v34 = vpop.f32.mrb[17].mxu0  ;;  %2574 = vmatmul.mubr.f32.gmra.mrb[122].mxu0 %v902_v10  ;;  %v907_v38 = vld [vmem:[#allocation3 + $0x5f8] sm:$0xff]  ;;  %v1827_v10 = vmul.f32 %v7372_v53, %v7303_v21 }
 0x197   : > { %v7509_v63 = vadd.f32 %v2896_v3, %v2864_v39  ;;  %v2246_v45 = vadd.f32 %v2245_v55, %v1826_v17  ;;  %2799 = vmatmul.mubr.f32.gmra.mrb[122].mxu1 %v966_v13  ;;  %2578 = vmatprep.mubr.f32.mxu0 %v905_v47  ;;  %v2247_v48 = vpop.f32.mrb[17].mxu1  ;;  %v7519_v3 = vpop.permute.xlu0 %1388  ;;  %v971_v13 = vld [vmem:[#allocation3 + $0x7f8] sm:$0xff]  ;;  %v1796_v34 = vmul.f32 %v7163_v35, %v7014_v22 }
 0x198   : > { %v2865_v59 = vmul.f32 %v7389_v11, %v2021_v0  ;;  %2803 = vmatprep.mubr.f32.mxu1 %v969_v23  ;;  %v906_v23 = vld [vmem:[#allocation3 + $0x5f0] sm:$0xff] }
 0x199   : > { %v2897_v39 = vmul.f32 %v7394_v5, %v2246_v45  ;;  %v2025_v17 = vpop.f32.mrb[18].mxu0  ;;  %v970_v48 = vld [vmem:[#allocation3 + $0x7f0] sm:$0xff] }
 0x19a   : > { %v2026_v47 = vadd.f32 %v2025_v17, %v1795_v14  ;;  %v2250_v60 = vpop.f32.mrb[18].mxu1  ;;  %v2027_v55 = vpop.f32.mrb[19].mxu0  ;;  %2579 = vmatmul.mubr.f32.gmra.mrb[124].mxu0 %v904_v61  ;;  %v5729_v14 = vld [vmem:[%s8629_s9 + $0x28] sm:$0xff]   ;;  %v1828_v61 = vmul.f32 %v7372_v53, %v7315_v12 }
 0x19b   : > { %v7521_v43 = vadd.f32 %v2897_v39, %v2865_v59  ;;  %v2251_v0 = vadd.f32 %v2250_v60, %v1827_v10  ;;  %2804 = vmatmul.mubr.f32.gmra.mrb[124].mxu1 %v968_v57  ;;  %2583 = vmatprep.mubr.f32.mxu0 %v907_v38  ;;  %v2252_v45 = vpop.f32.mrb[19].mxu1  ;;  %v7531_v59 = vpop.permute.xlu1 %1393  ;;  %v1797_v60 = vmul.f32 %v7163_v35, %v7011_v56 }
 0x19c   : > { %v2866_v21 = vmul.f32 %v7389_v11, %v2026_v47  ;;  %2808 = vmatprep.mubr.f32.mxu1 %v971_v13  ;;  %5389 = vmatprep.subr.bf16.mxu1 %v5729_v14  ;;  %v7536_v13 = vpop.permute.xlu0 %1398 }
 0x19d   : > { %v2898_v57 = vmul.f32 %v7394_v5, %v2251_v0  ;;  %v2030_v38 = vpop.f32.mrb[20].mxu0  ;;  %5390 = vmatpush3.bf16.msra.mxu1 %v5729_v14  ;;  %v1829_v0 = vmul.f32 %v7372_v53, %v7313_v6  ;;  %v1798_v14 = vmul.f32 %v7163_v35, %v7032_v51 }
 0x19e   : > { %v2031_v10 = vadd.f32 %v2030_v38, %v1796_v34  ;;  %v2255_v39 = vpop.f32.mrb[20].mxu1  ;;  %v2032_v22 = vpop.f32.mrb[21].mxu0  ;;  %2584 = vmatmul.mubr.f32.gmra.mrb[126].mxu0 %v906_v23 }
 0x19f   : > { %v7534_v17 = vadd.f32 %v2898_v57, %v2866_v21  ;;  %v2256_v47 = vadd.f32 %v2255_v39, %v1828_v61  ;;  %2809 = vmatmul.mubr.f32.gmra.mrb[126].mxu1 %v970_v48  ;;  %v2257_v55 = vpop.f32.mrb[21].mxu1  ;;  %v5730_v21 = vld [vmem:[%s8629_s9 + $0x30] sm:$0xff]   ;;  %v7547_v57 = vpop.permute.xlu1 %1403  ;;  %v1830_v39 = vmul.f32 %v7372_v53, %v7355_v26  ;;  %v1799_v26 = vmul.f32 %v7163_v35, %v7026_v4 }
 0x1a0   : > { %v2867_v12 = vmul.f32 %v7389_v11, %v2031_v10  ;;  %5391 = vmatprep.subr.bf16.mxu1 %v5730_v21  ;;  %v7556_v22 = vpop.permute.xlu0 %1548 }
 0x1a1   : > { %v2899_v34 = vmul.f32 %v7394_v5, %v2256_v47  ;;  %v2035_v23 = vpop.f32.mrb[22].mxu0  ;;  %5392 = vmatpush3.bf16.msra.mxu1 %v5730_v21  ;;  %8718 = vst [vmem:[#allocation65_spill] sm:$0xff] %v7556_v22 }
 0x1a2   : > { %v2036_v45 = vadd.f32 %v2035_v23, %v1797_v60  ;;  %v2260_v61 = vpop.f32.mrb[22].mxu1  ;;  %v2037_v48 = vpop.f32.mrb[23].mxu0 }
 0x1a3   : > { %v7549_v56 = vadd.f32 %v2899_v34, %v2867_v12  ;;  %v2261_v38 = vadd.f32 %v2260_v61, %v1829_v0  ;;  %v2262_v10 = vpop.f32.mrb[23].mxu1  ;;  %v5731_v12 = vld [vmem:[%s8629_s9 + $0x38] sm:$0xff]   ;;  %v6000_v61 = vld [vmem:[%s6398_s13] sm:$0xff]  ;;  %v6001_v48 = vld [vmem:[%s6398_s13 + $0x8] sm:$0xff] }
 0x1a4   : > { %v2868_v6 = vmul.f32 %v7389_v11, %v2036_v45  ;;  %5393 = vmatprep.subr.bf16.mxu1 %v5731_v12  ;;  %v7571_v10 = vpop.permute.xlu1 %1553 }
 0x1a5   : > { %v2900_v47 = vmul.f32 %v7394_v5, %v2261_v38  ;;  %v2040_v60 = vpop.f32.mrb[24].mxu0  ;;  %5394 = vmatpush3.bf16.msra.mxu1 %v5731_v12  ;;  %v3932_v38 = vpack.c.bf16 %v6001_v48, %v6000_v61 }
 0x1a6   : > { %v2041_v55 = vadd.f32 %v2040_v60, %v1798_v14  ;;  %v2265_v51 = vpop.f32.mrb[24].mxu1  ;;  %v2042_v0 = vpop.f32.mrb[25].mxu0  ;;  %v1831_v14 = vmul.f32 %v7372_v53, %v7353_v19  ;;  %v6003_v60 = vld [vmem:[%s6398_s13 + $0x18] sm:$0xff]  ;;  %v1800_v19 = vmul.f32 %v7163_v35, %v7044_v62 }
 0x1a7   : > { %v7562_v34 = vadd.f32 %v2900_v47, %v2868_v6  ;;  %v2266_v23 = vadd.f32 %v2265_v51, %v1830_v39  ;;  %v2267_v45 = vpop.f32.mrb[25].mxu1  ;;  %v6002_v39 = vld [vmem:[%s6398_s13 + $0x10] sm:$0xff]  ;;  %5395 = vmatprep.mubr.bf16.mxu1 %v3932_v38 }
 0x1a8   : > { %v2869_v21 = vmul.f32 %v7389_v11, %v2041_v55  ;;  %v3933_v51 = vpack.c.bf16 %v6003_v60, %v6002_v39  ;;  %v7576_v55 = vpop.permute.xlu0 %1558  ;;  %v1801_v39 = vmul.f32 %v7163_v35, %v7041_v32 }
 0x1a9   : > { %v2901_v6 = vmul.f32 %v7394_v5, %v2266_v23  ;;  %v2045_v47 = vpop.f32.mrb[26].mxu0 }
 0x1aa   : > { %v2046_v0 = vadd.f32 %v2045_v47, %v1799_v26  ;;  %v2270_v4 = vpop.f32.mrb[26].mxu1  ;;  %v2047_v22 = vpop.f32.mrb[27].mxu0  ;;  %5396 = vmatmul.mubr.bf16.vlgmr.msra.gmra.mrb[128].mxu1 %v3933_v51  ;;  %v1832_v26 = vmul.f32 %v7372_v53, %v7365_v27  ;;  %v6004_v27 = vld [vmem:[%s6398_s13 + $0x20] sm:$0xff] }
 0x1ab   : > { %v7578_v12 = vadd.f32 %v2901_v6, %v2869_v21  ;;  %v2271_v45 = vadd.f32 %v2270_v4, %v1831_v14  ;;  %v2272_v61 = vpop.f32.mrb[27].mxu1  ;;  %v7586_v6 = vpop.permute.xlu1 %1563 }
 0x1ac   : > { %v2870_v23 = vmul.f32 %v7389_v11, %v2046_v0  ;;  %8719 = vst [vmem:[#allocation66_spill] sm:$0xff] %v7586_v6  ;;  %v6005_v0 = vld [vmem:[%s6398_s13 + $0x28] sm:$0xff]  ;;  %v6011_v6 = vld [vmem:[%s6398_s13 + $0x58] sm:$0xff] }
 0x1ad   : > { %v2902_v22 = vmul.f32 %v7394_v5, %v2271_v45  ;;  %v2050_v48 = vpop.f32.mrb[28].mxu0  ;;  %v3934_v4 = vpack.c.bf16 %v6005_v0, %v6004_v27  ;;  %v1833_v45 = vmul.f32 %v7372_v53, %v7363_v9  ;;  %v1802_v27 = vmul.f32 %v7163_v35, %v7060_v42 }
 0x1ae   : > { %v2051_v38 = vadd.f32 %v2050_v48, %v1800_v19  ;;  %v2275_v21 = vpop.f32.mrb[28].mxu1  ;;  %v2052_v14 = vpop.f32.mrb[29].mxu0  ;;  %v1834_v0 = vmul.f32 %v7372_v53, %v7431_v52 }
 0x1af   : > { %v7588_v47 = vadd.f32 %v2902_v22, %v2870_v23  ;;  %v2276_v62 = vadd.f32 %v2275_v21, %v1832_v26  ;;  %v2277_v51 = vpop.f32.mrb[29].mxu1  ;;  %v7597_v19 = vpop.permute.xlu0 %1708  ;;  %v6006_v23 = vld [vmem:[%s6398_s13 + $0x30] sm:$0xff]  ;;  %v6007_v22 = vld [vmem:[%s6398_s13 + $0x38] sm:$0xff]  ;;  %5399 = vmatprep.mubr.bf16.mxu1 %v3934_v4 }
 0x1b0   : > { %v2871_v60 = vmul.f32 %v7389_v11, %v2051_v38  ;;  %v3935_v26 = vpack.c.bf16 %v6007_v22, %v6006_v23  ;;  %v7609_v23 = vpop.permute.xlu1 %1713 }
 0x1b1   : > { %v2903_v61 = vmul.f32 %v7394_v5, %v2276_v62  ;;  %v2055_v48 = vpop.f32.mrb[30].mxu0 }
 0x1b2   : > { %v2056_v21 = vadd.f32 %v2055_v48, %v1801_v39  ;;  %v2280_v14 = vpop.f32.mrb[30].mxu1  ;;  %v2057_v32 = vpop.f32.mrb[31].mxu0  ;;  %5400 = vmatmul.mubr.bf16.gmra.mrb[132].mxu1 %v3935_v26  ;;  %v1803_v26 = vmul.f32 %v7163_v35, %v7056_v20 }
 0x1b3   : > { %v7602_v38 = vadd.f32 %v2903_v61, %v2871_v60  ;;  %v2281_v51 = vadd.f32 %v2280_v14, %v1833_v45  ;;  %v2282_v62 = vpop.f32.mrb[31].mxu1  ;;  %v7612_v48 = vpop.permute.xlu0 %1718  ;;  %v6008_v14 = vld [vmem:[%s6398_s13 + $0x40] sm:$0xff]  ;;  %v6009_v32 = vld [vmem:[%s6398_s13 + $0x48] sm:$0xff] }
 0x1b4   : > { %v2872_v9 = vmul.f32 %v7389_v11, %v2056_v21  ;;  %v7626_v20 = vpop.permute.xlu1 %1723 }
 0x1b5   : > { %v2904_v39 = vmul.f32 %v7394_v5, %v2281_v51  ;;  %v2060_v4 = vpop.f32.mrb[32].mxu0  ;;  %v3936_v51 = vpack.c.bf16 %v6009_v32, %v6008_v14  ;;  %8720 = vst [vmem:[#allocation67_spill] sm:$0xff] %v7626_v20 }
 0x1b6   : > { %v2061_v60 = vadd.f32 %v2060_v4, %v1802_v27  ;;  %v2285_v45 = vpop.f32.mrb[32].mxu1  ;;  %v2062_v61 = vpop.f32.mrb[33].mxu0  ;;  %v1835_v27 = vmul.f32 %v7372_v53, %v7429_v46  ;;  %v1804_v46 = vmul.f32 %v7163_v35, %v7072_v37 }
 0x1b7   : > { %v7614_v42 = vadd.f32 %v2904_v39, %v2872_v9  ;;  %v2286_v22 = vadd.f32 %v2285_v45, %v1834_v0  ;;  %v2287_v21 = vpop.f32.mrb[33].mxu1  ;;  %v6010_v61 = vld [vmem:[%s6398_s13 + $0x50] sm:$0xff]  ;;  %5403 = vmatprep.mubr.bf16.mxu1 %v3936_v51 }
 0x1b8   : > { %v2873_v52 = vmul.f32 %v7389_v11, %v2061_v60  ;;  %v3937_v9 = vpack.c.bf16 %v6011_v6, %v6010_v61  ;;  %v1836_v6 = vmul.f32 %v7372_v53, %v7446_v16  ;;  %v1805_v61 = vmul.f32 %v7163_v35, %v7069_v7  ;;  %v6012_v16 = vld [vmem:[%s6398_s13 + $0x60] sm:$0xff] }
 0x1b9   : > { %v2905_v62 = vmul.f32 %v7394_v5, %v2286_v22  ;;  %v2065_v4 = vpop.f32.mrb[34].mxu0 }
 0x1ba   : > { %v2066_v39 = vadd.f32 %v2065_v4, %v1803_v26  ;;  %v2290_v0 = vpop.f32.mrb[34].mxu1  ;;  %v2067_v45 = vpop.f32.mrb[35].mxu0  ;;  %5404 = vmatmul.mubr.bf16.gmra.mrb[136].mxu1 %v3937_v9 }
 0x1bb   : > { %v7628_v60 = vadd.f32 %v2905_v62, %v2873_v52  ;;  %v2291_v21 = vadd.f32 %v2290_v0, %v1835_v27  ;;  %v2292_v14 = vpop.f32.mrb[35].mxu1  ;;  %v7635_v26 = vpop.permute.xlu0 %1408  ;;  %v6013_v0 = vld [vmem:[%s6398_s13 + $0x68] sm:$0xff] }
 0x1bc   : > { %v2874_v22 = vmul.f32 %v7389_v11, %v2066_v39  ;;  %v3938_v45 = vpack.c.bf16 %v6013_v0, %v6012_v16  ;;  %v7647_v14 = vpop.permute.xlu1 %1413 }
 0x1bd   : > { %v2906_v32 = vmul.f32 %v7394_v5, %v2291_v21  ;;  %v2070_v51 = vpop.f32.mrb[36].mxu0  ;;  %v1837_v21 = vmul.f32 %v7372_v53, %v7444_v58  ;;  %v1806_v58 = vmul.f32 %v7163_v35, %v7088_v49 }
 0x1be   : > { %v2071_v52 = vadd.f32 %v2070_v51, %v1804_v46  ;;  %v2295_v27 = vpop.f32.mrb[36].mxu1  ;;  %v2072_v62 = vpop.f32.mrb[37].mxu0  ;;  %5407 = vmatprep.mubr.bf16.mxu1 %v3938_v45 }
 0x1bf   : > { %v7638_v4 = vadd.f32 %v2906_v32, %v2874_v22  ;;  %v2296_v37 = vadd.f32 %v2295_v27, %v1836_v6  ;;  %v2297_v39 = vpop.f32.mrb[37].mxu1  ;;  %v6014_v22 = vld [vmem:[%s6398_s13 + $0x70] sm:$0xff]  ;;  %v6015_v32 = vld [vmem:[%s6398_s13 + $0x78] sm:$0xff] }
 0x1c0   : > { %v2875_v9 = vmul.f32 %v7389_v11, %v2071_v52  ;;  %v3939_v6 = vpack.c.bf16 %v6015_v32, %v6014_v22  ;;  %v7652_v52 = vpop.permute.xlu0 %1418 }
 0x1c1   : > { %v2907_v46 = vmul.f32 %v7394_v5, %v2296_v37  ;;  %v2075_v51 = vpop.f32.mrb[38].mxu0 }
 0x1c2   : > { %v2076_v27 = vadd.f32 %v2075_v51, %v1805_v61  ;;  %v2300_v62 = vpop.f32.mrb[38].mxu1  ;;  %v2077_v7 = vpop.f32.mrb[39].mxu0  ;;  %5408 = vmatmul.mubr.bf16.gmra.mrb[140].mxu1 %v3939_v6  ;;  %v1838_v61 = vmul.f32 %v7372_v53, %v7519_v3  ;;  %v1807_v6 = vmul.f32 %v7163_v35, %v7084_v8  ;;  %v6016_v3 = vld [vmem:[%s6398_s13 + $0x80] sm:$0xff] }
 0x1c3   : > { %v7654_v39 = vadd.f32 %v2907_v46, %v2875_v9  ;;  %v2301_v16 = vadd.f32 %v2300_v62, %v1837_v21  ;;  %v2302_v0 = vpop.f32.mrb[39].mxu1  ;;  %v7662_v46 = vpop.permute.xlu1 %1423  ;;  %v6017_v7 = vld [vmem:[%s6398_s13 + $0x88] sm:$0xff] }
 0x1c4   : > { %v2876_v37 = vmul.f32 %v7389_v11, %v2076_v27  ;;  %v7673_v0 = vpop.permute.xlu0 %1568 }
 0x1c5   : > { %v2908_v51 = vmul.f32 %v7394_v5, %v2301_v16  ;;  %v2080_v45 = vpop.f32.mrb[40].mxu0  ;;  %v3940_v16 = vpack.c.bf16 %v6017_v7, %v6016_v3  ;;  %v1808_v3 = vmul.f32 %v7163_v35, %v7100_v41  ;;  %v1840_v7 = vmul.f32 %v7372_v53, %v7536_v13 }
 0x1c6   : > { %v2081_v22 = vadd.f32 %v2080_v45, %v1806_v58  ;;  %v2305_v9 = vpop.f32.mrb[40].mxu1  ;;  %v2082_v21 = vpop.f32.mrb[41].mxu0  ;;  %v1839_v58 = vmul.f32 %v7372_v53, %v7531_v59 }
 0x1c7   : > { %v7664_v32 = vadd.f32 %v2908_v51, %v2876_v37  ;;  %v2306_v49 = vadd.f32 %v2305_v9, %v1838_v61  ;;  %v2307_v62 = vpop.f32.mrb[41].mxu1  ;;  %v6018_v37 = vld [vmem:[%s6398_s13 + $0x90] sm:$0xff]  ;;  %v6019_v51 = vld [vmem:[%s6398_s13 + $0x98] sm:$0xff]  ;;  %5411 = vmatprep.mubr.bf16.mxu1 %v3940_v16 }
 0x1c8   : > { %v2877_v27 = vmul.f32 %v7389_v11, %v2081_v22  ;;  %v3941_v61 = vpack.c.bf16 %v6019_v51, %v6018_v37  ;;  %v7685_v37 = vpop.permute.xlu1 %1573  ;;  %v1809_v51 = vmul.f32 %v7163_v35, %v7097_v1 }
 0x1c9   : > { %v2909_v45 = vmul.f32 %v7394_v5, %v2306_v49  ;;  %v2085_v21 = vpop.f32.mrb[42].mxu0 }
 0x1ca   : > { %v2086_v9 = vadd.f32 %v2085_v21, %v1807_v6  ;;  %v2310_v20 = vpop.f32.mrb[42].mxu1  ;;  %v2087_v8 = vpop.f32.mrb[43].mxu0  ;;  %5412 = vmatmul.mubr.bf16.gmra.mrb[144].mxu1 %v3941_v61 }
 0x1cb   : > { %v7678_v22 = vadd.f32 %v2909_v45, %v2877_v27  ;;  %v2311_v62 = vadd.f32 %v2310_v20, %v1839_v58  ;;  %v2312_v49 = vpop.f32.mrb[43].mxu1  ;;  %v7688_v45 = vpop.permute.xlu0 %1578  ;;  %v6021_v8 = vld [vmem:[%s6398_s13 + $0xa8] sm:$0xff] }
 0x1cc   : > { %v2878_v59 = vmul.f32 %v7389_v11, %v2086_v9  ;;  %8721 = vst [vmem:[#allocation68_spill] sm:$0xff] %v7688_v45  ;;  %v6020_v9 = vld [vmem:[%s6398_s13 + $0xa0] sm:$0xff]  ;;  %v6023_v45 = vld [vmem:[%s6398_s13 + $0xb8] sm:$0xff]  ;;  %v7702_v1 = vpop.permute.xlu1 %1583 }
 0x1cd   : > { %v2910_v6 = vmul.f32 %v7394_v5, %v2311_v62  ;;  %v2090_v16 = vpop.f32.mrb[44].mxu0  ;;  %v3942_v62 = vpack.c.bf16 %v6021_v8, %v6020_v9  ;;  %8722 = vst [vmem:[#allocation69_spill] sm:$0xff] %v7702_v1 }
 0x1ce   : > { %v2091_v27 = vadd.f32 %v2090_v16, %v1808_v3  ;;  %v2315_v20 = vpop.f32.mrb[44].mxu1  ;;  %v2092_v58 = vpop.f32.mrb[45].mxu0  ;;  %v1841_v3 = vmul.f32 %v7372_v53, %v7547_v57  ;;  %v1810_v57 = vmul.f32 %v7163_v35, %v7118_v40 }
 0x1cf   : > { %v7690_v41 = vadd.f32 %v2910_v6, %v2878_v59  ;;  %v2316_v21 = vadd.f32 %v2315_v20, %v1840_v7  ;;  %v2317_v61 = vpop.f32.mrb[45].mxu1  ;;  %v6022_v58 = vld [vmem:[%s6398_s13 + $0xb0] sm:$0xff]  ;;  %5415 = vmatprep.mubr.bf16.mxu1 %v3942_v62 }
 0x1d0   : > { %v2879_v13 = vmul.f32 %v7389_v11, %v2091_v27  ;;  %v3943_v59 = vpack.c.bf16 %v6023_v45, %v6022_v58  ;;  %v1842_v45 = vmul.f32 %v7372_v53, %v7635_v26  ;;  %v1811_v58 = vmul.f32 %v7163_v35, %v7113_v31  ;;  %v6024_v26 = vld [vmem:[%s6398_s13 + $0xc0] sm:$0xff] }
 0x1d1   : > { %v2911_v49 = vmul.f32 %v7394_v5, %v2316_v21  ;;  %v2095_v16 = vpop.f32.mrb[46].mxu0 }
 0x1d2   : > { %v2096_v6 = vadd.f32 %v2095_v16, %v1809_v51  ;;  %v2320_v7 = vpop.f32.mrb[46].mxu1  ;;  %v2097_v20 = vpop.f32.mrb[47].mxu0  ;;  %5416 = vmatmul.mubr.bf16.gmra.mrb[148].mxu1 %v3943_v59 }
 0x1d3   : > { %v7704_v27 = vadd.f32 %v2911_v49, %v2879_v13  ;;  %v2321_v61 = vadd.f32 %v2320_v7, %v1841_v3  ;;  %v2322_v9 = vpop.f32.mrb[47].mxu1  ;;  %v7711_v51 = vpop.permute.xlu0 %1728  ;;  %v6025_v7 = vld [vmem:[%s6398_s13 + $0xc8] sm:$0xff] }
 0x1d4   : > { %v2880_v21 = vmul.f32 %v7389_v11, %v2096_v6  ;;  %v3944_v20 = vpack.c.bf16 %v6025_v7, %v6024_v26  ;;  %v7723_v9 = vpop.permute.xlu1 %1733 }
 0x1d5   : > { %v2912_v8 = vmul.f32 %v7394_v5, %v2321_v61  ;;  %v2100_v62 = vpop.f32.mrb[48].mxu0  ;;  %v1843_v61 = vmul.f32 %v7372_v53, %v7647_v14  ;;  %v1812_v14 = vmul.f32 %v7163_v35, %v7132_v54 }
 0x1d6   : > { %v2101_v13 = vadd.f32 %v2100_v62, %v1810_v57  ;;  %v2325_v3 = vpop.f32.mrb[48].mxu1  ;;  %v2102_v49 = vpop.f32.mrb[49].mxu0  ;;  %5419 = vmatprep.mubr.bf16.mxu1 %v3944_v20 }
 0x1d7   : > { %v7714_v16 = vadd.f32 %v2912_v8, %v2880_v21  ;;  %v2326_v40 = vadd.f32 %v2325_v3, %v1842_v45  ;;  %v2327_v6 = vpop.f32.mrb[49].mxu1  ;;  %v6026_v21 = vld [vmem:[%s6398_s13 + $0xd0] sm:$0xff]  ;;  %v6027_v8 = vld [vmem:[%s6398_s13 + $0xd8] sm:$0xff] }
 0x1d8   : > { %v2881_v59 = vmul.f32 %v7389_v11, %v2101_v13  ;;  %v3945_v45 = vpack.c.bf16 %v6027_v8, %v6026_v21  ;;  %v7728_v13 = vpop.permute.xlu0 %1738 }
 0x1d9   : > { %v2913_v57 = vmul.f32 %v7394_v5, %v2326_v40  ;;  %v2105_v62 = vpop.f32.mrb[50].mxu0  ;;  %8723 = vst [vmem:[#allocation70_spill] sm:$0xff] %v7728_v13 }
 0x1da   : > { %v2106_v3 = vadd.f32 %v2105_v62, %v1811_v58  ;;  %v2330_v49 = vpop.f32.mrb[50].mxu1  ;;  %v2107_v31 = vpop.f32.mrb[51].mxu0  ;;  %5420 = vmatmul.mubr.bf16.gmra.mrb[152].mxu1 %v3945_v45  ;;  %v1844_v58 = vmul.f32 %v7372_v53, %v7652_v52  ;;  %v6028_v52 = vld [vmem:[%s6398_s13 + $0xe0] sm:$0xff] }
 0x1db   : > { %v7730_v6 = vadd.f32 %v2913_v57, %v2881_v59  ;;  %v2331_v26 = vadd.f32 %v2330_v49, %v1843_v61  ;;  %v2332_v7 = vpop.f32.mrb[51].mxu1  ;;  %v7738_v57 = vpop.permute.xlu1 %1743  ;;  %v6029_v31 = vld [vmem:[%s6398_s13 + $0xe8] sm:$0xff] }
 0x1dc   : > { %v2882_v40 = vmul.f32 %v7389_v11, %v2106_v3  ;;  %8724 = vst [vmem:[#allocation71_spill] sm:$0xff] %v7738_v57  ;;  %v1813_v3 = vmul.f32 %v7163_v35, %v7129_v29  ;;  %v1429_v7 = vpop.permute.xlu0 %1428  ;;  %v6030_v57 = vld [vmem:[%s6398_s13 + $0xf0] sm:$0xff] }
 0x1dd   : > { %v2914_v62 = vmul.f32 %v7394_v5, %v2331_v26  ;;  %v2110_v20 = vpop.f32.mrb[52].mxu0  ;;  %v3946_v26 = vpack.c.bf16 %v6029_v31, %v6028_v52  ;;  %v8727_v52 = vld [vmem:[#allocation25_spill] sm:$0xff] }
 0x1de   : > { %v2111_v21 = vadd.f32 %v2110_v20, %v1812_v14  ;;  %v2335_v59 = vpop.f32.mrb[52].mxu1  ;;  %v2112_v61 = vpop.f32.mrb[53].mxu0  ;;  %v1845_v14 = vmul.f32 %v7372_v53, %v7662_v46  ;;  %v1814_v31 = vmul.f32 %v7163_v35, %v8727_v52 }
 0x1df   : > { %v7740_v8 = vadd.f32 %v2914_v62, %v2882_v40  ;;  %v2336_v54 = vadd.f32 %v2335_v59, %v1844_v58  ;;  %v2337_v45 = vpop.f32.mrb[53].mxu1  ;;  %v6031_v40 = vld [vmem:[%s6398_s13 + $0xf8] sm:$0xff]  ;;  %5423 = vmatprep.mubr.bf16.mxu1 %v3946_v26  ;;  %s8255_s13 = sadd.s32 %s4990_s27, %s6388_s21  ;;  %s8789_s21 = sld [smem:[#allocation75_spill]] }
 0x1e0   : > { %v2883_v49 = vmul.f32 %v7389_v11, %v2111_v21  ;;  %v3947_v62 = vpack.c.bf16 %v6031_v40, %v6030_v57  ;;  %s4991_s28 = sshll.u32 %s8255_s13, 6  ;;  %s6068_s27 = scalar_lea.vmem %s6067_s3, 4096 }
 0x1e1   : > { %8725 = vst [vmem:[#allocation72_spill] sm:$0xff] %v7740_v8  ;;  %v2915_v20 = vmul.f32 %v7394_v5, %v2336_v54  ;;  %v2115_v61 = vpop.f32.mrb[54].mxu0  ;;  %v1434_v8 = vpop.permute.xlu1 %1433  ;;  %v1846_v54 = vmul.f32 %v7372_v53, %v1429_v7  ;;  %s8264_s30 = scalar_lea.hbm %s8631_s11, %s4991_s28  ;;  %p6070_p7 = scmp.lt.s32.totalorder %s6068_s27, %s6062_s18 }
 0x1e2   : > { %v2116_v58 = vadd.f32 %v2115_v61, %v1813_v3  ;;  %v2340_v59 = vpop.f32.mrb[54].mxu1  ;;  %v2117_v45 = vpop.f32.mrb[55].mxu0  ;;  %5424 = vmatmul.mubr.bf16.gmra.mrb[156].mxu1 %v3947_v62 }
 0x1e3   : > { %v7752_v29 = vadd.f32 %v2915_v20, %v2883_v49  ;;  %v2341_v21 = vadd.f32 %v2340_v59, %v1845_v14  ;;  %v2342_v1 = vpop.f32.mrb[55].mxu1  ;;  %v1439_v59 = vpop.permute.xlu0 %1438  ;;  %p6071_p9 = por %p6070_p7, %p6069_p6 }
 0x1e4   : > { %v2884_v46 = vmul.f32 %v7389_v11, %v2116_v58  ;;  %v8729_v1 = vld [vmem:[#allocation24_spill] sm:$0xff]  ;;  %v1847_v58 = vmul.f32 %v7372_v53, %v1434_v8 }
 0x1e5   : > { %8726 = vst [vmem:[#allocation73_spill] sm:$0xff] %v7752_v29  ;;  %v2916_v13 = vmul.f32 %v7394_v5, %v2341_v21  ;;  %v2120_v57 = vpop.f32.mrb[56].mxu0  ;;  %v1815_v20 = vmul.f32 %v7163_v35, %v8729_v1  ;;  %v8732_v8 = vld [vmem:[#allocation52_spill] sm:$0xff]  ;;  %p6072_p11 = pnand %p6071_p9, %p6065_p5 }
 0x1e6   : > { %v2121_v3 = vadd.f32 %v2120_v57, %v1814_v31  ;;  %v2345_v61 = vpop.f32.mrb[56].mxu1  ;;  %v2122_v40 = vpop.f32.mrb[57].mxu0 }
 0x1e7   : > { %v7759_v26 = vadd.f32 %v2916_v13, %v2884_v46  ;;  %v2346_v49 = vadd.f32 %v2345_v61, %v1846_v54  ;;  %v2347_v14 = vpop.f32.mrb[57].mxu1  ;;  %v8731_v54 = vld [vmem:[#allocation22_spill] sm:$0xff]  ;;  %v1125_v40 = vcombine.high %v8732_v8, %v8732_v8  ;;  %v8735_v8 = vld [vmem:[#allocation23_spill] sm:$0xff] }
 0x1e8   : > { %v2885_v62 = vmul.f32 %v7389_v11, %v2121_v3  ;;  %v1124_v61 = vcombine.high %v8731_v54, %v8731_v54  ;;  %v6032_v11 = vld [vmem:[%s8622_s2] ss:$0 sm:$0xff]  ;;  %v6033_v14 = vld [vmem:[%s8622_s2 + $0x1] ss:$0 sm:$0xff] }
 0x1e9   : > { %8728 = vst [vmem:[#allocation25_spill] sm:$0xff] %v7759_v26  ;;  %v2917_v7 = vmul.f32 %v7394_v5, %v2346_v49  ;;  %v2125_v45 = vpop.f32.mrb[58].mxu0  ;;  %v1444_v5 = vpop.permute.xlu1 %1443  ;;  %v1848_v49 = vmul.f32 %v7372_v53, %v1439_v59  ;;  %v7788_v26 = vrot.slane %v1125_v40, %v8735_v8 }
 0x1ea   : > { %v2126_v21 = vadd.f32 %v2125_v45, %v1815_v20  ;;  %v2350_v52 = vpop.f32.mrb[58].mxu1  ;;  %v2127_v31 = vpop.f32.mrb[59].mxu0 }
 0x1eb   : > { %v7766_v57 = vadd.f32 %v2917_v7, %v2885_v62  ;;  %v2351_v13 = vadd.f32 %v2350_v52, %v1847_v58  ;;  %v2352_v46 = vpop.f32.mrb[59].mxu1  ;;  %v8733_v62 = vld [vmem:[#allocation27_spill] sm:$0xff] }
 0x1ec   : > { %v2886_v3 = vmul.f32 %v6032_v11, %v2126_v21  ;;  %v8734_v46 = vld [vmem:[#allocation26_spill] sm:$0xff] }
 0x1ed   : > { %8730 = vst [vmem:[#allocation24_spill] sm:$0xff] %v7766_v57  ;;  %v2918_v1 = vmul.f32 %v6033_v14, %v2351_v13  ;;  %v2130_v20 = vpop.f32.mrb[60].mxu0  ;;  %v1817_v54 = vmul.f32 %v7163_v35, %v8734_v46  ;;  %v7785_v57 = vrot.slane %v1124_v61, %v8735_v8  ;;  %v1849_v13 = vmul.f32 %v7372_v53, %v1444_v5  ;;  %v8738_v35 = vld [vmem:[#allocation29_spill] sm:$0xff] }
 0x1ee   : > { %v2131_v58 = vadd.f32 %v2130_v20, %v8733_v62  ;;  %v2355_v7 = vpop.f32.mrb[60].mxu1  ;;  %v2132_v45 = vpop.f32.mrb[61].mxu0 }
 0x1ef   : > { %v7780_v52 = vadd.f32 %v2918_v1, %v2886_v3  ;;  %v2356_v31 = vadd.f32 %v2355_v7, %v1848_v49  ;;  %v2357_v21 = vpop.f32.mrb[61].mxu1  ;;  %v1850_v61 = vmul.f32 %v7785_v57, %v8738_v35 }
 0x1f0   : > { %v2887_v59 = vmul.f32 %v6032_v11, %v2131_v58  ;;  %v8739_v21 = vld [vmem:[#allocation33_spill] sm:$0xff] }
 0x1f1   : > { %v2919_v29 = vmul.f32 %v6033_v14, %v2356_v31  ;;  %v2135_v20 = vpop.f32.mrb[62].mxu0  ;;  %v1882_v40 = vmul.f32 %v7788_v26, %v8739_v21  ;;  %v7803_v31 = vld [vmem:[%s8622_s2 + $0x2] ss:$0 sm:$0xff] }
 0x1f2   : > { %v2136_v62 = vadd.f32 %v2135_v20, %v1817_v54  ;;  %v2360_v45 = vpop.f32.mrb[62].mxu1  ;;  %v2137_v3 = vpop.f32.mrb[63].mxu0  ;;  %v8741_v20 = vld [vmem:[#allocation28_spill] sm:$0xff] }
 0x1f3   : > { %v7791_v1 = vadd.f32 %v2919_v29, %v2887_v59  ;;  %v7793_v49 = vadd.f32 %v2360_v45, %v1849_v13  ;;  %v2362_v7 = vpop.f32.mrb[63].mxu1  ;;  %v8742_v45 = vld [vmem:[#allocation32_spill] sm:$0xff] }
 0x1f4   : > { %2827 = vst [vmem:[#allocation2 - $0x7] sm:$0x80] %v2136_v62  ;;  %v2888_v58 = vmul.f32 %v6032_v11, %v2136_v62  ;;  %v7810_v11 = vld [vmem:[%s8622_s2 + $0x3] ss:$0 sm:$0xff]  ;;  %v1883_v3 = vmul.f32 %v7788_v26, %v8742_v45 }
 0x1f5   : > { %8736 = vst [vmem:[#allocation22_spill] sm:$0xff] %v7791_v1  ;;  %8737 = vst [vmem:[#allocation52_spill] sm:$0xff] %v7793_v49  ;;  %v2920_v53 = vmul.f32 %v6033_v14, %v7793_v49  ;;  %v2430_v5 = vpop.f32.mrb[64].mxu0  ;;  %v1851_v14 = vmul.f32 %v7785_v57, %v8741_v20  ;;  %v8745_v49 = vld [vmem:[#allocation61_spill] sm:$0xff] }
 0x1f6   : > { %v2431_v29 = vadd.f32 %v2430_v5, %v1850_v61  ;;  %v2655_v46 = vpop.f32.mrb[64].mxu1  ;;  %v2432_v54 = vpop.f32.mrb[65].mxu0 }
 0x1f7   : > { %v7805_v8 = vadd.f32 %v2920_v53, %v2888_v58  ;;  %v2656_v59 = vadd.f32 %v2655_v46, %v1882_v40  ;;  %v2657_v13 = vpop.f32.mrb[65].mxu1  ;;  %v8743_v46 = vld [vmem:[#allocation31_spill] sm:$0xff] }
 0x1f8   : > { %v2921_v62 = vmul.f32 %v7803_v31, %v2431_v29  ;;  %v1852_v54 = vmul.f32 %v7785_v57, %v8743_v46  ;;  %v8744_v29 = vld [vmem:[#allocation35_spill] sm:$0xff] }
 0x1f9   : > { %8740 = vst [vmem:[#allocation27_spill] sm:$0xff] %v7805_v8  ;;  %v2435_v7 = vpop.f32.mrb[66].mxu0  ;;  %v2953_v61 = vmul.f32 %v7810_v11, %v2656_v59  ;;  %v1884_v8 = vmul.f32 %v7788_v26, %v8744_v29 }
 0x1fa   : > { %v2986_v35 = vadd.f32 %v7409_v24, %v2921_v62  ;;  %v2436_v58 = vadd.f32 %v2435_v7, %v1851_v14  ;;  %v2660_v21 = vpop.f32.mrb[66].mxu1  ;;  %v2437_v40 = vpop.f32.mrb[67].mxu0 }
 0x1fb   : > { %v2661_v53 = vadd.f32 %v2660_v21, %v1883_v3  ;;  %v2662_v5 = vpop.f32.mrb[67].mxu1  ;;  %v8746_v21 = vld [vmem:[#allocation30_spill] sm:$0xff] }
 0x1fc   : > { %v2987_v13 = vadd.f32 %v2986_v35, %v2953_v61  ;;  %v2922_v20 = vmul.f32 %v7803_v31, %v2436_v58  ;;  %v1853_v40 = vmul.f32 %v7785_v57, %v8746_v21  ;;  %v8747_v58 = vld [vmem:[#allocation34_spill] sm:$0xff] }
 0x1fd   : > { %v2440_v45 = vpop.f32.mrb[68].mxu0  ;;  %v2954_v24 = vmul.f32 %v7810_v11, %v2661_v53  ;;  %v1885_v5 = vmul.f32 %v7788_v26, %v8747_v58 }
 0x1fe   : > { %v2989_v1 = vadd.f32 %v8745_v49, %v2922_v20  ;;  %v2441_v59 = vadd.f32 %v2440_v45, %v1852_v54  ;;  %v2665_v14 = vpop.f32.mrb[68].mxu1  ;;  %v2442_v62 = vpop.f32.mrb[69].mxu0 }
 0x1ff   : > { %v2666_v7 = vadd.f32 %v2665_v14, %v1884_v8  ;;  %v2667_v3 = vpop.f32.mrb[69].mxu1  ;;  %v8748_v62 = vld [vmem:[#allocation37_spill] sm:$0xff] }
 0x200   : > { %v2990_v35 = vadd.f32 %v2989_v1, %v2954_v24  ;;  %v2923_v61 = vmul.f32 %v7803_v31, %v2441_v59  ;;  %v1854_v3 = vmul.f32 %v7785_v57, %v8748_v62  ;;  %v8749_v59 = vld [vmem:[#allocation41_spill] sm:$0xff] }
 0x201   : > { %v2445_v46 = vpop.f32.mrb[70].mxu0  ;;  %v2955_v53 = vmul.f32 %v7810_v11, %v2666_v7  ;;  %v1886_v21 = vmul.f32 %v7788_v26, %v8749_v59 }
 0x202   : > { %v2992_v49 = vadd.f32 %v7442_v30, %v2923_v61  ;;  %v2446_v54 = vadd.f32 %v2445_v46, %v1853_v40  ;;  %v2670_v20 = vpop.f32.mrb[70].mxu1  ;;  %v2447_v29 = vpop.f32.mrb[71].mxu0  ;;  %v3081_v8 = vpack.c.bf16 %v2990_v35, %v2987_v13  ;;  %v8750_v46 = vld [vmem:[#allocation36_spill] sm:$0xff] }
 0x203   : > { %v2671_v45 = vadd.f32 %v2670_v20, %v1885_v5  ;;  %v2672_v14 = vpop.f32.mrb[71].mxu1  ;;  %v8751_v20 = vld [vmem:[#allocation40_spill] sm:$0xff] }
 0x204   : > { %v2993_v1 = vadd.f32 %v2992_v49, %v2955_v53  ;;  %v2924_v24 = vmul.f32 %v7803_v31, %v2446_v54  ;;  %5097 = vst [vmem:[%s6405_s15] sm:$0xff] %v3081_v8   ;;  %5347 = vmatprep.mubr.bf16.mxu0 %v3081_v8  ;;  %v1855_v49 = vmul.f32 %v7785_v57, %v8750_v46 }
 0x205   : > { %v2450_v30 = vpop.f32.mrb[72].mxu0  ;;  %v2956_v40 = vmul.f32 %v7810_v11, %v2671_v45  ;;  %v1887_v29 = vmul.f32 %v7788_v26, %v8751_v20  ;;  %v8754_v20 = vld [vmem:[#allocation38_spill] sm:$0xff] }
 0x206   : > { %v2995_v7 = vadd.f32 %v7457_v2, %v2924_v24  ;;  %v2451_v61 = vadd.f32 %v2450_v30, %v1854_v3  ;;  %v2675_v13 = vpop.f32.mrb[72].mxu1  ;;  %v2452_v35 = vpop.f32.mrb[73].mxu0  ;;  %v8752_v30 = vld [vmem:[#allocation39_spill] sm:$0xff] }
 0x207   : > { %v2676_v58 = vadd.f32 %v2675_v13, %v1886_v21  ;;  %v2677_v5 = vpop.f32.mrb[73].mxu1  ;;  %v1856_v13 = vmul.f32 %v7785_v57, %v8752_v30 }
 0x208   : > { %v2996_v53 = vadd.f32 %v2995_v7, %v2956_v40  ;;  %v2925_v54 = vmul.f32 %v7803_v31, %v2451_v61  ;;  %v8753_v61 = vld [vmem:[#allocation43_spill] sm:$0xff] }
 0x209   : > { %v2455_v8 = vpop.f32.mrb[74].mxu0  ;;  %v2957_v45 = vmul.f32 %v7810_v11, %v2676_v58 }
 0x20a   : > { %v3082_v14 = vpack.c.bf16 %v2996_v53, %v2993_v1  ;;  %v2998_v2 = vadd.f32 %v7472_v33, %v2925_v54  ;;  %v2456_v62 = vadd.f32 %v2455_v8, %v1855_v49  ;;  %v2680_v3 = vpop.f32.mrb[74].mxu1  ;;  %v2457_v24 = vpop.f32.mrb[75].mxu0  ;;  %v1888_v1 = vmul.f32 %v7788_v26, %v8753_v61  ;;  %v8756_v61 = vld [vmem:[#allocation45_spill] sm:$0xff] }
 0x20b   : > { %v2681_v59 = vadd.f32 %v2680_v3, %v1887_v29  ;;  %v2682_v21 = vpop.f32.mrb[75].mxu1  ;;  %v1857_v29 = vmul.f32 %v7785_v57, %v8754_v20 }
 0x20c   : > { %5253 = vst [vmem:[%s6405_s15 + $0x8] sm:$0xff] %v3082_v14   ;;  %v2999_v7 = vadd.f32 %v2998_v2, %v2957_v45  ;;  %v2926_v40 = vmul.f32 %v7803_v31, %v2456_v62  ;;  %5348 = vmatmul.mubr.bf16.vlgmr.msra.gmra.mrb[128].mxu0 %v3082_v14  ;;  %v8755_v2 = vld [vmem:[#allocation42_spill] sm:$0xff] }
 0x20d   : > { %v2460_v35 = vpop.f32.mrb[76].mxu0  ;;  %v2958_v58 = vmul.f32 %v7810_v11, %v2681_v59  ;;  %v1889_v45 = vmul.f32 %v7788_v26, %v8755_v2 }
 0x20e   : > { %v3001_v33 = vadd.f32 %v7487_v15, %v2926_v40  ;;  %v2461_v5 = vadd.f32 %v2460_v35, %v1856_v13  ;;  %v2685_v46 = vpop.f32.mrb[76].mxu1  ;;  %v2462_v49 = vpop.f32.mrb[77].mxu0 }
 0x20f   : > { %v2686_v53 = vadd.f32 %v2685_v46, %v1888_v1  ;;  %v2687_v54 = vpop.f32.mrb[77].mxu1  ;;  %v1858_v1 = vmul.f32 %v7785_v57, %v8756_v61 }
 0x210   : > { %v3002_v8 = vadd.f32 %v3001_v33, %v2958_v58  ;;  %v2927_v14 = vmul.f32 %v7803_v31, %v2461_v5  ;;  %v8757_v58 = vld [vmem:[#allocation49_spill] sm:$0xff] }
 0x211   : > { %v2465_v62 = vpop.f32.mrb[78].mxu0  ;;  %v2959_v3 = vmul.f32 %v7810_v11, %v2686_v53  ;;  %v1890_v5 = vmul.f32 %v7788_v26, %v8757_v58 }
 0x212   : > { %v3004_v15 = vadd.f32 %v7499_v44, %v2927_v14  ;;  %v2466_v24 = vadd.f32 %v2465_v62, %v1857_v29  ;;  %v2690_v59 = vpop.f32.mrb[78].mxu1  ;;  %v2467_v21 = vpop.f32.mrb[79].mxu0  ;;  %v3083_v30 = vpack.c.bf16 %v3002_v8, %v2999_v7  ;;  %v8758_v8 = vld [vmem:[#allocation44_spill] sm:$0xff] }
 0x213   : > { %v2691_v13 = vadd.f32 %v2690_v59, %v1889_v45  ;;  %v2692_v40 = vpop.f32.mrb[79].mxu1  ;;  %v1859_v14 = vmul.f32 %v7785_v57, %v8758_v8  ;;  %v8759_v62 = vld [vmem:[#allocation48_spill] sm:$0xff]  ;;  %v8762_v8 = vld [vmem:[#allocation46_spill] sm:$0xff] }
 0x214   : > { %v3005_v35 = vadd.f32 %v3004_v15, %v2959_v3  ;;  %v2928_v33 = vmul.f32 %v7803_v31, %v2466_v24  ;;  %5254 = vst [vmem:[%s6405_s15 + $0x10] sm:$0xff] %v3083_v30   ;;  %5351 = vmatprep.mubr.bf16.mxu0 %v3083_v30  ;;  %v1891_v15 = vmul.f32 %v7788_v26, %v8759_v62  ;;  %v8763_v62 = vld [vmem:[#allocation50_spill] sm:$0xff] }
 0x215   : > { %v2470_v44 = vpop.f32.mrb[80].mxu0  ;;  %v2960_v49 = vmul.f32 %v7810_v11, %v2691_v13 }
 0x216   : > { %v3007_v46 = vadd.f32 %v7509_v63, %v2928_v33  ;;  %v2471_v53 = vadd.f32 %v2470_v44, %v1858_v1  ;;  %v2695_v7 = vpop.f32.mrb[80].mxu1  ;;  %v2472_v54 = vpop.f32.mrb[81].mxu0  ;;  %v8760_v1 = vld [vmem:[#allocation47_spill] sm:$0xff] }
 0x217   : > { %v2696_v20 = vadd.f32 %v2695_v7, %v1890_v5  ;;  %v2697_v29 = vpop.f32.mrb[81].mxu1  ;;  %v1860_v33 = vmul.f32 %v7785_v57, %v8760_v1  ;;  %v8761_v44 = vld [vmem:[#allocation51_spill] sm:$0xff] }
 0x218   : > { %v3008_v2 = vadd.f32 %v3007_v46, %v2960_v49  ;;  %v2929_v45 = vmul.f32 %v7803_v31, %v2471_v53  ;;  %v1892_v46 = vmul.f32 %v7788_v26, %v8761_v44  ;;  %v8765_v44 = vld [vmem:[#allocation58_spill] sm:$0xff] }
 0x219   : > { %v2475_v3 = vpop.f32.mrb[82].mxu0  ;;  %v2961_v24 = vmul.f32 %v7810_v11, %v2696_v20 }
 0x21a   : > { %v3010_v63 = vadd.f32 %v7521_v43, %v2929_v45  ;;  %v2476_v59 = vadd.f32 %v2475_v3, %v1859_v14  ;;  %v2700_v21 = vpop.f32.mrb[82].mxu1  ;;  %v2477_v30 = vpop.f32.mrb[83].mxu0  ;;  %v3084_v13 = vpack.c.bf16 %v3008_v2, %v3005_v35  ;;  %v1861_v14 = vmul.f32 %v7785_v57, %v8762_v8 }
 0x21b   : > { %v2701_v40 = vadd.f32 %v2700_v21, %v1891_v15  ;;  %v2702_v61 = vpop.f32.mrb[83].mxu1  ;;  %v1893_v15 = vmul.f32 %v7788_v26, %v8763_v62 }
 0x21c   : > { %v3011_v58 = vadd.f32 %v3010_v63, %v2961_v24  ;;  %v2930_v5 = vmul.f32 %v7803_v31, %v2476_v59  ;;  %5255 = vst [vmem:[%s6405_s15 + $0x18] sm:$0xff] %v3084_v13   ;;  %5352 = vmatmul.mubr.bf16.gmra.mrb[132].mxu0 %v3084_v13  ;;  %v8764_v61 = vld [vmem:[#allocation54_spill] sm:$0xff] }
 0x21d   : > { %v2480_v43 = vpop.f32.mrb[84].mxu0  ;;  %v2962_v53 = vmul.f32 %v7810_v11, %v2701_v40  ;;  %v1862_v1 = vmul.f32 %v7785_v57, %v8764_v61 }
 0x21e   : > { %v3013_v49 = vadd.f32 %v7534_v17, %v2930_v5  ;;  %v2481_v7 = vadd.f32 %v2480_v43, %v1860_v33  ;;  %v2705_v35 = vpop.f32.mrb[84].mxu1  ;;  %v2482_v54 = vpop.f32.mrb[85].mxu0 }
 0x21f   : > { %v2706_v20 = vadd.f32 %v2705_v35, %v1892_v46  ;;  %v2707_v29 = vpop.f32.mrb[85].mxu1  ;;  %v1894_v46 = vmul.f32 %v7788_v26, %v8765_v44 }
 0x220   : > { %v3014_v2 = vadd.f32 %v3013_v49, %v2962_v53  ;;  %v2931_v45 = vmul.f32 %v7803_v31, %v2481_v7 }
 0x221   : > { %v2485_v3 = vpop.f32.mrb[86].mxu0  ;;  %v2963_v63 = vmul.f32 %v7810_v11, %v2706_v20  ;;  %v8766_v20 = vld [vmem:[#allocation53_spill] sm:$0xff] }
 0x222   : > { %v3016_v17 = vadd.f32 %v7549_v56, %v2931_v45  ;;  %v2486_v24 = vadd.f32 %v2485_v3, %v1861_v14  ;;  %v2710_v59 = vpop.f32.mrb[86].mxu1  ;;  %v2487_v21 = vpop.f32.mrb[87].mxu0  ;;  %v3085_v30 = vpack.c.bf16 %v3014_v2, %v3011_v58  ;;  %v1863_v29 = vmul.f32 %v7785_v57, %v8766_v20  ;;  %v8767_v2 = vld [vmem:[#allocation57_spill] sm:$0xff]  ;;  %v8771_v20 = vld [vmem:[#allocation59_spill] sm:$0xff] }
 0x223   : > { %v2711_v13 = vadd.f32 %v2710_v59, %v1893_v15  ;;  %v2712_v40 = vpop.f32.mrb[87].mxu1  ;;  %v1895_v45 = vmul.f32 %v7788_v26, %v8767_v2 }
 0x224   : > { %v3017_v33 = vadd.f32 %v3016_v17, %v2963_v63  ;;  %v2932_v5 = vmul.f32 %v7803_v31, %v2486_v24  ;;  %5256 = vst [vmem:[%s6405_s15 + $0x20] sm:$0xff] %v3085_v30   ;;  %5355 = vmatprep.mubr.bf16.mxu0 %v3085_v30  ;;  %v8768_v30 = vld [vmem:[#allocation56_spill] sm:$0xff] }
 0x225   : > { %v2490_v56 = vpop.f32.mrb[88].mxu0  ;;  %v2964_v49 = vmul.f32 %v7810_v11, %v2711_v13  ;;  %v1864_v13 = vmul.f32 %v7785_v57, %v8768_v30 }
 0x226   : > { %v3019_v43 = vadd.f32 %v7562_v34, %v2932_v5  ;;  %v2491_v53 = vadd.f32 %v2490_v56, %v1862_v1  ;;  %v2715_v58 = vpop.f32.mrb[88].mxu1  ;;  %v2492_v7 = vpop.f32.mrb[89].mxu0  ;;  %v8769_v1 = vld [vmem:[#allocation60_spill] sm:$0xff] }
 0x227   : > { %v2716_v35 = vadd.f32 %v2715_v58, %v1894_v46  ;;  %v2717_v54 = vpop.f32.mrb[89].mxu1  ;;  %v1896_v5 = vmul.f32 %v7788_v26, %v8769_v1  ;;  %v8770_v58 = vld [vmem:[#allocation55_spill] sm:$0xff] }
 0x228   : > { %v3020_v8 = vadd.f32 %v3019_v43, %v2964_v49  ;;  %v2933_v14 = vmul.f32 %v7803_v31, %v2491_v53  ;;  %v1865_v7 = vmul.f32 %v7785_v57, %v8770_v58 }
 0x229   : > { %v2495_v62 = vpop.f32.mrb[90].mxu0  ;;  %v2965_v15 = vmul.f32 %v7810_v11, %v2716_v35 }
 0x22a   : > { %v3022_v34 = vadd.f32 %v7578_v12, %v2933_v14  ;;  %v2496_v3 = vadd.f32 %v2495_v62, %v1863_v29  ;;  %v2720_v17 = vpop.f32.mrb[90].mxu1  ;;  %v2497_v63 = vpop.f32.mrb[91].mxu0  ;;  %v3086_v24 = vpack.c.bf16 %v3020_v8, %v3017_v33  ;;  %v1897_v29 = vmul.f32 %v7788_v26, %v8771_v20 }
 0x22b   : > { %v2721_v59 = vadd.f32 %v2720_v17, %v1895_v45  ;;  %v2722_v21 = vpop.f32.mrb[91].mxu1  ;;  %v1866_v17 = vmul.f32 %v7785_v57, %v7461_v18 }
 0x22c   : > { %v3023_v40 = vadd.f32 %v3022_v34, %v2965_v15  ;;  %v2934_v61 = vmul.f32 %v7803_v31, %v2496_v3  ;;  %5257 = vst [vmem:[%s6405_s15 + $0x28] sm:$0xff] %v3086_v24   ;;  %5356 = vmatmul.mubr.bf16.gmra.mrb[136].mxu0 %v3086_v24 }
 0x22d   : > { %v2500_v12 = vpop.f32.mrb[92].mxu0  ;;  %v2966_v46 = vmul.f32 %v7810_v11, %v2721_v59  ;;  %v1898_v59 = vmul.f32 %v7788_v26, %v7489_v50  ;;  %v1899_v50 = vmul.f32 %v7788_v26, %v7497_v36  ;;  %v1900_v36 = vmul.f32 %v7788_v26, %v7501_v25 }
 0x22e   : > { %v3025_v44 = vadd.f32 %v7588_v47, %v2934_v61  ;;  %v2501_v56 = vadd.f32 %v2500_v12, %v1864_v13  ;;  %v2725_v33 = vpop.f32.mrb[92].mxu1  ;;  %v2502_v43 = vpop.f32.mrb[93].mxu0  ;;  %v8772_v12 = vld [vmem:[#allocation62_spill] sm:$0xff]  ;;  %v1901_v25 = vmul.f32 %v7788_v26, %v7511_v28  ;;  %v1902_v28 = vmul.f32 %v7788_v26, %v7597_v19 }
 0x22f   : > { %v2726_v49 = vadd.f32 %v2725_v33, %v1896_v5  ;;  %v2727_v53 = vpop.f32.mrb[93].mxu1  ;;  %v1867_v18 = vmul.f32 %v7785_v57, %v8772_v12  ;;  %v1903_v19 = vmul.f32 %v7788_v26, %v7609_v23  ;;  %v1904_v23 = vmul.f32 %v7788_v26, %v7612_v48 }
 0x230   : > { %v3026_v35 = vadd.f32 %v3025_v44, %v2966_v46  ;;  %v2935_v54 = vmul.f32 %v7803_v31, %v2501_v56 }
 0x231   : > { %v2505_v8 = vpop.f32.mrb[94].mxu0  ;;  %v2967_v14 = vmul.f32 %v7810_v11, %v2726_v49 }
 0x232   : > { %v3028_v47 = vadd.f32 %v7602_v38, %v2935_v54  ;;  %v2506_v2 = vadd.f32 %v2505_v8, %v1865_v7  ;;  %v2730_v45 = vpop.f32.mrb[94].mxu1  ;;  %v2507_v62 = vpop.f32.mrb[95].mxu0  ;;  %v3087_v34 = vpack.c.bf16 %v3026_v35, %v3023_v40  ;;  %v8773_v54 = vld [vmem:[#allocation64_spill] sm:$0xff] }
 0x233   : > { %v2731_v15 = vadd.f32 %v2730_v45, %v1897_v29  ;;  %v2732_v3 = vpop.f32.mrb[95].mxu1  ;;  %v1868_v20 = vmul.f32 %v7785_v57, %v8773_v54 }
 0x234   : > { %v3029_v63 = vadd.f32 %v3028_v47, %v2967_v14  ;;  %v2936_v24 = vmul.f32 %v7803_v31, %v2506_v2  ;;  %5258 = vst [vmem:[%s6405_s15 + $0x30] sm:$0xff] %v3087_v34   ;;  %5359 = vmatprep.mubr.bf16.mxu0 %v3087_v34  ;;  %v8774_v3 = vld [vmem:[#allocation63_spill] sm:$0xff] }
 0x235   : > { %v2510_v38 = vpop.f32.mrb[96].mxu0  ;;  %v2968_v30 = vmul.f32 %v7810_v11, %v2731_v15 }
 0x236   : > { %v3031_v21 = vadd.f32 %v7614_v42, %v2936_v24  ;;  %v2511_v13 = vadd.f32 %v2510_v38, %v1866_v17  ;;  %v2735_v40 = vpop.f32.mrb[96].mxu1  ;;  %v2512_v61 = vpop.f32.mrb[97].mxu0  ;;  %v1869_v17 = vmul.f32 %v7785_v57, %v8774_v3 }
 0x237   : > { %v2736_v1 = vadd.f32 %v2735_v40, %v1898_v59  ;;  %v2737_v5 = vpop.f32.mrb[97].mxu1 }
 0x238   : > { %v3032_v44 = vadd.f32 %v3031_v21, %v2968_v30  ;;  %v2937_v46 = vmul.f32 %v7803_v31, %v2511_v13  ;;  %v8775_v5 = vld [vmem:[#allocation65_spill] sm:$0xff] }
 0x239   : > { %v2515_v56 = vpop.f32.mrb[98].mxu0  ;;  %v2969_v33 = vmul.f32 %v7810_v11, %v2736_v1  ;;  %v1870_v12 = vmul.f32 %v7785_v57, %v8775_v5 }
 0x23a   : > { %v3034_v42 = vadd.f32 %v7628_v60, %v2937_v46  ;;  %v2516_v43 = vadd.f32 %v2515_v56, %v1867_v18  ;;  %v2740_v49 = vpop.f32.mrb[98].mxu1  ;;  %v2517_v53 = vpop.f32.mrb[99].mxu0  ;;  %v3088_v58 = vpack.c.bf16 %v3032_v44, %v3029_v63 }
 0x23b   : > { %v2741_v7 = vadd.f32 %v2740_v49, %v1899_v50  ;;  %v2742_v35 = vpop.f32.mrb[99].mxu1  ;;  %v1871_v53 = vmul.f32 %v7785_v57, %v7571_v10  ;;  %v1872_v10 = vmul.f32 %v7785_v57, %v7576_v55 }
 0x23c   : > { %v3035_v29 = vadd.f32 %v3034_v42, %v2969_v33  ;;  %v2938_v8 = vmul.f32 %v7803_v31, %v2516_v43  ;;  %5259 = vst [vmem:[%s6405_s15 + $0x38] sm:$0xff] %v3088_v58   ;;  %5360 = vmatmul.mubr.bf16.gmra.mrb[140].mxu0 %v3088_v58 }
 0x23d   : > { %v2520_v60 = vpop.f32.mrb[100].mxu0  ;;  %v2970_v14 = vmul.f32 %v7810_v11, %v2741_v7 }
 0x23e   : > { %v3037_v47 = vadd.f32 %v7638_v4, %v2938_v8  ;;  %v2521_v2 = vadd.f32 %v2520_v60, %v1868_v20  ;;  %v2745_v45 = vpop.f32.mrb[100].mxu1  ;;  %v2522_v62 = vpop.f32.mrb[101].mxu0 }
 0x23f   : > { %v2746_v34 = vadd.f32 %v2745_v45, %v1900_v36  ;;  %v2747_v15 = vpop.f32.mrb[101].mxu1 }
 0x240   : > { %v3038_v63 = vadd.f32 %v3037_v47, %v2970_v14  ;;  %v2939_v24 = vmul.f32 %v7803_v31, %v2521_v2 }
 0x241   : > { %v2525_v59 = vpop.f32.mrb[102].mxu0  ;;  %v2971_v38 = vmul.f32 %v7810_v11, %v2746_v34 }
 0x242   : > { %v3040_v4 = vadd.f32 %v7654_v39, %v2939_v24  ;;  %v2526_v21 = vadd.f32 %v2525_v59, %v1869_v17  ;;  %v2750_v30 = vpop.f32.mrb[102].mxu1  ;;  %v2527_v13 = vpop.f32.mrb[103].mxu0  ;;  %v3089_v40 = vpack.c.bf16 %v3038_v63, %v3035_v29  ;;  %v8776_v24 = vld [vmem:[#allocation66_spill] sm:$0xff] }
 0x243   : > { %v2751_v61 = vadd.f32 %v2750_v30, %v1901_v25  ;;  %v2752_v1 = vpop.f32.mrb[103].mxu1  ;;  %v1873_v55 = vmul.f32 %v7785_v57, %v8776_v24  ;;  %v8781_v24 = vld [vmem:[#allocation69_spill] sm:$0xff] }
 0x244   : > { %v3041_v18 = vadd.f32 %v3040_v4, %v2971_v38  ;;  %v2940_v44 = vmul.f32 %v7803_v31, %v2526_v21  ;;  %5260 = vst [vmem:[%s6405_s15 + $0x40] sm:$0xff] %v3089_v40   ;;  %5363 = vmatprep.mubr.bf16.mxu0 %v3089_v40  ;;  %v8777_v4 = vld [vmem:[#allocation67_spill] sm:$0xff] }
 0x245   : > { %v2530_v39 = vpop.f32.mrb[104].mxu0  ;;  %v2972_v50 = vmul.f32 %v7810_v11, %v2751_v61  ;;  %v1905_v48 = vmul.f32 %v7788_v26, %v8777_v4  ;;  %v8782_v4 = vld [vmem:[#allocation71_spill] sm:$0xff] }
 0x246   : > { %v3043_v46 = vadd.f32 %v7664_v32, %v2940_v44  ;;  %v2531_v56 = vadd.f32 %v2530_v39, %v1870_v12  ;;  %v2755_v42 = vpop.f32.mrb[104].mxu1  ;;  %v2532_v33 = vpop.f32.mrb[105].mxu0  ;;  %v1874_v12 = vmul.f32 %v7785_v57, %v7673_v0  ;;  %v1875_v0 = vmul.f32 %v7785_v57, %v7685_v37 }
 0x247   : > { %v2756_v43 = vadd.f32 %v2755_v42, %v1902_v28  ;;  %v2757_v49 = vpop.f32.mrb[105].mxu1  ;;  %v1906_v28 = vmul.f32 %v7788_v26, %v7711_v51  ;;  %v1907_v51 = vmul.f32 %v7788_v26, %v7723_v9  ;;  %v8779_v9 = vld [vmem:[#allocation70_spill] sm:$0xff] }
 0x248   : > { %v3044_v58 = vadd.f32 %v3043_v46, %v2972_v50  ;;  %v2941_v7 = vmul.f32 %v7803_v31, %v2531_v56 }
 0x249   : > { %v2535_v35 = vpop.f32.mrb[106].mxu0  ;;  %v2973_v54 = vmul.f32 %v7810_v11, %v2756_v43 }
 0x24a   : > { %v3046_v32 = vadd.f32 %v7678_v22, %v2941_v7  ;;  %v2536_v20 = vadd.f32 %v2535_v35, %v1871_v53  ;;  %v2760_v29 = vpop.f32.mrb[106].mxu1  ;;  %v2537_v8 = vpop.f32.mrb[107].mxu0  ;;  %v3090_v36 = vpack.c.bf16 %v3044_v58, %v3041_v18 }
 0x24b   : > { %v2761_v60 = vadd.f32 %v2760_v29, %v1903_v19  ;;  %v2762_v47 = vpop.f32.mrb[107].mxu1  ;;  %v1594_v7 = vpop.permute.xlu1 %1593 }
 0x24c   : > { %v3047_v14 = vadd.f32 %v3046_v32, %v2973_v54  ;;  %v2942_v2 = vmul.f32 %v7803_v31, %v2536_v20  ;;  %5261 = vst [vmem:[%s6405_s15 + $0x48] sm:$0xff] %v3090_v36   ;;  %5364 = vmatmul.mubr.bf16.gmra.mrb[144].mxu0 %v3090_v36 }
 0x24d   : > { %v2540_v22 = vpop.f32.mrb[108].mxu0  ;;  %v2974_v62 = vmul.f32 %v7810_v11, %v2761_v60  ;;  %v8778_v60 = vld [vmem:[#allocation68_spill] sm:$0xff] }
 0x24e   : > { %v3049_v45 = vadd.f32 %v7690_v41, %v2942_v2  ;;  %v2541_v34 = vadd.f32 %v2540_v22, %v1872_v10  ;;  %v2765_v15 = vpop.f32.mrb[108].mxu1  ;;  %v2542_v3 = vpop.f32.mrb[109].mxu0  ;;  %v1876_v47 = vmul.f32 %v7785_v57, %v8778_v60 }
 0x24f   : > { %v2766_v17 = vadd.f32 %v2765_v15, %v1904_v23  ;;  %v2767_v63 = vpop.f32.mrb[109].mxu1  ;;  %v8780_v23 = vld [vmem:[#allocation72_spill] sm:$0xff]  ;;  %v1604_v3 = vpop.permute.xlu1 %1603 }
 0x250   : > { %v3050_v25 = vadd.f32 %v3049_v45, %v2974_v62  ;;  %v2943_v59 = vmul.f32 %v7803_v31, %v2541_v34 }
 0x251   : > { %v2545_v38 = vpop.f32.mrb[110].mxu0  ;;  %v2975_v21 = vmul.f32 %v7810_v11, %v2766_v17 }
 0x252   : > { %v3052_v41 = vadd.f32 %v7704_v27, %v2943_v59  ;;  %v2546_v30 = vadd.f32 %v2545_v38, %v1873_v55  ;;  %v2770_v13 = vpop.f32.mrb[110].mxu1  ;;  %v2547_v40 = vpop.f32.mrb[111].mxu0  ;;  %v3091_v61 = vpack.c.bf16 %v3050_v25, %v3047_v14  ;;  %v1877_v55 = vmul.f32 %v7785_v57, %v8781_v24 }
 0x253   : > { %v2771_v1 = vadd.f32 %v2770_v13, %v1905_v48  ;;  %v2772_v5 = vpop.f32.mrb[111].mxu1  ;;  %v1589_v27 = vpop.permute.xlu0 %1588  ;;  %v1909_v48 = vmul.f32 %v7788_v26, %v8782_v4 }
 0x254   : > { %v3053_v18 = vadd.f32 %v3052_v41, %v2975_v21  ;;  %v2944_v44 = vmul.f32 %v7803_v31, %v2546_v30  ;;  %5262 = vst [vmem:[%s6405_s15 + $0x50] sm:$0xff] %v3091_v61   ;;  %5367 = vmatprep.mubr.bf16.mxu0 %v3091_v61  ;;  %v8783_v21 = vld [vmem:[#allocation73_spill] sm:$0xff] }
 0x255   : > { %v2550_v39 = vpop.f32.mrb[112].mxu0  ;;  %v2976_v50 = vmul.f32 %v7810_v11, %v2771_v1 }
 0x256   : > { %v3055_v46 = vadd.f32 %v7714_v16, %v2944_v44  ;;  %v2551_v56 = vadd.f32 %v2550_v39, %v1874_v12  ;;  %v2775_v42 = vpop.f32.mrb[112].mxu1  ;;  %v2552_v33 = vpop.f32.mrb[113].mxu0  ;;  %v1878_v44 = vmul.f32 %v7785_v57, %v1589_v27  ;;  %v1879_v27 = vmul.f32 %v7785_v57, %v1594_v7 }
 0x257   : > { %v2776_v43 = vadd.f32 %v2775_v42, %v1906_v28  ;;  %v2777_v49 = vpop.f32.mrb[113].mxu1  ;;  %v1599_v8 = vpop.permute.xlu0 %1598  ;;  %v8784_v42 = vld [vmem:[#allocation25_spill] sm:$0xff] }
 0x258   : > { %v3056_v53 = vadd.f32 %v3055_v46, %v2976_v50  ;;  %v2945_v58 = vmul.f32 %v7803_v31, %v2551_v56  ;;  %v1754_v46 = vpop.permute.xlu1 %1753  ;;  %v1880_v7 = vmul.f32 %v7785_v57, %v1599_v8  ;;  %v1881_v8 = vmul.f32 %v7785_v57, %v1604_v3 }
 0x259   : > { %v2555_v19 = vpop.f32.mrb[114].mxu0  ;;  %v2977_v35 = vmul.f32 %v7810_v11, %v2776_v43 }
 0x25a   : > { %v3058_v16 = vadd.f32 %v7730_v6, %v2945_v58  ;;  %v2556_v32 = vadd.f32 %v2555_v19, %v1875_v0  ;;  %v2780_v54 = vpop.f32.mrb[114].mxu1  ;;  %v2557_v20 = vpop.f32.mrb[115].mxu0  ;;  %v3092_v29 = vpack.c.bf16 %v3056_v53, %v3053_v18  ;;  %v1908_v6 = vmul.f32 %v7788_v26, %v8779_v9 }
 0x25b   : > { %v2781_v36 = vadd.f32 %v2780_v54, %v1907_v51  ;;  %v2782_v37 = vpop.f32.mrb[115].mxu1  ;;  %v1749_v38 = vpop.permute.xlu0 %1748  ;;  %v8785_v20 = vld [vmem:[#allocation24_spill] sm:$0xff] }
 0x25c   : > { %v3059_v10 = vadd.f32 %v3058_v16, %v2977_v35  ;;  %v2946_v14 = vmul.f32 %v7803_v31, %v2556_v32  ;;  %5263 = vst [vmem:[%s6405_s15 + $0x58] sm:$0xff] %v3092_v29   ;;  %5368 = vmatmul.mubr.bf16.gmra.mrb[148].mxu0 %v3092_v29  ;;  %v1910_v50 = vmul.f32 %v7788_v26, %v1749_v38  ;;  %v8786_v38 = vld [vmem:[#allocation22_spill] sm:$0xff] }
 0x25d   : > { %v2560_v2 = vpop.f32.mrb[116].mxu0  ;;  %v2978_v45 = vmul.f32 %v7810_v11, %v2781_v36  ;;  %v1911_v35 = vmul.f32 %v7788_v26, %v1754_v46 }
 0x25e   : > { %v3061_v22 = vadd.f32 %v8780_v23, %v2946_v14  ;;  %v2561_v62 = vadd.f32 %v2560_v2, %v1876_v47  ;;  %v2785_v34 = vpop.f32.mrb[116].mxu1  ;;  %v2562_v15 = vpop.f32.mrb[117].mxu0 }
 0x25f   : > { %v2786_v17 = vadd.f32 %v2785_v34, %v1908_v6  ;;  %v2787_v63 = vpop.f32.mrb[117].mxu1  ;;  %v1759_v32 = vpop.permute.xlu0 %1758 }
 0x260   : > { %v3062_v25 = vadd.f32 %v3061_v22, %v2978_v45  ;;  %v2947_v59 = vmul.f32 %v7803_v31, %v2561_v62  ;;  %v1764_v23 = vpop.permute.xlu1 %1763  ;;  %v1912_v22 = vmul.f32 %v7788_v26, %v1759_v32 }
 0x261   : > { %v2565_v41 = vpop.f32.mrb[118].mxu0  ;;  %v2979_v13 = vmul.f32 %v7810_v11, %v2786_v17  ;;  %v1913_v4 = vmul.f32 %v7788_v26, %v1764_v23 }
 0x262   : > { %v3064_v30 = vadd.f32 %v8783_v21, %v2947_v59  ;;  %v2566_v40 = vadd.f32 %v2565_v41, %v1877_v55  ;;  %v2790_v61 = vpop.f32.mrb[118].mxu1  ;;  %v2567_v1 = vpop.f32.mrb[119].mxu0  ;;  %v3093_v5 = vpack.c.bf16 %v3062_v25, %v3059_v10 }
 0x263   : > { %v2791_v12 = vadd.f32 %v2790_v61, %v1909_v48  ;;  %v2792_v18 = vpop.f32.mrb[119].mxu1  ;;  %v8787_v61 = vld [vmem:[#allocation52_spill] sm:$0xff] }
 0x264   : > { %v3065_v28 = vadd.f32 %v3064_v30, %v2979_v13  ;;  %v2948_v39 = vmul.f32 %v7803_v31, %v2566_v40  ;;  %5264 = vst [vmem:[%s6405_s15 + $0x60] sm:$0xff] %v3093_v5   ;;  %5371 = vmatprep.mubr.bf16.mxu0 %v3093_v5  ;;  %v2818_v1 = vrot.slane %v8787_v61, 7 }
 0x265   : > { %v2570_v56 = vpop.f32.mrb[120].mxu0  ;;  %v2980_v43 = vmul.f32 %v7810_v11, %v2791_v12 }
 0x266   : > { %v3067_v33 = vadd.f32 %v8784_v42, %v2948_v39  ;;  %v2571_v49 = vadd.f32 %v2570_v56, %v1878_v44  ;;  %v2795_v0 = vpop.f32.mrb[120].mxu1  ;;  %v2572_v53 = vpop.f32.mrb[121].mxu0 }
 0x267   : > { %v2796_v58 = vadd.f32 %v2795_v0, %v1910_v50  ;;  %v2797_v51 = vpop.f32.mrb[121].mxu1 }
 0x268   : > { %v3068_v19 = vadd.f32 %v3067_v33, %v2980_v43  ;;  %v2949_v16 = vmul.f32 %v7803_v31, %v2571_v49 }
 0x269   : > { %v2575_v54 = vpop.f32.mrb[122].mxu0  ;;  %v2981_v36 = vmul.f32 %v7810_v11, %v2796_v58 }
 0x26a   : > { %v3070_v29 = vadd.f32 %v8785_v20, %v2949_v16  ;;  %v2576_v37 = vadd.f32 %v2575_v54, %v1879_v27  ;;  %v2800_v60 = vpop.f32.mrb[122].mxu1  ;;  %v2577_v47 = vpop.f32.mrb[123].mxu0  ;;  %v3094_v10 = vpack.c.bf16 %v3068_v19, %v3065_v28  ;;  %v8788_v28 = vld [vmem:[#allocation27_spill] sm:$0xff] }
 0x26b   : > { %v2801_v14 = vadd.f32 %v2800_v60, %v1911_v35  ;;  %v2802_v9 = vpop.f32.mrb[123].mxu1 }
 0x26c   : > { %v3071_v6 = vadd.f32 %v3070_v29, %v2981_v36  ;;  %v2950_v2 = vmul.f32 %v7803_v31, %v2576_v37  ;;  %5265 = vst [vmem:[%s6405_s15 + $0x68] sm:$0xff] %v3094_v10   ;;  %5372 = vmatmul.mubr.bf16.gmra.mrb[152].mxu0 %v3094_v10 }
 0x26d   : > { %v2580_v45 = vpop.f32.mrb[124].mxu0  ;;  %v2982_v34 = vmul.f32 %v7810_v11, %v2801_v14 }
 0x26e   : > { %v3073_v62 = vadd.f32 %v7780_v52, %v2950_v2  ;;  %v2581_v15 = vadd.f32 %v2580_v45, %v1880_v7  ;;  %v2805_v17 = vpop.f32.mrb[124].mxu1  ;;  %v2582_v63 = vpop.f32.mrb[125].mxu0 }
 0x26f   : > { %v2806_v24 = vadd.f32 %v2805_v17, %v1912_v22  ;;  %v2807_v55 = vpop.f32.mrb[125].mxu1 }
 0x270   : > { %v3074_v25 = vadd.f32 %v3073_v62, %v2982_v34  ;;  %v2951_v59 = vmul.f32 %v7803_v31, %v2581_v15 }
 0x271   : > { %v2585_v48 = vpop.f32.mrb[126].mxu0  ;;  %v2983_v52 = vmul.f32 %v7810_v11, %v2806_v24 }
 0x272   : > { %v3076_v41 = vadd.f32 %v8786_v38, %v2951_v59  ;;  %v2586_v21 = vadd.f32 %v2585_v48, %v1881_v8  ;;  %v2810_v30 = vpop.f32.mrb[126].mxu1  ;;  %v2587_v13 = vpop.f32.mrb[127].mxu0  ;;  %v3095_v40 = vpack.c.bf16 %v3074_v25, %v3071_v6 }
 0x273   : > { %v2811_v5 = vadd.f32 %v2810_v30, %v1913_v4  ;;  %v2812_v57 = vpop.f32.mrb[127].mxu1 }
 0x274   : > { %v3077_v3 = vadd.f32 %v3076_v41, %v2983_v52  ;;  %v2819_v12 = vrot.slane %v2586_v21, 6  ;;  %v2952_v26 = vmul.f32 %v7803_v31, %v2586_v21  ;;  %5266 = vst [vmem:[%s6405_s15 + $0x70] sm:$0xff] %v3095_v40   ;;  %5375 = vmatprep.mubr.bf16.mxu0 %v3095_v40  ;;  %v8044_v31 = vld [vmem:[%s8630_s10] ss:$0 sm:$0xff] }
 0x275   : > { %v2822_v18 = vrot.slane %v2811_v5, 5  ;;  %v2984_v46 = vmul.f32 %v7810_v11, %v2811_v5 }
 0x276   : > { %v2821_v44 = vsel %vm2820_vm0, %v2819_v12, %v2818_v1  ;;  %v3079_v39 = vadd.f32 %v8788_v28, %v2952_v26 }
 0x277   : > { %v2824_v50 = vsel %vm2823_vm1, %v2822_v18, %v2821_v44 }
 0x278   : > { %2828 = vst [vmem:[#allocation2 + $0x1] sm:$0x7] %v2824_v50  ;;  %v3080_v56 = vadd.f32 %v3079_v39, %v2984_v46 }
 0x27a   : > { %v3096_v42 = vpack.c.bf16 %v3080_v56, %v3077_v3 }
 0x27c   : > { %5267 = vst [vmem:[%s6405_s15 + $0x78] sm:$0xff] %v3096_v42   ;;  %5376 = vmatmul.mubr.bf16.gmra.mrb[156].mxu0 %v3096_v42 }
 0x27d   : > { %v5397_v33 = vpop.f32.mrb[128].mxu1 }
 0x27e   : > { %v4053_v43 = vpop.f32.mrb[129].mxu1  ;;  %v8047_v0 = vadd.f32 %v5397_v33, %v8044_v31 }
 0x27f   : > { %v5398_v49 = vpop.f32.mrb[130].mxu1  ;;  %v8050_v53 = vadd.f32 %v8044_v31, %v4053_v43 }
 0x280   : > { %v8053_v11 = vadd.f32 %v5398_v49, %v8044_v31  ;;  %v4056_v58 = vpop.f32.mrb[131].mxu1  ;;  %v4925_v51 = vmul.f32 -1.442695, %v8047_v0 }
 0x281   : > { %v8057_v27 = vadd.f32 %v8044_v31, %v4056_v58  ;;  %v4923_v19 = vmul.f32 -1.442695, %v8050_v53 }
 0x282   : > { %v4926_v16 = vmul.f32 -1.442695, %v8053_v11  ;;  %5732 = vpow2.f32 %v4925_v51 }
 0x283   : > { %v4924_v35 = vmul.f32 -1.442695, %v8057_v27  ;;  %5734 = vpow2.f32 %v4923_v19 }
 0x284   : > { %5736 = vpow2.f32 %v4926_v16 }
 0x285   : > { %v5401_v32 = vpop.f32.mrb[132].mxu1  ;;  %5738 = vpow2.f32 %v4924_v35 }
 0x286   : > { %v4069_v54 = vpop.f32.mrb[133].mxu1  ;;  %v8063_v36 = vadd.f32 %v5401_v32, %v8044_v31 }
 0x287   : > { %v5402_v20 = vpop.f32.mrb[134].mxu1  ;;  %v8066_v37 = vadd.f32 %v8044_v31, %v4069_v54 }
 0x288   : > { %v4072_v29 = vpop.f32.mrb[135].mxu1  ;;  %v8069_v60 = vadd.f32 %v5402_v20, %v8044_v31  ;;  %v4929_v47 = vmul.f32 -1.442695, %v8063_v36 }
 0x289   : > { %v4927_v10 = vmul.f32 -1.442695, %v8066_v37  ;;  %v8075_v9 = vadd.f32 %v8044_v31, %v4072_v29 }
 0x28a   : > { %v4930_v14 = vmul.f32 -1.442695, %v8069_v60  ;;  %5740 = vpow2.f32 %v4929_v47 }
 0x28b   : > { %5742 = vpow2.f32 %v4927_v10  ;;  %v4928_v63 = vmul.f32 -1.442695, %v8075_v9 }
 0x28c   : > { %v5733_v7 = vpop.eup %5732  ;;  %5744 = vpow2.f32 %v4930_v14 }
 0x28d   : > { %v5405_v6 = vpop.f32.mrb[136].mxu1  ;;  %v5735_v2 = vpop.eup %5734  ;;  %v4278_v23 = vadd.f32 1.0, %v5733_v7 }
 0x28e   : > { %v4085_v22 = vpop.f32.mrb[137].mxu1  ;;  %v5737_v45 = vpop.eup %5736  ;;  %v4276_v62 = vadd.f32 1.0, %v5735_v2  ;;  %v8079_v8 = vadd.f32 %v5405_v6, %v8044_v31 }
 0x28f   : > { %v5406_v34 = vpop.f32.mrb[138].mxu1  ;;  %v5739_v15 = vpop.eup %5738  ;;  %5746 = vrcp.f32 %v4278_v23  ;;  %v4279_v17 = vadd.f32 1.0, %v5737_v45  ;;  %v8082_v25 = vadd.f32 %v8044_v31, %v4085_v22 }
 0x290   : > { %v4088_v24 = vpop.f32.mrb[139].mxu1  ;;  %5748 = vrcp.f32 %v4276_v62  ;;  %v4277_v55 = vadd.f32 1.0, %v5739_v15  ;;  %v8085_v59 = vadd.f32 %v5406_v34, %v8044_v31  ;;  %v4933_v48 = vmul.f32 -1.442695, %v8079_v8 }
 0x291   : > { %5750 = vrcp.f32 %v4279_v17  ;;  %v8088_v4 = vadd.f32 %v8044_v31, %v4088_v24  ;;  %v4931_v38 = vmul.f32 -1.442695, %v8082_v25 }
 0x292   : > { %5752 = vrcp.f32 %v4277_v55  ;;  %v4934_v41 = vmul.f32 -1.442695, %v8085_v59 }
 0x293   : > { %5754 = vpow2.f32 %v4928_v63  ;;  %v4932_v52 = vmul.f32 -1.442695, %v8088_v4 }
 0x294   : > { %5756 = vpow2.f32 %v4933_v48  ;;  %v5741_v13 = vpop.eup %5740 }
 0x295   : > { %v5409_v21 = vpop.f32.mrb[140].mxu1  ;;  %5758 = vpow2.f32 %v4931_v38  ;;  %v5743_v61 = vpop.eup %5742  ;;  %v4282_v1 = vadd.f32 1.0, %v5741_v13 }
 0x296   : > { %v4101_v30 = vpop.f32.mrb[141].mxu1  ;;  %5760 = vpow2.f32 %v4934_v41  ;;  %v5745_v57 = vpop.eup %5744  ;;  %v4280_v3 = vadd.f32 1.0, %v5743_v61  ;;  %v8095_v12 = vadd.f32 %v5409_v21, %v8044_v31 }
 0x297   : > { %v5410_v40 = vpop.f32.mrb[142].mxu1  ;;  %5762 = vpow2.f32 %v4932_v52  ;;  %v8098_v26 = vadd.f32 %v8044_v31, %v4101_v30  ;;  %v4283_v28 = vadd.f32 1.0, %v5745_v57 }
 0x298   : > { %v4104_v5 = vpop.f32.mrb[143].mxu1  ;;  %v8101_v18 = vadd.f32 %v5410_v40, %v8044_v31  ;;  %5764 = vrcp.f32 %v4282_v1  ;;  %v4937_v56 = vmul.f32 -1.442695, %v8095_v12 }
 0x299   : > { %v5747_v44 = vpop.eup %5746  ;;  %v8104_v39 = vadd.f32 %v8044_v31, %v4104_v5  ;;  %5766 = vrcp.f32 %v4280_v3  ;;  %v4935_v42 = vmul.f32 -1.442695, %v8098_v26 }
 0x29a   : > { %v5749_v46 = vpop.eup %5748  ;;  %v4374_v50 = vmul.f32 %v5747_v44, %v8047_v0  ;;  %5768 = vrcp.f32 %v4283_v28  ;;  %v4938_v49 = vmul.f32 -1.442695, %v8101_v18 }
 0x29b   : > { %v5751_v33 = vpop.eup %5750  ;;  %v4372_v43 = vmul.f32 %v5749_v46, %v8050_v53  ;;  %v4936_v58 = vmul.f32 -1.442695, %v8104_v39  ;;  %5770 = vpow2.f32 %v4937_v56 }
 0x29c   : > { %v5753_v51 = vpop.eup %5752  ;;  %v4375_v19 = vmul.f32 %v5751_v33, %v8053_v11  ;;  %5772 = vpow2.f32 %v4935_v42 }
 0x29d   : > { %v5413_v16 = vpop.f32.mrb[144].mxu1  ;;  %v5755_v0 = vpop.eup %5754  ;;  %v4373_v35 = vmul.f32 %v5753_v51, %v8057_v27  ;;  %5774 = vpow2.f32 %v4938_v49 }
 0x29e   : > { %v4117_v32 = vpop.f32.mrb[145].mxu1  ;;  %v5757_v54 = vpop.eup %5756  ;;  %v5181_v20 = vpack.c.bf16 %v4375_v19, %v4374_v50  ;;  %v4281_v53 = vadd.f32 1.0, %v5755_v0  ;;  %5776 = vpow2.f32 %v4936_v58  ;;  %v8116_v6 = vadd.f32 %v5413_v16, %v8044_v31 }
 0x29f   : > { %v5414_v29 = vpop.f32.mrb[146].mxu1  ;;  %v5759_v47 = vpop.eup %5758  ;;  %v5176_v10 = vpack.c.bf16 %v4373_v35, %v4372_v43  ;;  %v4286_v14 = vadd.f32 1.0, %v5757_v54  ;;  %v8119_v27 = vadd.f32 %v8044_v31, %v4117_v32 }
 0x2a0   : > { %v5761_v7 = vpop.eup %5760  ;;  %5268 = vst [vmem:[%s6407_s8 + $0x8] sm:$0xff] %v5181_v20   ;;  %5778 = vrcp.f32 %v4281_v53  ;;  %v4284_v11 = vadd.f32 1.0, %v5759_v47  ;;  %v4120_v2 = vpop.f32.mrb[147].mxu1  ;;  %v8123_v45 = vadd.f32 %v5414_v29, %v8044_v31  ;;  %v4941_v15 = vmul.f32 -1.442695, %v8116_v6 }
 0x2a1   : > { %v5763_v23 = vpop.eup %5762  ;;  %5177 = vst [vmem:[%s6407_s8] sm:$0xff] %v5176_v10   ;;  %5780 = vrcp.f32 %v4286_v14  ;;  %v4287_v22 = vadd.f32 1.0, %v5761_v7  ;;  %v8126_v62 = vadd.f32 %v8044_v31, %v4120_v2  ;;  %v4939_v17 = vmul.f32 -1.442695, %v8119_v27 }
 0x2a2   : > { %5782 = vrcp.f32 %v4284_v11  ;;  %v4285_v34 = vadd.f32 1.0, %v5763_v23  ;;  %v5765_v63 = vpop.eup %5764  ;;  %v4942_v24 = vmul.f32 -1.442695, %v8123_v45 }
 0x2a3   : > { %5784 = vrcp.f32 %v4287_v22  ;;  %v5767_v55 = vpop.eup %5766  ;;  %v4378_v48 = vmul.f32 %v5765_v63, %v8063_v36  ;;  %v4940_v38 = vmul.f32 -1.442695, %v8126_v62 }
 0x2a4   : > { %5786 = vrcp.f32 %v4285_v34  ;;  %v5769_v41 = vpop.eup %5768  ;;  %v4376_v57 = vmul.f32 %v5767_v55, %v8066_v37 }
 0x2a5   : > { %5788 = vpow2.f32 %v4941_v15  ;;  %v5417_v52 = vpop.f32.mrb[148].mxu1  ;;  %v5771_v21 = vpop.eup %5770  ;;  %v4379_v30 = vmul.f32 %v5769_v41, %v8069_v60 }
 0x2a6   : > { %5790 = vpow2.f32 %v4939_v17  ;;  %v4133_v13 = vpop.f32.mrb[149].mxu1  ;;  %v5773_v40 = vpop.eup %5772  ;;  %v4290_v61 = vadd.f32 1.0, %v5771_v21  ;;  %v8136_v50 = vadd.f32 %v5417_v52, %v8044_v31 }
 0x2a7   : > { %5792 = vpow2.f32 %v4942_v24  ;;  %v5418_v1 = vpop.f32.mrb[150].mxu1  ;;  %v5775_v5 = vpop.eup %5774  ;;  %v5191_v36 = vpack.c.bf16 %v4379_v30, %v4378_v48  ;;  %v4288_v3 = vadd.f32 1.0, %v5773_v40  ;;  %v8139_v60 = vadd.f32 %v8044_v31, %v4133_v13 }
 0x2a8   : > { %5794 = vpow2.f32 %v4940_v38  ;;  %v4136_v44 = vpop.f32.mrb[151].mxu1  ;;  %v5777_v28 = vpop.eup %5776  ;;  %v4291_v46 = vadd.f32 1.0, %v5775_v5  ;;  %v8143_v33 = vadd.f32 %v5418_v1, %v8044_v31  ;;  %v4945_v58 = vmul.f32 -1.442695, %v8136_v50 }
 0x2a9   : > { %5796 = vrcp.f32 %v4290_v61  ;;  %5270 = vst [vmem:[%s6407_s8 + $0x18] sm:$0xff] %v5191_v36   ;;  %v4289_v42 = vadd.f32 1.0, %v5777_v28  ;;  %v8146_v37 = vadd.f32 %v8044_v31, %v4136_v44  ;;  %v4943_v51 = vmul.f32 -1.442695, %v8139_v60 }
 0x2aa   : > { %v5779_v56 = vpop.eup %5778  ;;  %5798 = vrcp.f32 %v4288_v3  ;;  %v4946_v0 = vmul.f32 -1.442695, %v8143_v33 }
 0x2ab   : > { %v5781_v43 = vpop.eup %5780  ;;  %v4377_v49 = vmul.f32 %v5779_v56, %v8075_v9  ;;  %5800 = vrcp.f32 %v4291_v46  ;;  %v4944_v35 = vmul.f32 -1.442695, %v8146_v37 }
 0x2ac   : > { %v5783_v19 = vpop.eup %5782  ;;  %v4382_v16 = vmul.f32 %v5781_v43, %v8079_v8  ;;  %5802 = vrcp.f32 %v4289_v42 }
 0x2ad   : > { %v5785_v32 = vpop.eup %5784  ;;  %v5186_v54 = vpack.c.bf16 %v4377_v49, %v4376_v57  ;;  %v4380_v20 = vmul.f32 %v5783_v19, %v8082_v25  ;;  %5804 = vpow2.f32 %v4945_v58  ;;  %v5421_v9 = vpop.f32.mrb[152].mxu1 }
 0x2ae   : > { %v5787_v53 = vpop.eup %5786  ;;  %v4383_v29 = vmul.f32 %v5785_v32, %v8085_v59  ;;  %5806 = vpow2.f32 %v4943_v51  ;;  %v4149_v47 = vpop.f32.mrb[153].mxu1  ;;  %v8159_v59 = vadd.f32 %v5421_v9, %v8044_v31 }
 0x2af   : > { %v5789_v10 = vpop.eup %5788  ;;  %5269 = vst [vmem:[%s6407_s8 + $0x10] sm:$0xff] %v5186_v54   ;;  %v4381_v8 = vmul.f32 %v5787_v53, %v8088_v4  ;;  %5808 = vpow2.f32 %v4946_v0  ;;  %v5422_v14 = vpop.f32.mrb[154].mxu1  ;;  %v8162_v15 = vadd.f32 %v8044_v31, %v4149_v47 }
 0x2b0   : > { %v5791_v7 = vpop.eup %5790  ;;  %v5201_v11 = vpack.c.bf16 %v4383_v29, %v4382_v16  ;;  %v4294_v2 = vadd.f32 1.0, %v5789_v10  ;;  %5810 = vpow2.f32 %v4944_v35  ;;  %v4152_v25 = vpop.f32.mrb[155].mxu1  ;;  %v8166_v63 = vadd.f32 %v5422_v14, %v8044_v31 }
 0x2b1   : > { %v5793_v23 = vpop.eup %5792  ;;  %v5196_v22 = vpack.c.bf16 %v4381_v8, %v4380_v20  ;;  %v4292_v34 = vadd.f32 1.0, %v5791_v7  ;;  %v8169_v24 = vadd.f32 %v8044_v31, %v4152_v25  ;;  %v4949_v38 = vmul.f32 -1.442695, %v8159_v59 }
 0x2b2   : > { %v5795_v17 = vpop.eup %5794  ;;  %5272 = vst [vmem:[%s6407_s8 + $0x28] sm:$0xff] %v5201_v11   ;;  %5812 = vrcp.f32 %v4294_v2  ;;  %v4295_v4 = vadd.f32 1.0, %v5793_v23  ;;  %v4947_v41 = vmul.f32 -1.442695, %v8162_v15  ;;  %v4950_v30 = vmul.f32 -1.442695, %v8166_v63 }
 0x2b3   : > { %v5797_v55 = vpop.eup %5796  ;;  %5271 = vst [vmem:[%s6407_s8 + $0x20] sm:$0xff] %v5196_v22   ;;  %5814 = vrcp.f32 %v4292_v34  ;;  %v4293_v48 = vadd.f32 1.0, %v5795_v17  ;;  %v4948_v61 = vmul.f32 -1.442695, %v8169_v24 }
 0x2b4   : > { %v5799_v52 = vpop.eup %5798  ;;  %v4386_v21 = vmul.f32 %v5797_v55, %v8095_v12  ;;  %5816 = vrcp.f32 %v4295_v4 }
 0x2b5   : > { %v5801_v13 = vpop.eup %5800  ;;  %v4384_v40 = vmul.f32 %v5799_v52, %v8098_v26  ;;  %5818 = vrcp.f32 %v4293_v48  ;;  %v5425_v1 = vpop.f32.mrb[156].mxu1 }
 0x2b6   : > { %v5803_v5 = vpop.eup %5802  ;;  %v4387_v57 = vmul.f32 %v5801_v13, %v8101_v18  ;;  %5820 = vpow2.f32 %v4949_v38  ;;  %v4165_v36 = vpop.f32.mrb[157].mxu1  ;;  %v8181_v18 = vadd.f32 %v5425_v1, %v8044_v31 }
 0x2b7   : > { %v5805_v3 = vpop.eup %5804  ;;  %v4385_v44 = vmul.f32 %v5803_v5, %v8104_v39  ;;  %5822 = vpow2.f32 %v4947_v41  ;;  %v5426_v12 = vpop.f32.mrb[158].mxu1  ;;  %v8185_v39 = vadd.f32 %v8044_v31, %v4165_v36 }
 0x2b8   : > { %v5807_v28 = vpop.eup %5806  ;;  %v5211_v46 = vpack.c.bf16 %v4387_v57, %v4386_v21  ;;  %v4298_v56 = vadd.f32 1.0, %v5805_v3  ;;  %5824 = vpow2.f32 %v4950_v30  ;;  %v4168_v26 = vpop.f32.mrb[159].mxu1  ;;  %v8188_v19 = vadd.f32 %v5426_v12, %v8044_v31 }
 0x2b9   : > { %v5809_v42 = vpop.eup %5808  ;;  %v5206_v43 = vpack.c.bf16 %v4385_v44, %v4384_v40  ;;  %v4296_v49 = vadd.f32 1.0, %v5807_v28  ;;  %5826 = vpow2.f32 %v4948_v61  ;;  %v4953_v0 = vmul.f32 -1.442695, %v8181_v18 }
 0x2ba   : > { %v5811_v58 = vpop.eup %5810  ;;  %5274 = vst [vmem:[%s6407_s8 + $0x38] sm:$0xff] %v5211_v46   ;;  %5828 = vrcp.f32 %v4298_v56  ;;  %v4299_v51 = vadd.f32 1.0, %v5809_v42  ;;  %v8193_v35 = vadd.f32 %v8044_v31, %v4168_v26  ;;  %v4951_v54 = vmul.f32 -1.442695, %v8185_v39 }
 0x2bb   : > { %5273 = vst [vmem:[%s6407_s8 + $0x30] sm:$0xff] %v5206_v43   ;;  %5830 = vrcp.f32 %v4296_v49  ;;  %v4297_v16 = vadd.f32 1.0, %v5811_v58  ;;  %v4954_v20 = vmul.f32 -1.442695, %v8188_v19 }
 0x2bc   : > { %v5813_v32 = vpop.eup %5812  ;;  %5832 = vrcp.f32 %v4299_v51  ;;  %v4952_v29 = vmul.f32 -1.442695, %v8193_v35 }
 0x2bd   : > { %v5815_v9 = vpop.eup %5814  ;;  %v4390_v53 = vmul.f32 %v5813_v32, %v8116_v6  ;;  %5834 = vrcp.f32 %v4297_v16 }
 0x2be   : > { %v5817_v47 = vpop.eup %5816  ;;  %v4388_v10 = vmul.f32 %v5815_v9, %v8119_v27  ;;  %5836 = vpow2.f32 %v4953_v0 }
 0x2bf   : > { %v5819_v8 = vpop.eup %5818  ;;  %v4391_v31 = vmul.f32 %v5817_v47, %v8123_v45  ;;  %5838 = vpow2.f32 %v4951_v54 }
 0x2c0   : > { %v5821_v14 = vpop.eup %5820  ;;  %v4389_v7 = vmul.f32 %v5819_v8, %v8126_v62  ;;  %5840 = vpow2.f32 %v4954_v20 }
 0x2c1   : > { %v5823_v11 = vpop.eup %5822  ;;  %v5221_v2 = vpack.c.bf16 %v4391_v31, %v4390_v53  ;;  %v4302_v6 = vadd.f32 1.0, %v5821_v14  ;;  %5842 = vpow2.f32 %v4952_v29 }
 0x2c2   : > { %v5825_v25 = vpop.eup %5824  ;;  %v5216_v23 = vpack.c.bf16 %v4389_v7, %v4388_v10  ;;  %v4300_v22 = vadd.f32 1.0, %v5823_v11 }
 0x2c3   : > { %v5827_v34 = vpop.eup %5826  ;;  %5276 = vst [vmem:[%s6407_s8 + $0x48] sm:$0xff] %v5221_v2   ;;  %5844 = vrcp.f32 %v4302_v6  ;;  %v4303_v27 = vadd.f32 1.0, %v5825_v25 }
 0x2c4   : > { %v5829_v17 = vpop.eup %5828  ;;  %5275 = vst [vmem:[%s6407_s8 + $0x40] sm:$0xff] %v5216_v23   ;;  %5846 = vrcp.f32 %v4300_v22  ;;  %v4301_v45 = vadd.f32 1.0, %v5827_v34 }
 0x2c5   : > { %v5831_v4 = vpop.eup %5830  ;;  %v4394_v55 = vmul.f32 %v5829_v17, %v8136_v50  ;;  %5848 = vrcp.f32 %v4303_v27 }
 0x2c6   : > { %v5833_v62 = vpop.eup %5832  ;;  %v4392_v48 = vmul.f32 %v5831_v4, %v8139_v60  ;;  %5850 = vrcp.f32 %v4301_v45 }
 0x2c7   : > { %v5835_v38 = vpop.eup %5834  ;;  %v4395_v41 = vmul.f32 %v5833_v62, %v8143_v33 }
 0x2c8   : > { %v5837_v52 = vpop.eup %5836  ;;  %v4393_v21 = vmul.f32 %v5835_v38, %v8146_v37 }
 0x2c9   : > { %v5839_v30 = vpop.eup %5838  ;;  %v5231_v13 = vpack.c.bf16 %v4395_v41, %v4394_v55  ;;  %v4306_v40 = vadd.f32 1.0, %v5837_v52 }
 0x2ca   : > { %v5841_v61 = vpop.eup %5840  ;;  %v5226_v1 = vpack.c.bf16 %v4393_v21, %v4392_v48  ;;  %v4304_v5 = vadd.f32 1.0, %v5839_v30  ;;  %v8269_v21 = vld [vmem:[%s8627_s7 + $0x1] ss:$0 sm:$0xff] }
 0x2cb   : > { %v5843_v50 = vpop.eup %5842  ;;  %5278 = vst [vmem:[%s6407_s8 + $0x58] sm:$0xff] %v5231_v13   ;;  %5852 = vrcp.f32 %v4306_v40  ;;  %v4307_v57 = vadd.f32 1.0, %v5841_v61  ;;  %v8276_v40 = vld [vmem:[%s8789_s21 + $0x1] ss:$0 sm:$0xff] }
 0x2cc   : > { %5277 = vst [vmem:[%s6407_s8 + $0x50] sm:$0xff] %v5226_v1   ;;  %5854 = vrcp.f32 %v4304_v5  ;;  %v4305_v60 = vadd.f32 1.0, %v5843_v50 }
 0x2cd   : > { %v5845_v36 = vpop.eup %5844  ;;  %5856 = vrcp.f32 %v4307_v57 }
 0x2ce   : > { %v5847_v33 = vpop.eup %5846  ;;  %v4398_v37 = vmul.f32 %v5845_v36, %v8159_v59  ;;  %5858 = vrcp.f32 %v4305_v60 }
 0x2cf   : > { %v5849_v3 = vpop.eup %5848  ;;  %v4396_v44 = vmul.f32 %v5847_v33, %v8162_v15 }
 0x2d0   : > { %v5851_v12 = vpop.eup %5850  ;;  %v4399_v28 = vmul.f32 %v5849_v3, %v8166_v63  ;;  %v8222_v63 = vld [vmem:[%s8626_s6] ss:$0 sm:$0xff] }
 0x2d1   : > { %v4397_v46 = vmul.f32 %v5851_v12, %v8169_v24 }
 0x2d2   : > { %v5241_v56 = vpack.c.bf16 %v4399_v28, %v4398_v37 }
 0x2d3   : > { %v5236_v26 = vpack.c.bf16 %v4397_v46, %v4396_v44 }
 0x2d4   : > { %5280 = vst [vmem:[%s6407_s8 + $0x68] sm:$0xff] %v5241_v56  }
 0x2d5   : > { %v5853_v42 = vpop.eup %5852  ;;  %5279 = vst [vmem:[%s6407_s8 + $0x60] sm:$0xff] %v5236_v26  }
 0x2d6   : > { %v5855_v43 = vpop.eup %5854  ;;  %v4402_v49 = vmul.f32 %v5853_v42, %v8181_v18 }
 0x2d7   : > { %v5857_v59 = vpop.eup %5856  ;;  %v4400_v58 = vmul.f32 %v5855_v43, %v8185_v39 }
 0x2d8   : > { %v5859_v51 = vpop.eup %5858  ;;  %v4403_v15 = vmul.f32 %v5857_v59, %v8188_v19 }
 0x2d9   : > { %v4401_v24 = vmul.f32 %v5859_v51, %v8193_v35 }
 0x2da   : > { %v5251_v16 = vpack.c.bf16 %v4403_v15, %v4402_v49 }
 0x2db   : > { %v5246_v32 = vpack.c.bf16 %v4401_v24, %v4400_v58 }
 0x2dc   : > { %5282 = vst [vmem:[%s6407_s8 + $0x78] sm:$0xff] %v5251_v16  }
 0x2dd   : > { %5281 = vst [vmem:[%s6407_s8 + $0x70] sm:$0xff] %v5246_v32  }
 0x2df   : > { %v5349_v0 = vpop.f32.mrb[128].mxu0 }
 0x2e0   : > { %v3355_v54 = vadd.f32 %v5349_v0, %v8222_v63  ;;  %v3346_v20 = vpop.f32.mrb[129].mxu0 }
 0x2e1   : > { %v3347_v18 = vadd.f32 %v8222_v63, %v3346_v20  ;;  %v5350_v39 = vpop.f32.mrb[130].mxu0 }
 0x2e2   : > { %v4850_v9 = vmul.f32 -1.442695, %v3355_v54  ;;  %v8230_v19 = vadd.f32 %v5350_v39, %v8222_v63  ;;  %v3349_v53 = vpop.f32.mrb[131].mxu0 }
 0x2e3   : > { %v4848_v29 = vmul.f32 -1.442695, %v3347_v18  ;;  %v8233_v47 = vadd.f32 %v8222_v63, %v3349_v53 }
 0x2e4   : > { %5860 = vpow2.f32 %v4850_v9  ;;  %v4851_v35 = vmul.f32 -1.442695, %v8230_v19 }
 0x2e5   : > { %5862 = vpow2.f32 %v4848_v29  ;;  %v4849_v10 = vmul.f32 -1.442695, %v8233_v47 }
 0x2e6   : > { %5864 = vpow2.f32 %v4851_v35 }
 0x2e7   : > { %5866 = vpow2.f32 %v4849_v10 }
 0x2ee   : > { %v5861_v8 = vpop.eup %5860 }
 0x2ef   : > { %v5863_v31 = vpop.eup %5862  ;;  %v3571_v14 = vadd.f32 1.0, %v5861_v8  ;;  %v5353_v7 = vpop.f32.mrb[132].mxu0 }
 0x2f0   : > { %v5865_v11 = vpop.eup %5864  ;;  %v3569_v2 = vadd.f32 1.0, %v5863_v31  ;;  %v8238_v6 = vadd.f32 %v5353_v7, %v8222_v63  ;;  %v3362_v25 = vpop.f32.mrb[133].mxu0 }
 0x2f1   : > { %v5867_v23 = vpop.eup %5866  ;;  %5868 = vrcp.f32 %v3571_v14  ;;  %v3572_v22 = vadd.f32 1.0, %v5865_v11  ;;  %v8241_v34 = vadd.f32 %v8222_v63, %v3362_v25  ;;  %v5354_v27 = vpop.f32.mrb[134].mxu0 }
 0x2f2   : > { %5870 = vrcp.f32 %v3569_v2  ;;  %v3570_v17 = vadd.f32 1.0, %v5867_v23  ;;  %v4854_v45 = vmul.f32 -1.442695, %v8238_v6  ;;  %v8245_v4 = vadd.f32 %v5354_v27, %v8222_v63  ;;  %v3365_v55 = vpop.f32.mrb[135].mxu0 }
 0x2f3   : > { %5872 = vrcp.f32 %v3572_v22  ;;  %v4852_v62 = vmul.f32 -1.442695, %v8241_v34  ;;  %v8249_v48 = vadd.f32 %v8222_v63, %v3365_v55 }
 0x2f4   : > { %5874 = vrcp.f32 %v3570_v17  ;;  %v4855_v38 = vmul.f32 -1.442695, %v8245_v4 }
 0x2f5   : > { %5876 = vpow2.f32 %v4854_v45  ;;  %v4853_v41 = vmul.f32 -1.442695, %v8249_v48 }
 0x2f6   : > { %5878 = vpow2.f32 %v4852_v62 }
 0x2f7   : > { %5880 = vpow2.f32 %v4855_v38 }
 0x2f8   : > { %5882 = vpow2.f32 %v4853_v41 }
 0x2fb   : > { %v5869_v52 = vpop.eup %5868 }
 0x2fc   : > { %v5871_v30 = vpop.eup %5870  ;;  %v3667_v13 = vmul.f32 %v5869_v52, %v3355_v54 }
 0x2fd   : > { %v5873_v61 = vpop.eup %5872  ;;  %v3665_v1 = vmul.f32 %v5871_v30, %v3347_v18 }
 0x2fe   : > { %6075 = shalt.err (!%p6072_p11)
}
 0x2ff   : > { %s6076_s25 = scalar_lea.hbm %s8264_s30, 2048  ;;  %s6080_s19 = scalar_lea.hbm %s8631_s11, 8192 }
 0x300   : > { %p6077_p13 = scmp.ne.s32.totalorder %s8264_s30, %s6076_s25  ;;  %p6081_p3 = scmp.lt.u32.totalorder %s8264_s30, %s8631_s11 }
 0x301   : > { %p6082_p8 = scmp.lt.u32.totalorder %s6080_s19, %s6076_s25  ;;  %p6084_p12 = scmp.lt.u32.totalorder %s6076_s25, %s8264_s30 }
 0x302   : > { %p6078_p1 = pnand %p6077_p13, %p8790_p0 }
 0x303   : > { %p6083_p10 = por %p6082_p8, %p6081_p3 }
 0x304   : > { %p6079_p4 = pneg %p6078_p1 }
 0x305   : > { %p6085_p2 = por %p6084_p12, %p6083_p10 }
 0x307   : > { %p6086_p5 = pnand %p6085_p2, %p6079_p4 }
 0x309   : > { %6089 = shalt.err (!%p6086_p5)
}
 0x30a   : > { %s6202_s21 = smov 64   ;;  %s6203_s18 = smov 4   ;;  %v5875_v5 = vpop.eup %5874  ;;  %v3704_v50 = vmul.f32 %v8269_v21, %v3667_v13  ;;  %v3668_v57 = vmul.f32 %v5873_v61, %v8230_v19  ;;  %vm3899_vm2 = vcmask 519168   ;;  %v3702_v36 = vmul.f32 %v8269_v21, %v3665_v1  ;;  %v5357_v37 = vpop.f32.mrb[136].mxu0 }
 0x30b   : > { %5623 = dma.vmem_to_hbm [thread:$0]  (%p8790_p0), %s8271_s23, 2048, %s8264_s30, %s4565_s24, %s6202_s21, %s6202_s21, %s6203_s18   ;;  %v5877_v60 = vpop.eup %5876  ;;  %v3666_v33 = vmul.f32 %v5875_v5, %v8233_v47  ;;  %v8322_v46 = vadd.f32 %v5357_v37, %v8222_v63  ;;  %v3378_v56 = vpop.f32.mrb[137].mxu0 }
 0x30c   : > { %s8791_s27 = sld [smem:[#allocation76_spill]]  ;;  %s4616_s14 = sshll.u32 %s6407_s8, 4  ;;  %v5879_v3 = vpop.eup %5878  ;;  %v3741_v44 = vadd.f32 %v8276_v40, %v3704_v50  ;;  %v3705_v12 = vmul.f32 %v8269_v21, %v3668_v57  ;;  %v3575_v28 = vadd.f32 1.0, %v5877_v60  ;;  %s8317_s14 = int_to_ptr.vmem [resolvable:$true] %s4616_s14 }
 0x30d   : > { %s4579_s8 = scalar_lea.sflag [#allocation8], %s6385_s17  ;;  %s6090_s13 = scalar_lea.vmem %s8317_s14, 2048 }
 0x30e   : > { %p6091_p6 = scmp.ne.s32.totalorder %s8317_s14, %s6090_s13 }
 0x310   : > { %p6092_p7 = pnand %p6091_p6, %p8790_p0 }
 0x312   : > { %s8792_s20 = smov %s8791_s27  ;;  %s8312_s25 = scalar_lea.hbm %s8791_s27, %s4991_s28 }
 0x313   : > { %p6093_p9 = pneg %p6092_p7  ;;  %s6204_s28 = smov [#allocation7]  }
 0x314   : > { %s6094_s23 = sshll.u32 %s6204_s28, 4  ;;  %s6095_s23 = int_to_ptr.vmem [resolvable:$false] %s6094_s23 }
 0x315   : > { %s6096_s30 = scalar_lea.vmem %s6095_s23, 4096  ;;  %p6097_p11 = scmp.lt.s32.totalorder %s8317_s14, %s6095_s23 }
 0x316   : > { %p6098_p13 = scmp.lt.s32.totalorder %s6096_s30, %s6090_s13 }
 0x318   : > { %p6099_p1 = por %p6098_p13, %p6097_p11 }
 0x31a   : > { %p6100_p4 = pnand %p6099_p1, %p6093_p9 }
 0x31c   : > { %6103 = shalt.err (!%p6100_p4)
}
 0x31d   : > { %s6104_s24 = scalar_lea.hbm %s8312_s25, 2048  ;;  %s6108_s15 = scalar_lea.hbm %s8792_s20, 8192 }
 0x31e   : > { %p6105_p3 = scmp.ne.s32.totalorder %s8312_s25, %s6104_s24  ;;  %p6109_p12 = scmp.lt.u32.totalorder %s8312_s25, %s8792_s20 }
 0x31f   : > { %p6110_p2 = scmp.lt.u32.totalorder %s6108_s15, %s6104_s24  ;;  %p6112_p6 = scmp.lt.u32.totalorder %s6104_s24, %s8312_s25 }
 0x320   : > { %p6106_p8 = pnand %p6105_p3, %p8790_p0 }
 0x321   : > { %p6111_p5 = por %p6110_p2, %p6109_p12 }
 0x322   : > { %p6107_p10 = pneg %p6106_p8 }
 0x323   : > { %p6113_p7 = por %p6112_p6, %p6111_p5 }
 0x325   : > { %p6114_p9 = pnand %p6113_p7, %p6107_p10 }
 0x327   : > { %6117 = shalt.err (!%p6114_p9)
}
 0x328   : > { %5624 = dma.vmem_to_hbm [thread:$0]  (%p8790_p0), %s8317_s14, 2048, %s8312_s25, %s4579_s8, %s6202_s21, %s6202_s21, %s6203_s18   ;;  %v5881_v26 = vpop.eup %5880  ;;  %v3739_v42 = vadd.f32 %v8276_v40, %v3702_v36  ;;  %v3703_v43 = vmul.f32 %v8269_v21, %v3666_v33  ;;  %v3573_v49 = vadd.f32 1.0, %v5879_v3  ;;  %v8354_v59 = vadd.f32 %v8222_v63, %v3378_v56  ;;  %v5358_v58 = vpop.f32.mrb[138].mxu0 }
 0x329   : > { %v5883_v51 = vpop.eup %5882  ;;  %v5031_v15 = vpack.c.bf16 %v3741_v44, %v3741_v44  ;;  %v3742_v24 = vadd.f32 %v8276_v40, %v3705_v12  ;;  %5884 = vrcp.f32 %v3575_v28  ;;  %v3576_v16 = vadd.f32 1.0, %v5881_v26  ;;  %v3381_v0 = vpop.f32.mrb[139].mxu0 }
 0x32a   : > { %v5029_v32 = vpack.c.bf16 %v3739_v42, %v3739_v42  ;;  %v3740_v54 = vadd.f32 %v8276_v40, %v3703_v43  ;;  %5886 = vrcp.f32 %v3573_v49  ;;  %v3574_v20 = vadd.f32 1.0, %v5883_v51  ;;  %v5361_v23 = vpop.f32.mrb[140].mxu0 }
 0x32b   : > { %3902 = vst.msk [vmem:[%s6403_s26 + $0x8] sm:$0xf] %vm3899_vm2, %v5031_v15  ;;  %v5032_v18 = vpack.c.bf16 %v3742_v24, %v3742_v24  ;;  %5888 = vrcp.f32 %v3576_v16  ;;  %v4858_v39 = vmul.f32 -1.442695, %v8322_v46  ;;  %v4856_v9 = vmul.f32 -1.442695, %v8354_v59 }
 0x32c   : > { %3900 = vst.msk [vmem:[%s6403_s26] sm:$0xf] %vm3899_vm2, %v5029_v32  ;;  %v5030_v19 = vpack.c.bf16 %v3740_v54, %v3740_v54  ;;  %5890 = vrcp.f32 %v3574_v20  ;;  %v8365_v53 = vadd.f32 %v5358_v58, %v8222_v63  ;;  %v8368_v29 = vadd.f32 %v8222_v63, %v3381_v0  ;;  %v3394_v55 = vpop.f32.mrb[141].mxu0 }
 0x32d   : > { %3903 = vst.msk [vmem:[%s6403_s26 + $0xc] sm:$0xf] %vm3899_vm2, %v5032_v18  ;;  %5892 = vpow2.f32 %v4858_v39  ;;  %v8383_v45 = vadd.f32 %v5361_v23, %v8222_v63  ;;  %v8388_v41 = vadd.f32 %v8222_v63, %v3394_v55 }
 0x32e   : > { %3901 = vst.msk [vmem:[%s6403_s26 + $0x4] sm:$0xf] %vm3899_vm2, %v5030_v19  ;;  %5894 = vpow2.f32 %v4856_v9  ;;  %v4859_v47 = vmul.f32 -1.442695, %v8365_v53  ;;  %v4857_v35 = vmul.f32 -1.442695, %v8368_v29 }
 0x32f   : > { %v4862_v13 = vmul.f32 -1.442695, %v8383_v45  ;;  %v4860_v57 = vmul.f32 -1.442695, %v8388_v41 }
 0x330   : > { %5896 = vpow2.f32 %v4859_v47 }
 0x331   : > { %5898 = vpow2.f32 %v4857_v35 }
 0x333   : > { %v5885_v10 = vpop.eup %5884 }
 0x334   : > { %v5887_v8 = vpop.eup %5886  ;;  %v3671_v31 = vmul.f32 %v5885_v10, %v8238_v6 }
 0x335   : > { %v5889_v14 = vpop.eup %5888  ;;  %v3669_v7 = vmul.f32 %v5887_v8, %v8241_v34 }
 0x336   : > { %v5891_v11 = vpop.eup %5890  ;;  %v3708_v2 = vmul.f32 %v8269_v21, %v3671_v31  ;;  %v3672_v25 = vmul.f32 %v5889_v14, %v8245_v4  ;;  %v5362_v4 = vpop.f32.mrb[142].mxu0 }
 0x337   : > { %v5893_v22 = vpop.eup %5892  ;;  %v3706_v27 = vmul.f32 %v8269_v21, %v3669_v7  ;;  %v3670_v17 = vmul.f32 %v5891_v11, %v8249_v48  ;;  %v3397_v61 = vpop.f32.mrb[143].mxu0  ;;  %v8399_v12 = vadd.f32 %v5362_v4, %v8222_v63 }
 0x338   : > { %v5895_v62 = vpop.eup %5894  ;;  %v3745_v6 = vadd.f32 %v8276_v40, %v3708_v2  ;;  %v3709_v34 = vmul.f32 %v8269_v21, %v3672_v25  ;;  %v3579_v38 = vadd.f32 1.0, %v5893_v22  ;;  %v8404_v56 = vadd.f32 %v8222_v63, %v3397_v61  ;;  %v5365_v24 = vpop.f32.mrb[144].mxu0 }
 0x339   : > { %v3743_v52 = vadd.f32 %v8276_v40, %v3706_v27  ;;  %v3707_v30 = vmul.f32 %v8269_v21, %v3670_v17  ;;  %v3577_v48 = vadd.f32 1.0, %v5895_v62  ;;  %v4863_v26 = vmul.f32 -1.442695, %v8399_v12  ;;  %v3410_v20 = vpop.f32.mrb[145].mxu0 }
 0x33a   : > { %v5897_v1 = vpop.eup %5896  ;;  %v5035_v5 = vpack.c.bf16 %v3745_v6, %v3745_v6  ;;  %v3746_v50 = vadd.f32 %v8276_v40, %v3709_v34  ;;  %5900 = vrcp.f32 %v3579_v38  ;;  %v4861_v42 = vmul.f32 -1.442695, %v8404_v56 }
 0x33b   : > { %v5899_v60 = vpop.eup %5898  ;;  %v5033_v36 = vpack.c.bf16 %v3743_v52, %v3743_v52  ;;  %v3744_v33 = vadd.f32 %v8276_v40, %v3707_v30  ;;  %5902 = vrcp.f32 %v3577_v48  ;;  %v3580_v37 = vadd.f32 1.0, %v5897_v1 }
 0x33c   : > { %3906 = vst.msk [vmem:[%s6403_s26 + $0x18] sm:$0xf] %vm3899_vm2, %v5035_v5  ;;  %v5036_v3 = vpack.c.bf16 %v3746_v50, %v3746_v50  ;;  %v3578_v44 = vadd.f32 1.0, %v5899_v60  ;;  %5904 = vpow2.f32 %v4862_v13  ;;  %v8416_v54 = vadd.f32 %v5365_v24, %v8222_v63 }
 0x33d   : > { %3904 = vst.msk [vmem:[%s6403_s26 + $0x10] sm:$0xf] %vm3899_vm2, %v5033_v36  ;;  %v5034_v28 = vpack.c.bf16 %v3744_v33, %v3744_v33  ;;  %5906 = vrcp.f32 %v3580_v37  ;;  %v8421_v19 = vadd.f32 %v8222_v63, %v3410_v20 }
 0x33e   : > { %3907 = vst.msk [vmem:[%s6403_s26 + $0x1c] sm:$0xf] %vm3899_vm2, %v5036_v3  ;;  %5908 = vrcp.f32 %v3578_v44  ;;  %v4866_v10 = vmul.f32 -1.442695, %v8416_v54 }
 0x33f   : > { %3905 = vst.msk [vmem:[%s6403_s26 + $0x14] sm:$0xf] %vm3899_vm2, %v5034_v28  ;;  %5910 = vpow2.f32 %v4860_v57  ;;  %v4864_v11 = vmul.f32 -1.442695, %v8421_v19 }
 0x340   : > { %5912 = vpow2.f32 %v4863_v26 }
 0x341   : > { %5914 = vpow2.f32 %v4861_v42 }
 0x344   : > { %v5901_v43 = vpop.eup %5900 }
 0x345   : > { %v5903_v49 = vpop.eup %5902  ;;  %v3675_v58 = vmul.f32 %v5901_v43, %v8322_v46  ;;  %v5366_v46 = vpop.f32.mrb[146].mxu0 }
 0x346   : > { %v5905_v51 = vpop.eup %5904  ;;  %v3673_v15 = vmul.f32 %v5903_v49, %v8354_v59  ;;  %v3413_v8 = vpop.f32.mrb[147].mxu0  ;;  %v8435_v62 = vadd.f32 %v5366_v46, %v8222_v63 }
 0x347   : > { %v5907_v16 = vpop.eup %5906  ;;  %v3712_v0 = vmul.f32 %v8269_v21, %v3675_v58  ;;  %v3583_v32 = vadd.f32 1.0, %v5905_v51  ;;  %v8438_v6 = vadd.f32 %v8222_v63, %v3413_v8  ;;  %v5369_v50 = vpop.f32.mrb[148].mxu0 }
 0x348   : > { %v5909_v18 = vpop.eup %5908  ;;  %v3710_v39 = vmul.f32 %v8269_v21, %v3673_v15  ;;  %v3676_v9 = vmul.f32 %v5907_v16, %v8365_v53  ;;  %v4867_v4 = vmul.f32 -1.442695, %v8435_v62  ;;  %v8452_v36 = vadd.f32 %v5369_v50, %v8222_v63  ;;  %v3426_v33 = vpop.f32.mrb[149].mxu0 }
 0x349   : > { %v5911_v47 = vpop.eup %5910  ;;  %v3749_v59 = vadd.f32 %v8276_v40, %v3712_v0  ;;  %v3674_v35 = vmul.f32 %v5909_v18, %v8368_v29  ;;  %5916 = vrcp.f32 %v3583_v32  ;;  %v4865_v52 = vmul.f32 -1.442695, %v8438_v6  ;;  %v5370_v28 = vpop.f32.mrb[150].mxu0 }
 0x34a   : > { %v5913_v31 = vpop.eup %5912  ;;  %v3747_v14 = vadd.f32 %v8276_v40, %v3710_v39  ;;  %v3713_v7 = vmul.f32 %v8269_v21, %v3676_v9  ;;  %v3581_v53 = vadd.f32 1.0, %v5911_v47  ;;  %5918 = vpow2.f32 %v4866_v10  ;;  %v3429_v58 = vpop.f32.mrb[151].mxu0 }
 0x34b   : > { %v5915_v2 = vpop.eup %5914  ;;  %v5039_v25 = vpack.c.bf16 %v3749_v59, %v3749_v59  ;;  %v3711_v23 = vmul.f32 %v8269_v21, %v3674_v35  ;;  %v3584_v22 = vadd.f32 1.0, %v5913_v31  ;;  %v4870_v43 = vmul.f32 -1.442695, %v8452_v36 }
 0x34c   : > { %v5037_v29 = vpack.c.bf16 %v3747_v14, %v3747_v14  ;;  %v3750_v27 = vadd.f32 %v8276_v40, %v3713_v7  ;;  %5920 = vrcp.f32 %v3581_v53  ;;  %v3582_v17 = vadd.f32 1.0, %v5915_v2 }
 0x34d   : > { %3910 = vst.msk [vmem:[%s6403_s26 + $0x28] sm:$0xf] %vm3899_vm2, %v5039_v25  ;;  %v3748_v55 = vadd.f32 %v8276_v40, %v3711_v23  ;;  %5922 = vrcp.f32 %v3584_v22  ;;  %v8463_v49 = vadd.f32 %v5370_v28, %v8222_v63  ;;  %v8474_v9 = vadd.f32 %v8222_v63, %v3429_v58  ;;  %v5373_v25 = vpop.f32.mrb[152].mxu0 }
 0x34e   : > { %3908 = vst.msk [vmem:[%s6403_s26 + $0x20] sm:$0xf] %vm3899_vm2, %v5037_v29  ;;  %v5040_v34 = vpack.c.bf16 %v3750_v27, %v3750_v27  ;;  %5924 = vrcp.f32 %v3582_v17  ;;  %v8489_v27 = vadd.f32 %v5373_v25, %v8222_v63  ;;  %v3442_v17 = vpop.f32.mrb[153].mxu0 }
 0x34f   : > { %v5038_v38 = vpack.c.bf16 %v3748_v55, %v3748_v55  ;;  %5926 = vpow2.f32 %v4864_v11  ;;  %v4869_v10 = vmul.f32 -1.442695, %v8474_v9 }
 0x350   : > { %3911 = vst.msk [vmem:[%s6403_s26 + $0x2c] sm:$0xf] %vm3899_vm2, %v5040_v34  ;;  %5928 = vpow2.f32 %v4867_v4 }
 0x351   : > { %3909 = vst.msk [vmem:[%s6403_s26 + $0x24] sm:$0xf] %vm3899_vm2, %v5038_v38  ;;  %5930 = vpow2.f32 %v4865_v52  ;;  %v5374_v38 = vpop.f32.mrb[154].mxu0 }
 0x352   : > { %v8500_v50 = vadd.f32 %v5374_v38, %v8222_v63 }
 0x353   : > { %v5917_v30 = vpop.eup %5916 }
 0x354   : > { %v3679_v48 = vmul.f32 %v5917_v30, %v8383_v45  ;;  %v5919_v13 = vpop.eup %5918  ;;  %v8457_v45 = vadd.f32 %v8222_v63, %v3426_v33 }
 0x355   : > { %v3587_v5 = vadd.f32 1.0, %v5919_v13  ;;  %v3445_v13 = vpop.f32.mrb[155].mxu0 }
 0x356   : > { %v5921_v61 = vpop.eup %5920  ;;  %v3716_v1 = vmul.f32 %v8269_v21, %v3679_v48  ;;  %v4868_v24 = vmul.f32 -1.442695, %v8457_v45 }
 0x357   : > { %v5923_v57 = vpop.eup %5922  ;;  %v3677_v60 = vmul.f32 %v5921_v61, %v8388_v41  ;;  %5932 = vrcp.f32 %v3587_v5 }
 0x358   : > { %v5925_v37 = vpop.eup %5924  ;;  %v3753_v3 = vadd.f32 %v8276_v40, %v3716_v1  ;;  %v3680_v44 = vmul.f32 %v5923_v57, %v8399_v12  ;;  %5934 = vpow2.f32 %v4870_v43 }
 0x359   : > { %v5927_v26 = vpop.eup %5926  ;;  %v3714_v42 = vmul.f32 %v8269_v21, %v3677_v60  ;;  %v3678_v41 = vmul.f32 %v5925_v37, %v8404_v56  ;;  %v4871_v56 = vmul.f32 -1.442695, %v8463_v49 }
 0x35a   : > { %v5043_v51 = vpack.c.bf16 %v3753_v3, %v3753_v3  ;;  %v3717_v12 = vmul.f32 %v8269_v21, %v3680_v44  ;;  %v3585_v15 = vadd.f32 1.0, %v5927_v26  ;;  %v5929_v16 = vpop.eup %5928  ;;  %v4875_v3 = vmul.f32 -1.442695, %v8500_v50 }
 0x35b   : > { %v3751_v0 = vadd.f32 %v8276_v40, %v3714_v42  ;;  %v3715_v32 = vmul.f32 %v8269_v21, %v3678_v41  ;;  %v5931_v20 = vpop.eup %5930  ;;  %v3588_v39 = vadd.f32 1.0, %v5929_v16  ;;  %v8510_v26 = vadd.f32 %v8222_v63, %v3445_v13 }
 0x35c   : > { %3914 = vst.msk [vmem:[%s6403_s26 + $0x38] sm:$0xf] %vm3899_vm2, %v5043_v51  ;;  %v3754_v18 = vadd.f32 %v8276_v40, %v3717_v12  ;;  %5936 = vrcp.f32 %v3585_v15  ;;  %v3586_v59 = vadd.f32 1.0, %v5931_v20  ;;  %v5377_v20 = vpop.f32.mrb[156].mxu0 }
 0x35d   : > { %v5041_v46 = vpack.c.bf16 %v3751_v0, %v3751_v0  ;;  %v3752_v47 = vadd.f32 %v8276_v40, %v3715_v32  ;;  %5938 = vpow2.f32 %v4868_v24  ;;  %v4873_v43 = vmul.f32 -1.442695, %v8510_v26 }
 0x35e   : > { %v5044_v35 = vpack.c.bf16 %v3754_v18, %v3754_v18  ;;  %5940 = vrcp.f32 %v3588_v39 }
 0x35f   : > { %3912 = vst.msk [vmem:[%s6403_s26 + $0x30] sm:$0xf] %vm3899_vm2, %v5041_v46  ;;  %v5042_v8 = vpack.c.bf16 %v3752_v47, %v3752_v47  ;;  %5942 = vrcp.f32 %v3586_v59  ;;  %v8526_v59 = vadd.f32 %v5377_v20, %v8222_v63 }
 0x360   : > { %3915 = vst.msk [vmem:[%s6403_s26 + $0x3c] sm:$0xf] %vm3899_vm2, %v5044_v35  ;;  %5944 = vpow2.f32 %v4871_v56  ;;  %v3458_v35 = vpop.f32.mrb[157].mxu0 }
 0x361   : > { %3913 = vst.msk [vmem:[%s6403_s26 + $0x34] sm:$0xf] %vm3899_vm2, %v5042_v8  ;;  %5946 = vpow2.f32 %v4869_v10  ;;  %v5933_v31 = vpop.eup %5932  ;;  %v5378_v8 = vpop.f32.mrb[158].mxu0 }
 0x362   : > { %v3683_v14 = vmul.f32 %v5933_v31, %v8416_v54  ;;  %v5935_v7 = vpop.eup %5934  ;;  %v8492_v54 = vadd.f32 %v8222_v63, %v3442_v17 }
 0x363   : > { %v3591_v2 = vadd.f32 1.0, %v5935_v7 }
 0x364   : > { %v3720_v53 = vmul.f32 %v8269_v21, %v3683_v14  ;;  %v4872_v5 = vmul.f32 -1.442695, %v8492_v54 }
 0x365   : > { %5948 = vrcp.f32 %v3591_v2 }
 0x366   : > { %v5937_v11 = vpop.eup %5936  ;;  %v3757_v22 = vadd.f32 %v8276_v40, %v3720_v53 }
 0x367   : > { %v5939_v23 = vpop.eup %5938  ;;  %v3681_v29 = vmul.f32 %v5937_v11, %v8421_v19  ;;  %v4874_v19 = vmul.f32 -1.442695, %v8489_v27  ;;  %v3461_v11 = vpop.f32.mrb[159].mxu0 }
 0x368   : > { %v5941_v55 = vpop.eup %5940  ;;  %v3589_v34 = vadd.f32 1.0, %v5939_v23  ;;  %v5047_v52 = vpack.c.bf16 %v3757_v22, %v3757_v22  ;;  %v4878_v23 = vmul.f32 -1.442695, %v8526_v59 }
 0x369   : > { %v5943_v4 = vpop.eup %5942  ;;  %v3718_v30 = vmul.f32 %v8269_v21, %v3681_v29  ;;  %v3684_v48 = vmul.f32 %v5941_v55, %v8435_v62  ;;  %v3470_v55 = vadd.f32 %v5378_v8, %v8222_v63 }
 0x36a   : > { %v5945_v61 = vpop.eup %5944  ;;  %v3682_v1 = vmul.f32 %v5943_v4, %v8438_v6  ;;  %5950 = vrcp.f32 %v3589_v34  ;;  %3918 = vst.msk [vmem:[%s6403_s26 + $0x48] sm:$0xf] %vm3899_vm2, %v5047_v52 }
 0x36b   : > { %v5947_v57 = vpop.eup %5946  ;;  %v3755_v60 = vadd.f32 %v8276_v40, %v3718_v30  ;;  %v3721_v62 = vmul.f32 %v8269_v21, %v3684_v48  ;;  %v3592_v33 = vadd.f32 1.0, %v5945_v61  ;;  %5952 = vpow2.f32 %v4874_v19 }
 0x36c   : > { %v3719_v37 = vmul.f32 %v8269_v21, %v3682_v1  ;;  %v3590_v6 = vadd.f32 1.0, %v5947_v57  ;;  %5954 = vpow2.f32 %v4872_v5  ;;  %v4879_v52 = vmul.f32 -1.442695, %v3470_v55 }
 0x36d   : > { %v5045_v44 = vpack.c.bf16 %v3755_v60, %v3755_v60  ;;  %v3758_v28 = vadd.f32 %v8276_v40, %v3721_v62  ;;  %5956 = vrcp.f32 %v3592_v33 }
 0x36e   : > { %v3756_v42 = vadd.f32 %v8276_v40, %v3719_v37  ;;  %5958 = vrcp.f32 %v3590_v6 }
 0x36f   : > { %3916 = vst.msk [vmem:[%s6403_s26 + $0x40] sm:$0xf] %vm3899_vm2, %v5045_v44  ;;  %v5048_v41 = vpack.c.bf16 %v3758_v28, %v3758_v28  ;;  %5960 = vpow2.f32 %v4875_v3  ;;  %v5949_v51 = vpop.eup %5948 }
 0x370   : > { %v5046_v58 = vpack.c.bf16 %v3756_v42, %v3756_v42  ;;  %5962 = vpow2.f32 %v4873_v43  ;;  %v3687_v12 = vmul.f32 %v5949_v51, %v8452_v36 }
 0x371   : > { %3919 = vst.msk [vmem:[%s6403_s26 + $0x4c] sm:$0xf] %vm3899_vm2, %v5048_v41 }
 0x372   : > { %3917 = vst.msk [vmem:[%s6403_s26 + $0x44] sm:$0xf] %vm3899_vm2, %v5046_v58  ;;  %v3724_v16 = vmul.f32 %v8269_v21, %v3687_v12 }
 0x374   : > { %v5951_v15 = vpop.eup %5950  ;;  %v3761_v39 = vadd.f32 %v8276_v40, %v3724_v16 }
 0x375   : > { %v5953_v24 = vpop.eup %5952  ;;  %v3685_v0 = vmul.f32 %v5951_v15, %v8457_v45  ;;  %v8530_v45 = vadd.f32 %v8222_v63, %v3458_v35 }
 0x376   : > { %v5955_v32 = vpop.eup %5954  ;;  %v3595_v56 = vadd.f32 1.0, %v5953_v24  ;;  %v5051_v14 = vpack.c.bf16 %v3761_v39, %v3761_v39 }
 0x377   : > { %v5957_v18 = vpop.eup %5956  ;;  %v3722_v46 = vmul.f32 %v8269_v21, %v3685_v0  ;;  %v3593_v47 = vadd.f32 1.0, %v5955_v32 }
 0x378   : > { %v5959_v36 = vpop.eup %5958  ;;  %v3688_v10 = vmul.f32 %v5957_v18, %v8463_v49  ;;  %5964 = vrcp.f32 %v3595_v56  ;;  %v4876_v49 = vmul.f32 -1.442695, %v8530_v45  ;;  %3922 = vst.msk [vmem:[%s6403_s26 + $0x58] sm:$0xf] %vm3899_vm2, %v5051_v14 }
 0x379   : > { %v5961_v31 = vpop.eup %5960  ;;  %v3759_v7 = vadd.f32 %v8276_v40, %v3722_v46  ;;  %v3686_v53 = vmul.f32 %v5959_v36, %v8474_v9  ;;  %5966 = vrcp.f32 %v3593_v47  ;;  %v8542_v9 = vadd.f32 %v8222_v63, %v3461_v11 }
 0x37a   : > { %v3725_v2 = vmul.f32 %v8269_v21, %v3688_v10  ;;  %v3596_v25 = vadd.f32 1.0, %v5961_v31  ;;  %v5963_v22 = vpop.eup %5962 }
 0x37b   : > { %v5049_v29 = vpack.c.bf16 %v3759_v7, %v3759_v7  ;;  %v3723_v17 = vmul.f32 %v8269_v21, %v3686_v53  ;;  %v3594_v38 = vadd.f32 1.0, %v5963_v22  ;;  %v4877_v30 = vmul.f32 -1.442695, %v8542_v9 }
 0x37c   : > { %v3762_v34 = vadd.f32 %v8276_v40, %v3725_v2  ;;  %5968 = vrcp.f32 %v3596_v25 }
 0x37d   : > { %3920 = vst.msk [vmem:[%s6403_s26 + $0x50] sm:$0xf] %vm3899_vm2, %v5049_v29  ;;  %v3760_v4 = vadd.f32 %v8276_v40, %v3723_v17  ;;  %5970 = vpow2.f32 %v4878_v23 }
 0x37e   : > { %v5052_v48 = vpack.c.bf16 %v3762_v34, %v3762_v34  ;;  %5972 = vrcp.f32 %v3594_v38 }
 0x37f   : > { %v5050_v19 = vpack.c.bf16 %v3760_v4, %v3760_v4  ;;  %5974 = vpow2.f32 %v4876_v49 }
 0x380   : > { %3923 = vst.msk [vmem:[%s6403_s26 + $0x5c] sm:$0xf] %vm3899_vm2, %v5052_v48  ;;  %5976 = vpow2.f32 %v4879_v52 }
 0x381   : > { %3921 = vst.msk [vmem:[%s6403_s26 + $0x54] sm:$0xf] %vm3899_vm2, %v5050_v19  ;;  %5978 = vpow2.f32 %v4877_v30 }
 0x382   : > { %v5965_v63 = vpop.eup %5964 }
 0x383   : > { %v5967_v13 = vpop.eup %5966  ;;  %v3691_v61 = vmul.f32 %v5965_v63, %v8489_v27 }
 0x384   : > { %v3689_v1 = vmul.f32 %v5967_v13, %v8492_v54 }
 0x385   : > { %v3728_v5 = vmul.f32 %v8269_v21, %v3691_v61 }
 0x386   : > { %v5969_v57 = vpop.eup %5968  ;;  %v3726_v60 = vmul.f32 %v8269_v21, %v3689_v1 }
 0x387   : > { %v5971_v62 = vpop.eup %5970  ;;  %v3765_v33 = vadd.f32 %v8276_v40, %v3728_v5  ;;  %v3692_v37 = vmul.f32 %v5969_v57, %v8500_v50 }
 0x388   : > { %v5973_v6 = vpop.eup %5972  ;;  %v3763_v3 = vadd.f32 %v8276_v40, %v3726_v60  ;;  %v3599_v44 = vadd.f32 1.0, %v5971_v62 }
 0x389   : > { %v5975_v28 = vpop.eup %5974  ;;  %v5055_v27 = vpack.c.bf16 %v3765_v33, %v3765_v33  ;;  %v3729_v54 = vmul.f32 %v8269_v21, %v3692_v37  ;;  %v3690_v42 = vmul.f32 %v5973_v6, %v8510_v26 }
 0x38a   : > { %v5977_v41 = vpop.eup %5976  ;;  %v5053_v43 = vpack.c.bf16 %v3763_v3, %v3763_v3  ;;  %5980 = vrcp.f32 %v3599_v44  ;;  %v3597_v58 = vadd.f32 1.0, %v5975_v28 }
 0x38b   : > { %v5979_v51 = vpop.eup %5978  ;;  %3926 = vst.msk [vmem:[%s6403_s26 + $0x68] sm:$0xf] %vm3899_vm2, %v5055_v27  ;;  %v3766_v50 = vadd.f32 %v8276_v40, %v3729_v54  ;;  %v3727_v12 = vmul.f32 %v8269_v21, %v3690_v42  ;;  %v3600_v15 = vadd.f32 1.0, %v5977_v41 }
 0x38c   : > { %3924 = vst.msk [vmem:[%s6403_s26 + $0x60] sm:$0xf] %vm3899_vm2, %v5053_v43  ;;  %5982 = vrcp.f32 %v3597_v58  ;;  %v3598_v24 = vadd.f32 1.0, %v5979_v51 }
 0x38d   : > { %v5056_v16 = vpack.c.bf16 %v3766_v50, %v3766_v50  ;;  %v3764_v26 = vadd.f32 %v8276_v40, %v3727_v12  ;;  %5984 = vrcp.f32 %v3600_v15 }
 0x38e   : > { %5986 = vrcp.f32 %v3598_v24 }
 0x38f   : > { %3927 = vst.msk [vmem:[%s6403_s26 + $0x6c] sm:$0xf] %vm3899_vm2, %v5056_v16  ;;  %v5054_v0 = vpack.c.bf16 %v3764_v26, %v3764_v26 }
 0x391   : > { %3925 = vst.msk [vmem:[%s6403_s26 + $0x64] sm:$0xf] %vm3899_vm2, %v5054_v0 }
 0x394   : > { %v5981_v32 = vpop.eup %5980 }
 0x395   : > { %v3695_v56 = vmul.f32 %v5981_v32, %v8526_v59 }
 0x396   : > { %v5983_v20 = vpop.eup %5982 }
 0x397   : > { %v5985_v18 = vpop.eup %5984  ;;  %v3732_v39 = vmul.f32 %v8269_v21, %v3695_v56  ;;  %v3693_v46 = vmul.f32 %v5983_v20, %v8530_v45 }
 0x398   : > { %v5987_v47 = vpop.eup %5986  ;;  %v3696_v35 = vmul.f32 %v5985_v18, %v3470_v55 }
 0x399   : > { %v3769_v36 = vadd.f32 %v8276_v40, %v3732_v39  ;;  %v3730_v10 = vmul.f32 %v8269_v21, %v3693_v46  ;;  %v3694_v8 = vmul.f32 %v5987_v47, %v8542_v9 }
 0x39a   : > { %v3733_v31 = vmul.f32 %v8269_v21, %v3696_v35 }
 0x39b   : > { %v5059_v59 = vpack.c.bf16 %v3769_v36, %v3769_v36  ;;  %v3767_v14 = vadd.f32 %v8276_v40, %v3730_v10  ;;  %v3731_v7 = vmul.f32 %v8269_v21, %v3694_v8 }
 0x39c   : > { %v3770_v53 = vadd.f32 %v8276_v40, %v3733_v31 }
 0x39d   : > { %3930 = vst.msk [vmem:[%s6403_s26 + $0x78] sm:$0xf] %vm3899_vm2, %v5059_v59  ;;  %v5057_v45 = vpack.c.bf16 %v3767_v14, %v3767_v14  ;;  %v3768_v11 = vadd.f32 %v8276_v40, %v3731_v7 }
 0x39e   : > { %v5060_v2 = vpack.c.bf16 %v3770_v53, %v3770_v53 }
 0x39f   : > { %3928 = vst.msk [vmem:[%s6403_s26 + $0x70] sm:$0xf] %vm3899_vm2, %v5057_v45  ;;  %v5058_v25 = vpack.c.bf16 %v3768_v11, %v3768_v11 }
 0x3a0   : > { %3931 = vst.msk [vmem:[%s6403_s26 + $0x7c] sm:$0xf] %vm3899_vm2, %v5060_v2 }
 0x3a1   : > { %3929 = vst.msk [vmem:[%s6403_s26 + $0x74] sm:$0xf] %vm3899_vm2, %v5058_v25 }
 0x3a2 PF: > { %s8793_s22 = sld [smem:[#allocation17_spill]]  ;;  %s8794_s17 = sld [smem:[#allocation12_spill]] }
 0x3a3   : > { %s8795_s21 = sld [smem:[#allocation20_spill]] }
 0x3a8   : > { %p5640_p0 = scmp.ge.s32.totalorder %s8793_s22, 2  ;;  %s4631_s18 = sand.u32 1, %s8794_s17  }
 0x3a9   : > { %p8796_p11 = scmp.ne.s32.totalorder %s8795_s21, 0  ;;  %s4632_s27 = scalar_lea.sflag [#allocation5], %s4631_s18 }
 0x3ab   : > { %p5632_p13 = pnand %p5640_p0, %p8796_p11 }
 0x3ad   : > { %6155 = dma.done.wait (!%p5632_p13), %s4632_s27, 2048  }
 0x3ae   : > { %6157 = vsyncadd (!%p5632_p13), %s4632_s27, 4294965248  ;;  %s4653_s25 = scalar_lea.sflag [#allocation8], %s4631_s18 }
 0x3af   : > { %6159 = dma.done.wait (!%p5632_p13), %s4653_s25, 2048  }
 0x3b0   : > { %6161 = vsyncadd (!%p5632_p13), %s4653_s25, 4294965248  ;;  %s31_s15 = sadd.s32 1, %s8793_s22   ;;  %s8797_s25 = sld [smem:[#allocation13_spill]] }
 0x3b1   : > { %p28_p1 = scmp.ge.s32.totalorder %s31_s15, 6   ;;  %s8798_s26 = sld [smem:[#allocation14_spill]] }
 0x3b2   : > { %s8799_s27 = sld [smem:[#allocation21_spill]]  ;;  %s8800_s28 = sld [smem:[#allocation15_spill]] }
 0x3b3   : > { %s8801_s29 = sld [smem:[#allocation16_spill]]  ;;  %s8802_s30 = sld [smem:[#allocation18_spill]] }
 0x3b4   : > { %s8803_s14 = sld [smem:[#allocation19_spill]]  ;;  %30 = sbr.rel (!%p28_p1) target bundleno = 12 (0xc), region = 137 }
 0x3bb   :  { %4658 = vsyncpa [#allocation4], 1 }
 0x3bc   :  { %4660 = vsyncpa [#allocation4 + $0x1], 1 }
 0x3bd   :  { %4661 = vsyncpa [#allocation5], 1 }
 0x3be   :  { %4663 = vsyncpa [#allocation5 + $0x1], 1 }
 0x3bf   :  { %4664 = vsyncpa [#allocation8], 1 }
 0x3c0   :  { %4666 = vsyncpa [#allocation8 + $0x1], 1 }

</bundles_post_ra>
